<compile_context>
chip_gen: v7x
topology: tpu7x:2x2x1
jax: 0.10.0
libtpu: 0.0.40
codegen_flags: <defaults>
</compile_context>

<pallas_src>
import functools

import jax
import jax.numpy as jnp
from jax.experimental import pallas as pl
from jax.experimental.pallas import tpu as pltpu

EPS = 1e-3  # eps used by both GroupNorm and BatchNorm in the module


# ----------------------------- in-kernel helpers -----------------------------

def _mish(x):
    # x * tanh(softplus(x));  tanh(log(t)) = (t^2 - 1) / (t^2 + 1), t = 1 + e^x.
    # Clamp before exp: for x > 20 the tanh factor is exactly 1.0 in f32 and
    # the clamp removes the overflow hazard.  Exact division (kernel is
    # overhead-bound, so the extra EUP/VPU cost is not measurable).
    e = jnp.exp(jnp.minimum(x, 20.0))
    t = 1.0 + e
    n = t * t
    return x * (n - 1.0) / (n + 1.0)


def _group_norm_t(y, m_grp, gamma, beta, eps=EPS):
    """Two-pass GroupNorm on a channels-first (C, HW) tile.

    m_grp: (C, C) block-diagonal group-averaging matrix (precomputed constant).
    gamma/beta: (C, 1).  Centered variance (no E[x^2]-mean^2 cancellation).
    """
    ch_mean = jnp.mean(y, axis=1, keepdims=True)                         # (C, 1)
    g_mean = jnp.dot(m_grp, ch_mean, preferred_element_type=jnp.float32)  # (C, 1)
    yc = y - g_mean
    ch_var = jnp.mean(yc * yc, axis=1, keepdims=True)                    # (C, 1)
    g_var = jnp.dot(m_grp, ch_var, preferred_element_type=jnp.float32)   # (C, 1)
    inv = jax.lax.rsqrt(g_var + eps)
    return yc * (inv * gamma) + beta


# ------------------------------- Pallas kernel --------------------------------

def make_oneblock_kernel(H, W, C, r, k):
    """Fused Cardinal_Block x k + Split_Attention + final 1x1 conv/BN + residual.

    Grid is (N,): one grid step = one full sample on a lane-dense (Cin, HW)
    tile.  The k cardinals are statically unrolled inside the body; their
    attention outputs are concatenated and pushed through a single final
    (Cin, Cin) @ (Cin, HW) matmul.
    """
    HW = H * W
    Cr = C * r
    inner = 2 * C

    # offsets into the packed per-cardinal parameter vector (see pack_params)
    o_g1g, o_g1b = 0, C
    o_g3g, o_g3b = 2 * C, 2 * C + Cr
    o_bd1 = 2 * C + 2 * Cr
    o_bsc = 4 * C + 2 * Cr
    o_bsh = 6 * C + 2 * Cr
    o_bd2 = 8 * C + 2 * Cr

    def kernel(x_ref, masks_ref, w1_ref, mc_ref, w3_ref, mcr_ref,
               wd1_ref, wd2_ref, wf_ref, vecs_ref, bnf_ref, out_ref):
        x_full = x_ref[...].astype(jnp.float32)           # (Cin, HW)
        masks = masks_ref[...]                            # (9, HW) 0/1 f32
        mc = mc_ref[...]                                  # (C, C)
        mcr = mcr_ref[...]                                # (Cr, Cr)

        att_list = []
        for i in range(k):                                # static unroll over cardinals
            x = x_full[i * C:(i + 1) * C, :]              # (C, HW)
            vec = vecs_ref[i]                             # (P, 1) packed params

            # ---- cardinal conv1: grouped 1x1 conv (dense block-diag) + GN + Mish
            y1 = jnp.dot(w1_ref[i], x, preferred_element_type=jnp.float32)   # (C, HW)
            y1 = _mish(_group_norm_t(y1, mc,
                                     vec[o_g1g:o_g1g + C, :],
                                     vec[o_g1b:o_g1b + C, :]))

            # ---- cardinal conv3: grouped 3x3 "same" conv as ONE im2col matmul
            taps = []
            for dy in range(3):
                for dx in range(3):
                    t = dy * 3 + dx
                    off = (dy - 1) * W + (dx - 1)
                    if off == 0:
                        taps.append(y1)
                    else:
                        rolled = pltpu.roll(y1, shift=(-off) % HW, axis=1)
                        taps.append(rolled * masks[t:t + 1, :])
            stacked = jnp.concatenate(taps, axis=0)                          # (9C, HW)
            y3 = jnp.dot(w3_ref[i], stacked,
                         preferred_element_type=jnp.float32)                 # (Cr, HW)
            y3 = _mish(_group_norm_t(y3, mcr,
                                     vec[o_g3g:o_g3g + Cr, :],
                                     vec[o_g3b:o_g3b + Cr, :]))

            # ---- split attention
            added = y3[0:C, :]
            for s in range(1, r):
                added = added + y3[s * C:(s + 1) * C, :]
            gp = jnp.mean(added, axis=1, keepdims=True)                      # (C, 1) GAP
            d1 = jnp.dot(wd1_ref[i], gp, preferred_element_type=jnp.float32)
            d1 = d1 + vec[o_bd1:o_bd1 + inner, :]
            d1 = _mish(d1 * vec[o_bsc:o_bsc + inner, :]
                       + vec[o_bsh:o_bsh + inner, :])                        # (2C, 1)
            d2 = jnp.dot(wd2_ref[i], d1, preferred_element_type=jnp.float32)
            d2 = d2 + vec[o_bd2:o_bd2 + Cr, :]                               # (Cr, 1)

            att = jnp.zeros((C, HW), jnp.float32)
            for s in range(r):
                a = d2[s * C:(s + 1) * C, :]                                 # (C, 1)
                a = a - jnp.max(a, axis=0, keepdims=True)
                e = jnp.exp(a)
                sm = e / jnp.sum(e, axis=0, keepdims=True)
                att = att + sm * y3[s * C:(s + 1) * C, :]
            att_list.append(att)

        # ---- final 1x1 conv over all cardinals at once + folded BN + residual
        cat = jnp.concatenate(att_list, axis=0)                              # (Cin, HW)
        y = jnp.dot(wf_ref[...], cat, preferred_element_type=jnp.float32)    # (Cin, HW)
        y = y * bnf_ref[:, 0:1] + bnf_ref[:, 1:2]
        out_ref[...] = (y + x_full).astype(out_ref.dtype)

    return kernel


# --------------------------- parameter setup (glue) ---------------------------

def init_params(key, Cin, k, r):
    """Deterministic parameter init matching the PyTorch module's shapes."""
    C = Cin // k
    Cr = C * r
    inner = 2 * C
    ks = jax.random.split(key, 6 * k + 1)
    cards = []
    idx = 0
    for _ in range(k):
        w1 = 0.3 * jax.random.normal(ks[idx], (C, C // r, 1, 1), jnp.float32); idx += 1
        w3 = 0.3 * jax.random.normal(ks[idx], (Cr, C // r, 3, 3), jnp.float32); idx += 1
        wd1 = 0.3 * jax.random.normal(ks[idx], (inner, C, 1, 1), jnp.float32); idx += 1
        bd1 = 0.1 * jax.random.normal(ks[idx], (inner,), jnp.float32); idx += 1
        wd2 = 0.3 * jax.random.normal(ks[idx], (Cr, inner // r, 1, 1), jnp.float32); idx += 1
        bd2 = 0.1 * jax.random.normal(ks[idx], (Cr,), jnp.float32); idx += 1
        cards.append(dict(
            w1=w1, gn1_g=jnp.ones((C,), jnp.float32), gn1_b=jnp.zeros((C,), jnp.float32),
            w3=w3, gn3_g=jnp.ones((Cr,), jnp.float32), gn3_b=jnp.zeros((Cr,), jnp.float32),
            wd1=wd1, bd1=bd1,
            bn1_g=jnp.ones((inner,), jnp.float32), bn1_b=jnp.zeros((inner,), jnp.float32),
            bn1_m=jnp.zeros((inner,), jnp.float32), bn1_v=jnp.ones((inner,), jnp.float32),
            wd2=wd2, bd2=bd2))
    wf = 0.3 * jax.random.normal(ks[idx], (Cin, Cin, 1, 1), jnp.float32)
    final = dict(wf=wf,
                 bnf_g=jnp.ones((Cin,), jnp.float32), bnf_b=jnp.zeros((Cin,), jnp.float32),
                 bnf_m=jnp.zeros((Cin,), jnp.float32), bnf_v=jnp.ones((Cin,), jnp.float32))
    return cards, final


def _grouped_1x1_dense(w, groups):
    # torch weight (C_out, C_in/groups, 1, 1) -> dense (C_in, C_out) for y = x @ D
    w2 = w[:, :, 0, 0]
    c_out, cgi = w2.shape
    cgo = c_out // groups
    c_in = cgi * groups
    d = jnp.zeros((c_in, c_out), jnp.float32)
    for g in range(groups):
        d = d.at[g * cgi:(g + 1) * cgi, g * cgo:(g + 1) * cgo].set(
            w2[g * cgo:(g + 1) * cgo, :].T)
    return d


def _fold_bn(g, b, m, v, eps):
    sc = g / jnp.sqrt(v + eps)
    return sc, b - m * sc


def _group_avg_matrix(C, groups):
    cg = C // groups
    gi = jnp.arange(C)[:, None] // cg
    gj = jnp.arange(C)[None, :] // cg
    return jnp.where(gi == gj, 1.0 / cg, 0.0).astype(jnp.float32)


def _tap_masks(H, W):
    """(9, HW) 0/1 masks for the 3x3 im2col taps (row-major tap order)."""
    HW = H * W
    pos = jnp.arange(HW)
    yy = pos // W
    xx = pos % W
    rows = []
    for dy in range(3):
        for dx in range(3):
            oy, ox = dy - 1, dx - 1
            m = jnp.ones((HW,), jnp.float32)
            if oy < 0:
                m = m * (yy >= 1).astype(jnp.float32)
            elif oy > 0:
                m = m * (yy <= H - 2).astype(jnp.float32)
            if ox < 0:
                m = m * (xx >= 1).astype(jnp.float32)
            elif ox > 0:
                m = m * (xx <= W - 2).astype(jnp.float32)
            rows.append(m)
    return jnp.stack(rows, 0)


def pack_params(cards, final, k, r, H, W):
    """Pack weights in the transposed (out x in) layout the kernel uses
    (y_T = W_T @ x_T), per-cardinal tensors stacked on axis 0, and all skinny
    per-cardinal vectors consolidated into one (k, P, 1) array."""
    C = cards[0]['w1'].shape[0]
    Cin = C * k
    Cr = C * r

    def stack(f):
        return jnp.stack([f(c) for c in cards], 0)

    def conv3_big(w):   # grouped (Cr, C/r, 3, 3) -> dense (9C, Cr), tap-major rows
        taps = [_grouped_1x1_dense(w[:, :, dy, dx][..., None, None], r)
                for dy in range(3) for dx in range(3)]     # each (C, Cr)
        return jnp.concatenate(taps, axis=0)

    vec_list = []
    for c in cards:
        sc, sh = _fold_bn(c['bn1_g'], c['bn1_b'], c['bn1_m'], c['bn1_v'], EPS)
        vec = jnp.concatenate([c['gn1_g'], c['gn1_b'],
                               c['gn3_g'], c['gn3_b'],
                               c['bd1'], sc, sh, c['bd2']], axis=0)
        vec_list.append(vec[:, None])                       # (P, 1), P = 8C + 3Cr

    packed = dict(
        w1t=stack(lambda c: _grouped_1x1_dense(c['w1'], r).T),   # (k, C, C)
        w3t=stack(lambda c: conv3_big(c['w3']).T),               # (k, Cr, 9C)
        wd1t=stack(lambda c: _grouped_1x1_dense(c['wd1'], 1).T),  # (k, 2C, C)
        wd2t=stack(lambda c: _grouped_1x1_dense(c['wd2'], r).T),  # (k, Cr, 2C)
        vecs=jnp.stack(vec_list, 0),                              # (k, P, 1)
        wft=_grouped_1x1_dense(final['wf'], 1).T,                 # (Cin, Cin)
        mc=_group_avg_matrix(C, r),                               # (C, C)
        mcr=_group_avg_matrix(Cr, r),                             # (Cr, Cr)
        masks=_tap_masks(H, W),                                   # (9, HW)
    )
    sc, sh = _fold_bn(final['bnf_g'], final['bnf_b'], final['bnf_m'], final['bnf_v'], EPS)
    packed['bnf'] = jnp.concatenate([sc[:, None], sh[:, None]], axis=1)   # (Cin, 2)
    return packed


# ------------------------------ forward wrapper -------------------------------

@functools.partial(jax.jit, static_argnums=(2, 3))
def one_block_forward(x_nchw, packed, k, r):
    N, Cin, H, W = x_nchw.shape
    C = Cin // k
    Cr = C * r
    inner = 2 * C
    HW = H * W
    P = 8 * C + 3 * Cr
    x_flat = x_nchw.reshape(N, Cin, HW)      # free reshape; already channels-first

    full3 = lambda n: (0, 0, 0)              # grid-invariant 3-D parameter (resident)
    full2 = lambda n: (0, 0)                 # grid-invariant 2-D parameter (resident)

    # advisory cost hint for XLA's scheduler around this very short custom call
    flops = 2 * N * (k * (C * C * HW + Cr * 9 * C * HW + inner * C + Cr * inner)
                     + Cin * Cin * HW)
    transcendentals = N * k * (C * HW + Cr * HW + inner + Cr)
    bytes_accessed = 4 * (2 * N * Cin * HW
                          + k * (C * C + Cr * 9 * C + inner * C + Cr * inner + P)
                          + Cin * Cin + 9 * HW + C * C + Cr * Cr + 2 * Cin)

    out = pl.pallas_call(
        make_oneblock_kernel(H, W, C, r, k),
        out_shape=jax.ShapeDtypeStruct((N, Cin, HW), jnp.float32),
        grid=(N,),                            # one step per sample; k unrolled in-kernel
        in_specs=[
            pl.BlockSpec((None, Cin, HW), lambda n: (n, 0, 0)),  # x (per-sample tile)
            pl.BlockSpec((9, HW), full2),          # precomputed im2col boundary masks
            pl.BlockSpec((k, C, C), full3),        # conv1 weight^T (all cardinals)
            pl.BlockSpec((C, C), full2),           # GN1 group-average matrix
            pl.BlockSpec((k, Cr, 9 * C), full3),   # conv3 im2col weight^T (all cardinals)
            pl.BlockSpec((Cr, Cr), full2),         # GN3 group-average matrix
            pl.BlockSpec((k, inner, C), full3),    # dense1 weight^T (all cardinals)
            pl.BlockSpec((k, Cr, inner), full3),   # dense2 weight^T (all cardinals)
            pl.BlockSpec((Cin, Cin), full2),       # final 1x1 conv weight^T
            pl.BlockSpec((k, P, 1), full3),        # packed per-cardinal vectors
            pl.BlockSpec((Cin, 2), full2),         # final BN (folded scale, shift)
        ],
        out_specs=pl.BlockSpec((None, Cin, HW), lambda n: (n, 0, 0)),
        compiler_params=pltpu.CompilerParams(dimension_semantics=("parallel",)),
        cost_estimate=pl.CostEstimate(flops=flops, transcendentals=transcendentals,
                                      bytes_accessed=bytes_accessed),
    )(x_flat, packed['masks'],
      packed['w1t'], packed['mc'], packed['w3t'], packed['mcr'],
      packed['wd1t'], packed['wd2t'], packed['wft'],
      packed['vecs'], packed['bnf'])

    return out.reshape(N, Cin, H, W)          # already NCHW


# --------------------------- pure-JAX reference (NCHW) ------------------------

def _conv_ref(x, w, b, groups, pad):
    y = jax.lax.conv_general_dilated(
        x, w, (1, 1), ((pad, pad), (pad, pad)),
        dimension_numbers=('NCHW', 'OIHW', 'NCHW'),
        feature_group_count=groups, precision=jax.lax.Precision.HIGHEST)
    if b is not None:
        y = y + b.reshape(1, -1, 1, 1)
    return y


def _gn_ref(x, groups, g, b):
    N, C, H, W = x.shape
    xg = x.reshape(N, groups, -1)
    m = xg.mean(-1, keepdims=True)
    v = ((xg - m) ** 2).mean(-1, keepdims=True)
    xn = ((xg - m) / jnp.sqrt(v + EPS)).reshape(N, C, H, W)
    return xn * g.reshape(1, -1, 1, 1) + b.reshape(1, -1, 1, 1)


def _bn_ref(x, g, b, m, v):
    return ((x - m.reshape(1, -1, 1, 1)) / jnp.sqrt(v.reshape(1, -1, 1, 1) + EPS)
            * g.reshape(1, -1, 1, 1) + b.reshape(1, -1, 1, 1))


def _mish_ref(x):
    return x * jnp.tanh(jax.nn.softplus(x))


def reference_forward(x, cards, final, k, r):
    N, Cin, H, W = x.shape
    C = Cin // k
    outs = []
    for i in range(k):
        xc = x[:, i * C:(i + 1) * C]
        c = cards[i]
        y1 = _mish_ref(_gn_ref(_conv_ref(xc, c['w1'], None, r, 0), r, c['gn1_g'], c['gn1_b']))
        y3 = _mish_ref(_gn_ref(_conv_ref(y1, c['w3'], None, r, 1), r, c['gn3_g'], c['gn3_b']))
        splits = [y3[:, s * C:(s + 1) * C] for s in range(r)]
        added = sum(splits)
        gp = added.mean(axis=(2, 3), keepdims=True)
        d1 = _mish_ref(_bn_ref(_conv_ref(gp, c['wd1'], c['bd1'], 1, 0),
                               c['bn1_g'], c['bn1_b'], c['bn1_m'], c['bn1_v']))
        d2 = _conv_ref(d1, c['wd2'], c['bd2'], r, 0)
        att = jnp.zeros_like(splits[0])
        for s in range(r):
            a = jax.nn.softmax(d2[:, s * C:(s + 1) * C], axis=1)
            att = att + a * splits[s]
        outs.append(att)
    cat = jnp.concatenate(outs, axis=1)
    cat = _bn_ref(_conv_ref(cat, final['wf'], None, 1, 0),
                  final['bnf_g'], final['bnf_b'], final['bnf_m'], final['bnf_v'])
    return cat + x


# ------------------------------------ main ------------------------------------

if __name__ == "__main__":
    key = jax.random.PRNGKey(0)
    N, Cin, H, W = 2, 16, 16, 16      # in_channels == out_channels => no DownSample
    k, r = 2, 4

    kx, kp = jax.random.split(key)
    x = jax.random.normal(kx, (N, Cin, H, W), jnp.float32)
    cards, final = init_params(kp, Cin, k, r)
    packed = pack_params(cards, final, k, r, H, W)

    out = one_block_forward(x, packed, k, r)
    out = jax.block_until_ready(out)
    assert out.shape == (N, Cin, H, W)

    ref = reference_forward(x, cards, final, k, r)
    err = float(jnp.max(jnp.abs(out - ref)))
    if err > 2e-2:
        raise AssertionError(f"Pallas output mismatch vs JAX reference: max abs err {err}")

    print("KERNEL_OK")
</pallas_src>

<mosaic_0001>
module attributes {stable_mosaic.version = 11 : i64} {
  func.func @kernel(%arg0: i32, %arg1: memref<1x16x256xf32, #tpu.memory_space<vmem>>, %arg2: memref<9x256xf32, #tpu.memory_space<vmem>>, %arg3: memref<2x8x8xf32, #tpu.memory_space<vmem>>, %arg4: memref<8x8xf32, #tpu.memory_space<vmem>>, %arg5: memref<2x32x72xf32, #tpu.memory_space<vmem>>, %arg6: memref<32x32xf32, #tpu.memory_space<vmem>>, %arg7: memref<2x16x8xf32, #tpu.memory_space<vmem>>, %arg8: memref<2x32x16xf32, #tpu.memory_space<vmem>>, %arg9: memref<16x16xf32, #tpu.memory_space<vmem>>, %arg10: memref<2x160x1xf32, #tpu.memory_space<vmem>>, %arg11: memref<16x2xf32, #tpu.memory_space<vmem>>, %arg12: memref<1x16x256xf32, #tpu.memory_space<vmem>>) attributes {dimension_semantics = [#tpu.dimension_semantics<parallel>], iteration_bounds = array<i64: 2>, scalar_prefetch = 0 : i64, scratch_operands = 0 : i64, tpu.core_type = #tpu.core_type<tc>, window_params = [{transform_indices = @transform_0, window_bounds = array<i64: 1, 16, 256>}, {pipeline_mode = #tpu.pipeline_mode<synchronous>, transform_indices = @transform_1, window_bounds = array<i64: 9, 256>}, {pipeline_mode = #tpu.pipeline_mode<synchronous>, transform_indices = @transform_2, window_bounds = array<i64: 2, 8, 8>}, {pipeline_mode = #tpu.pipeline_mode<synchronous>, transform_indices = @transform_3, window_bounds = array<i64: 8, 8>}, {pipeline_mode = #tpu.pipeline_mode<synchronous>, transform_indices = @transform_4, window_bounds = array<i64: 2, 32, 72>}, {pipeline_mode = #tpu.pipeline_mode<synchronous>, transform_indices = @transform_5, window_bounds = array<i64: 32, 32>}, {pipeline_mode = #tpu.pipeline_mode<synchronous>, transform_indices = @transform_6, window_bounds = array<i64: 2, 16, 8>}, {pipeline_mode = #tpu.pipeline_mode<synchronous>, transform_indices = @transform_7, window_bounds = array<i64: 2, 32, 16>}, {pipeline_mode = #tpu.pipeline_mode<synchronous>, transform_indices = @transform_8, window_bounds = array<i64: 16, 16>}, {pipeline_mode = #tpu.pipeline_mode<synchronous>, transform_indices = @transform_9, window_bounds = array<i64: 2, 160, 1>}, {pipeline_mode = #tpu.pipeline_mode<synchronous>, transform_indices = @transform_10, window_bounds = array<i64: 16, 2>}, {transform_indices = @transform_11, window_bounds = array<i64: 1, 16, 256>}]} {
    %c0 = arith.constant 0 : index
    %c0_0 = arith.constant 0 : index
    %c0_1 = arith.constant 0 : index
    %0 = vector.load %arg1[%c0, %c0_0, %c0_1] : memref<1x16x256xf32, #tpu.memory_space<vmem>>, vector<1x16x256xf32>
    %1 = vector.shape_cast %0 : vector<1x16x256xf32> to vector<16x256xf32>
    %c0_2 = arith.constant 0 : index
    %c0_3 = arith.constant 0 : index
    %2 = vector.load %arg2[%c0_2, %c0_3] : memref<9x256xf32, #tpu.memory_space<vmem>>, vector<9x256xf32>
    %c0_4 = arith.constant 0 : index
    %c0_5 = arith.constant 0 : index
    %3 = vector.load %arg4[%c0_4, %c0_5] : memref<8x8xf32, #tpu.memory_space<vmem>>, vector<8x8xf32>
    %c0_6 = arith.constant 0 : index
    %c0_7 = arith.constant 0 : index
    %4 = vector.load %arg6[%c0_6, %c0_7] : memref<32x32xf32, #tpu.memory_space<vmem>>, vector<32x32xf32>
    %5 = vector.extract_strided_slice %1 {offsets = [0, 0], sizes = [8, 256], strides = [1, 1]} : vector<16x256xf32> to vector<8x256xf32>
    %c0_8 = arith.constant 0 : index
    %c0_9 = arith.constant 0 : index
    %c0_10 = arith.constant 0 : index
    %6 = vector.load %arg10[%c0_8, %c0_9, %c0_10] : memref<2x160x1xf32, #tpu.memory_space<vmem>>, vector<1x160x1xf32>
    %7 = vector.shape_cast %6 : vector<1x160x1xf32> to vector<160x1xf32>
    %c0_11 = arith.constant 0 : index
    %c0_12 = arith.constant 0 : index
    %c0_13 = arith.constant 0 : index
    %8 = vector.load %arg3[%c0_11, %c0_12, %c0_13] : memref<2x8x8xf32, #tpu.memory_space<vmem>>, vector<1x8x8xf32>
    %9 = vector.shape_cast %8 : vector<1x8x8xf32> to vector<8x8xf32>
    %cst = arith.constant dense<0.000000e+00> : vector<8x256xf32>
    %10 = tpu.matmul %9, %5, %cst {dimension_numbers = #tpu.dot_dimension_numbers<[1], [0], [0], [1], [0, 0, 1, 1], [], []>} : vector<8x8xf32>, vector<8x256xf32>, vector<8x256xf32> -> vector<8x256xf32>
    %11 = vector.extract_strided_slice %7 {offsets = [0, 0], sizes = [8, 1], strides = [1, 1]} : vector<160x1xf32> to vector<8x1xf32>
    %12 = vector.extract_strided_slice %7 {offsets = [8, 0], sizes = [8, 1], strides = [1, 1]} : vector<160x1xf32> to vector<8x1xf32>
    %cst_14 = arith.constant dense<0.000000e+00> : vector<8xf32>
    %13 = vector.multi_reduction <add>, %10, %cst_14 [1] : vector<8x256xf32> to vector<8xf32>
    %14 = vector.shape_cast %13 : vector<8xf32> to vector<8x1xf32>
    %cst_15 = arith.constant 2.560000e+02 : f32
    %15 = vector.broadcast %cst_15 : f32 to vector<8x1xf32>
    %16 = arith.divf %14, %15 : vector<8x1xf32>
    %cst_16 = arith.constant dense<0.000000e+00> : vector<8x1xf32>
    %17 = tpu.matmul %3, %16, %cst_16 {dimension_numbers = #tpu.dot_dimension_numbers<[1], [0], [0], [1], [0, 0, 1, 1], [], []>} : vector<8x8xf32>, vector<8x1xf32>, vector<8x1xf32> -> vector<8x1xf32>
    %18 = vector.broadcast %17 : vector<8x1xf32> to vector<8x256xf32>
    %19 = arith.subf %10, %18 : vector<8x256xf32>
    %20 = arith.mulf %19, %19 : vector<8x256xf32>
    %cst_17 = arith.constant dense<0.000000e+00> : vector<8xf32>
    %21 = vector.multi_reduction <add>, %20, %cst_17 [1] : vector<8x256xf32> to vector<8xf32>
    %22 = vector.shape_cast %21 : vector<8xf32> to vector<8x1xf32>
    %cst_18 = arith.constant 2.560000e+02 : f32
    %23 = vector.broadcast %cst_18 : f32 to vector<8x1xf32>
    %24 = arith.divf %22, %23 : vector<8x1xf32>
    %cst_19 = arith.constant dense<0.000000e+00> : vector<8x1xf32>
    %25 = tpu.matmul %3, %24, %cst_19 {dimension_numbers = #tpu.dot_dimension_numbers<[1], [0], [0], [1], [0, 0, 1, 1], [], []>} : vector<8x8xf32>, vector<8x1xf32>, vector<8x1xf32> -> vector<8x1xf32>
    %cst_20 = arith.constant 1.000000e-03 : f32
    %26 = vector.broadcast %cst_20 : f32 to vector<8x1xf32>
    %27 = arith.addf %25, %26 : vector<8x1xf32>
    %28 = math.rsqrt %27 : vector<8x1xf32>
    %29 = arith.mulf %28, %11 : vector<8x1xf32>
    %30 = vector.broadcast %29 : vector<8x1xf32> to vector<8x256xf32>
    %31 = arith.mulf %19, %30 : vector<8x256xf32>
    %32 = vector.broadcast %12 : vector<8x1xf32> to vector<8x256xf32>
    %33 = arith.addf %31, %32 : vector<8x256xf32>
    %cst_21 = arith.constant 2.000000e+01 : f32
    %34 = vector.broadcast %cst_21 : f32 to vector<8x256xf32>
    %35 = arith.minimumf %33, %34 : vector<8x256xf32>
    %36 = math.exp %35 : vector<8x256xf32>
    %cst_22 = arith.constant 1.000000e+00 : f32
    %37 = vector.broadcast %cst_22 : f32 to vector<8x256xf32>
    %38 = arith.addf %37, %36 : vector<8x256xf32>
    %39 = arith.mulf %38, %38 : vector<8x256xf32>
    %cst_23 = arith.constant 1.000000e+00 : f32
    %40 = vector.broadcast %cst_23 : f32 to vector<8x256xf32>
    %41 = arith.subf %39, %40 : vector<8x256xf32>
    %42 = arith.mulf %33, %41 : vector<8x256xf32>
    %cst_24 = arith.constant 1.000000e+00 : f32
    %43 = vector.broadcast %cst_24 : f32 to vector<8x256xf32>
    %44 = arith.addf %39, %43 : vector<8x256xf32>
    %45 = arith.divf %42, %44 : vector<8x256xf32>
    %c17_i32 = arith.constant 17 : i32
    %46 = tpu.dynamic_rotate %45 by %c17_i32 dim 1 : vector<8x256xf32>, i32 -> vector<8x256xf32>
    %47 = vector.extract_strided_slice %2 {offsets = [0, 0], sizes = [1, 256], strides = [1, 1]} : vector<9x256xf32> to vector<1x256xf32>
    %48 = vector.broadcast %47 : vector<1x256xf32> to vector<8x256xf32>
    %49 = arith.mulf %46, %48 : vector<8x256xf32>
    %c16_i32 = arith.constant 16 : i32
    %50 = tpu.dynamic_rotate %45 by %c16_i32 dim 1 : vector<8x256xf32>, i32 -> vector<8x256xf32>
    %51 = vector.extract_strided_slice %2 {offsets = [1, 0], sizes = [1, 256], strides = [1, 1]} : vector<9x256xf32> to vector<1x256xf32>
    %52 = vector.broadcast %51 : vector<1x256xf32> to vector<8x256xf32>
    %53 = arith.mulf %50, %52 : vector<8x256xf32>
    %c15_i32 = arith.constant 15 : i32
    %54 = tpu.dynamic_rotate %45 by %c15_i32 dim 1 : vector<8x256xf32>, i32 -> vector<8x256xf32>
    %55 = vector.extract_strided_slice %2 {offsets = [2, 0], sizes = [1, 256], strides = [1, 1]} : vector<9x256xf32> to vector<1x256xf32>
    %56 = vector.broadcast %55 : vector<1x256xf32> to vector<8x256xf32>
    %57 = arith.mulf %54, %56 : vector<8x256xf32>
    %c1_i32 = arith.constant 1 : i32
    %58 = tpu.dynamic_rotate %45 by %c1_i32 dim 1 : vector<8x256xf32>, i32 -> vector<8x256xf32>
    %59 = vector.extract_strided_slice %2 {offsets = [3, 0], sizes = [1, 256], strides = [1, 1]} : vector<9x256xf32> to vector<1x256xf32>
    %60 = vector.broadcast %59 : vector<1x256xf32> to vector<8x256xf32>
    %61 = arith.mulf %58, %60 : vector<8x256xf32>
    %c255_i32 = arith.constant 255 : i32
    %62 = tpu.dynamic_rotate %45 by %c255_i32 dim 1 : vector<8x256xf32>, i32 -> vector<8x256xf32>
    %63 = vector.extract_strided_slice %2 {offsets = [5, 0], sizes = [1, 256], strides = [1, 1]} : vector<9x256xf32> to vector<1x256xf32>
    %64 = vector.broadcast %63 : vector<1x256xf32> to vector<8x256xf32>
    %65 = arith.mulf %62, %64 : vector<8x256xf32>
    %c241_i32 = arith.constant 241 : i32
    %66 = tpu.dynamic_rotate %45 by %c241_i32 dim 1 : vector<8x256xf32>, i32 -> vector<8x256xf32>
    %67 = vector.extract_strided_slice %2 {offsets = [6, 0], sizes = [1, 256], strides = [1, 1]} : vector<9x256xf32> to vector<1x256xf32>
    %68 = vector.broadcast %67 : vector<1x256xf32> to vector<8x256xf32>
    %69 = arith.mulf %66, %68 : vector<8x256xf32>
    %c240_i32 = arith.constant 240 : i32
    %70 = tpu.dynamic_rotate %45 by %c240_i32 dim 1 : vector<8x256xf32>, i32 -> vector<8x256xf32>
    %71 = vector.extract_strided_slice %2 {offsets = [7, 0], sizes = [1, 256], strides = [1, 1]} : vector<9x256xf32> to vector<1x256xf32>
    %72 = vector.broadcast %71 : vector<1x256xf32> to vector<8x256xf32>
    %73 = arith.mulf %70, %72 : vector<8x256xf32>
    %c239_i32 = arith.constant 239 : i32
    %74 = tpu.dynamic_rotate %45 by %c239_i32 dim 1 : vector<8x256xf32>, i32 -> vector<8x256xf32>
    %75 = vector.extract_strided_slice %2 {offsets = [8, 0], sizes = [1, 256], strides = [1, 1]} : vector<9x256xf32> to vector<1x256xf32>
    %76 = vector.broadcast %75 : vector<1x256xf32> to vector<8x256xf32>
    %77 = arith.mulf %74, %76 : vector<8x256xf32>
    %78 = tpu.concatenate %49, %53, %57, %61, %45, %65, %69, %73, %77 in 0 : vector<8x256xf32>, vector<8x256xf32>, vector<8x256xf32>, vector<8x256xf32>, vector<8x256xf32>, vector<8x256xf32>, vector<8x256xf32>, vector<8x256xf32>, vector<8x256xf32> -> vector<72x256xf32>
    %c0_25 = arith.constant 0 : index
    %c0_26 = arith.constant 0 : index
    %c0_27 = arith.constant 0 : index
    %79 = vector.load %arg5[%c0_25, %c0_26, %c0_27] : memref<2x32x72xf32, #tpu.memory_space<vmem>>, vector<1x32x72xf32>
    %80 = vector.shape_cast %79 : vector<1x32x72xf32> to vector<32x72xf32>
    %cst_28 = arith.constant dense<0.000000e+00> : vector<32x256xf32>
    %81 = tpu.matmul %80, %78, %cst_28 {dimension_numbers = #tpu.dot_dimension_numbers<[1], [0], [0], [1], [0, 0, 1, 1], [], []>} : vector<32x72xf32>, vector<72x256xf32>, vector<32x256xf32> -> vector<32x256xf32>
    %82 = vector.extract_strided_slice %7 {offsets = [16, 0], sizes = [32, 1], strides = [1, 1]} : vector<160x1xf32> to vector<32x1xf32>
    %83 = vector.extract_strided_slice %7 {offsets = [48, 0], sizes = [32, 1], strides = [1, 1]} : vector<160x1xf32> to vector<32x1xf32>
    %cst_29 = arith.constant dense<0.000000e+00> : vector<32xf32>
    %84 = vector.multi_reduction <add>, %81, %cst_29 [1] : vector<32x256xf32> to vector<32xf32>
    %85 = vector.shape_cast %84 : vector<32xf32> to vector<32x1xf32>
    %cst_30 = arith.constant 2.560000e+02 : f32
    %86 = vector.broadcast %cst_30 : f32 to vector<32x1xf32>
    %87 = arith.divf %85, %86 : vector<32x1xf32>
    %cst_31 = arith.constant dense<0.000000e+00> : vector<32x1xf32>
    %88 = tpu.matmul %4, %87, %cst_31 {dimension_numbers = #tpu.dot_dimension_numbers<[1], [0], [0], [1], [0, 0, 1, 1], [], []>} : vector<32x32xf32>, vector<32x1xf32>, vector<32x1xf32> -> vector<32x1xf32>
    %89 = vector.broadcast %88 : vector<32x1xf32> to vector<32x256xf32>
    %90 = arith.subf %81, %89 : vector<32x256xf32>
    %91 = arith.mulf %90, %90 : vector<32x256xf32>
    %cst_32 = arith.constant dense<0.000000e+00> : vector<32xf32>
    %92 = vector.multi_reduction <add>, %91, %cst_32 [1] : vector<32x256xf32> to vector<32xf32>
    %93 = vector.shape_cast %92 : vector<32xf32> to vector<32x1xf32>
    %cst_33 = arith.constant 2.560000e+02 : f32
    %94 = vector.broadcast %cst_33 : f32 to vector<32x1xf32>
    %95 = arith.divf %93, %94 : vector<32x1xf32>
    %cst_34 = arith.constant dense<0.000000e+00> : vector<32x1xf32>
    %96 = tpu.matmul %4, %95, %cst_34 {dimension_numbers = #tpu.dot_dimension_numbers<[1], [0], [0], [1], [0, 0, 1, 1], [], []>} : vector<32x32xf32>, vector<32x1xf32>, vector<32x1xf32> -> vector<32x1xf32>
    %cst_35 = arith.constant 1.000000e-03 : f32
    %97 = vector.broadcast %cst_35 : f32 to vector<32x1xf32>
    %98 = arith.addf %96, %97 : vector<32x1xf32>
    %99 = math.rsqrt %98 : vector<32x1xf32>
    %100 = arith.mulf %99, %82 : vector<32x1xf32>
    %101 = vector.broadcast %100 : vector<32x1xf32> to vector<32x256xf32>
    %102 = arith.mulf %90, %101 : vector<32x256xf32>
    %103 = vector.broadcast %83 : vector<32x1xf32> to vector<32x256xf32>
    %104 = arith.addf %102, %103 : vector<32x256xf32>
    %cst_36 = arith.constant 2.000000e+01 : f32
    %105 = vector.broadcast %cst_36 : f32 to vector<32x256xf32>
    %106 = arith.minimumf %104, %105 : vector<32x256xf32>
    %107 = math.exp %106 : vector<32x256xf32>
    %cst_37 = arith.constant 1.000000e+00 : f32
    %108 = vector.broadcast %cst_37 : f32 to vector<32x256xf32>
    %109 = arith.addf %108, %107 : vector<32x256xf32>
    %110 = arith.mulf %109, %109 : vector<32x256xf32>
    %cst_38 = arith.constant 1.000000e+00 : f32
    %111 = vector.broadcast %cst_38 : f32 to vector<32x256xf32>
    %112 = arith.subf %110, %111 : vector<32x256xf32>
    %113 = arith.mulf %104, %112 : vector<32x256xf32>
    %cst_39 = arith.constant 1.000000e+00 : f32
    %114 = vector.broadcast %cst_39 : f32 to vector<32x256xf32>
    %115 = arith.addf %110, %114 : vector<32x256xf32>
    %116 = arith.divf %113, %115 : vector<32x256xf32>
    %117 = vector.extract_strided_slice %116 {offsets = [0, 0], sizes = [8, 256], strides = [1, 1]} : vector<32x256xf32> to vector<8x256xf32>
    %118 = vector.extract_strided_slice %116 {offsets = [8, 0], sizes = [8, 256], strides = [1, 1]} : vector<32x256xf32> to vector<8x256xf32>
    %119 = arith.addf %117, %118 : vector<8x256xf32>
    %120 = vector.extract_strided_slice %116 {offsets = [16, 0], sizes = [8, 256], strides = [1, 1]} : vector<32x256xf32> to vector<8x256xf32>
    %121 = arith.addf %119, %120 : vector<8x256xf32>
    %122 = vector.extract_strided_slice %116 {offsets = [24, 0], sizes = [8, 256], strides = [1, 1]} : vector<32x256xf32> to vector<8x256xf32>
    %123 = arith.addf %121, %122 : vector<8x256xf32>
    %cst_40 = arith.constant dense<0.000000e+00> : vector<8xf32>
    %124 = vector.multi_reduction <add>, %123, %cst_40 [1] : vector<8x256xf32> to vector<8xf32>
    %125 = vector.shape_cast %124 : vector<8xf32> to vector<8x1xf32>
    %cst_41 = arith.constant 2.560000e+02 : f32
    %126 = vector.broadcast %cst_41 : f32 to vector<8x1xf32>
    %127 = arith.divf %125, %126 : vector<8x1xf32>
    %c0_42 = arith.constant 0 : index
    %c0_43 = arith.constant 0 : index
    %c0_44 = arith.constant 0 : index
    %128 = vector.load %arg7[%c0_42, %c0_43, %c0_44] : memref<2x16x8xf32, #tpu.memory_space<vmem>>, vector<1x16x8xf32>
    %129 = vector.shape_cast %128 : vector<1x16x8xf32> to vector<16x8xf32>
    %cst_45 = arith.constant dense<0.000000e+00> : vector<16x1xf32>
    %130 = tpu.matmul %129, %127, %cst_45 {dimension_numbers = #tpu.dot_dimension_numbers<[1], [0], [0], [1], [0, 0, 1, 1], [], []>} : vector<16x8xf32>, vector<8x1xf32>, vector<16x1xf32> -> vector<16x1xf32>
    %131 = vector.extract_strided_slice %7 {offsets = [80, 0], sizes = [16, 1], strides = [1, 1]} : vector<160x1xf32> to vector<16x1xf32>
    %132 = arith.addf %130, %131 : vector<16x1xf32>
    %133 = vector.extract_strided_slice %7 {offsets = [96, 0], sizes = [16, 1], strides = [1, 1]} : vector<160x1xf32> to vector<16x1xf32>
    %134 = arith.mulf %132, %133 : vector<16x1xf32>
    %135 = vector.extract_strided_slice %7 {offsets = [112, 0], sizes = [16, 1], strides = [1, 1]} : vector<160x1xf32> to vector<16x1xf32>
    %136 = arith.addf %134, %135 : vector<16x1xf32>
    %cst_46 = arith.constant 2.000000e+01 : f32
    %137 = vector.broadcast %cst_46 : f32 to vector<16x1xf32>
    %138 = arith.minimumf %136, %137 : vector<16x1xf32>
    %139 = math.exp %138 : vector<16x1xf32>
    %cst_47 = arith.constant 1.000000e+00 : f32
    %140 = vector.broadcast %cst_47 : f32 to vector<16x1xf32>
    %141 = arith.addf %140, %139 : vector<16x1xf32>
    %142 = arith.mulf %141, %141 : vector<16x1xf32>
    %cst_48 = arith.constant 1.000000e+00 : f32
    %143 = vector.broadcast %cst_48 : f32 to vector<16x1xf32>
    %144 = arith.subf %142, %143 : vector<16x1xf32>
    %145 = arith.mulf %136, %144 : vector<16x1xf32>
    %cst_49 = arith.constant 1.000000e+00 : f32
    %146 = vector.broadcast %cst_49 : f32 to vector<16x1xf32>
    %147 = arith.addf %142, %146 : vector<16x1xf32>
    %148 = arith.divf %145, %147 : vector<16x1xf32>
    %c0_50 = arith.constant 0 : index
    %c0_51 = arith.constant 0 : index
    %c0_52 = arith.constant 0 : index
    %149 = vector.load %arg8[%c0_50, %c0_51, %c0_52] : memref<2x32x16xf32, #tpu.memory_space<vmem>>, vector<1x32x16xf32>
    %150 = vector.shape_cast %149 : vector<1x32x16xf32> to vector<32x16xf32>
    %cst_53 = arith.constant dense<0.000000e+00> : vector<32x1xf32>
    %151 = tpu.matmul %150, %148, %cst_53 {dimension_numbers = #tpu.dot_dimension_numbers<[1], [0], [0], [1], [0, 0, 1, 1], [], []>} : vector<32x16xf32>, vector<16x1xf32>, vector<32x1xf32> -> vector<32x1xf32>
    %152 = vector.extract_strided_slice %7 {offsets = [128, 0], sizes = [32, 1], strides = [1, 1]} : vector<160x1xf32> to vector<32x1xf32>
    %153 = arith.addf %151, %152 : vector<32x1xf32>
    %cst_54 = arith.constant 0.000000e+00 : f32
    %154 = vector.broadcast %cst_54 : f32 to vector<8x256xf32>
    %155 = vector.extract_strided_slice %153 {offsets = [0, 0], sizes = [8, 1], strides = [1, 1]} : vector<32x1xf32> to vector<8x1xf32>
    %cst_55 = arith.constant dense<0xFF800000> : vector<1xf32>
    %156 = vector.multi_reduction <maximumf>, %155, %cst_55 [0] : vector<8x1xf32> to vector<1xf32>
    %157 = vector.shape_cast %156 : vector<1xf32> to vector<1x1xf32>
    %158 = vector.broadcast %157 : vector<1x1xf32> to vector<8x1xf32>
    %159 = arith.subf %155, %158 : vector<8x1xf32>
    %160 = math.exp %159 : vector<8x1xf32>
    %cst_56 = arith.constant dense<0.000000e+00> : vector<1xf32>
    %161 = vector.multi_reduction <add>, %160, %cst_56 [0] : vector<8x1xf32> to vector<1xf32>
    %162 = vector.shape_cast %161 : vector<1xf32> to vector<1x1xf32>
    %163 = vector.broadcast %162 : vector<1x1xf32> to vector<8x1xf32>
    %164 = arith.divf %160, %163 : vector<8x1xf32>
    %165 = vector.extract_strided_slice %116 {offsets = [0, 0], sizes = [8, 256], strides = [1, 1]} : vector<32x256xf32> to vector<8x256xf32>
    %166 = vector.broadcast %164 : vector<8x1xf32> to vector<8x256xf32>
    %167 = arith.mulf %166, %165 : vector<8x256xf32>
    %168 = arith.addf %154, %167 : vector<8x256xf32>
    %169 = vector.extract_strided_slice %153 {offsets = [8, 0], sizes = [8, 1], strides = [1, 1]} : vector<32x1xf32> to vector<8x1xf32>
    %cst_57 = arith.constant dense<0xFF800000> : vector<1xf32>
    %170 = vector.multi_reduction <maximumf>, %169, %cst_57 [0] : vector<8x1xf32> to vector<1xf32>
    %171 = vector.shape_cast %170 : vector<1xf32> to vector<1x1xf32>
    %172 = vector.broadcast %171 : vector<1x1xf32> to vector<8x1xf32>
    %173 = arith.subf %169, %172 : vector<8x1xf32>
    %174 = math.exp %173 : vector<8x1xf32>
    %cst_58 = arith.constant dense<0.000000e+00> : vector<1xf32>
    %175 = vector.multi_reduction <add>, %174, %cst_58 [0] : vector<8x1xf32> to vector<1xf32>
    %176 = vector.shape_cast %175 : vector<1xf32> to vector<1x1xf32>
    %177 = vector.broadcast %176 : vector<1x1xf32> to vector<8x1xf32>
    %178 = arith.divf %174, %177 : vector<8x1xf32>
    %179 = vector.extract_strided_slice %116 {offsets = [8, 0], sizes = [8, 256], strides = [1, 1]} : vector<32x256xf32> to vector<8x256xf32>
    %180 = vector.broadcast %178 : vector<8x1xf32> to vector<8x256xf32>
    %181 = arith.mulf %180, %179 : vector<8x256xf32>
    %182 = arith.addf %168, %181 : vector<8x256xf32>
    %183 = vector.extract_strided_slice %153 {offsets = [16, 0], sizes = [8, 1], strides = [1, 1]} : vector<32x1xf32> to vector<8x1xf32>
    %cst_59 = arith.constant dense<0xFF800000> : vector<1xf32>
    %184 = vector.multi_reduction <maximumf>, %183, %cst_59 [0] : vector<8x1xf32> to vector<1xf32>
    %185 = vector.shape_cast %184 : vector<1xf32> to vector<1x1xf32>
    %186 = vector.broadcast %185 : vector<1x1xf32> to vector<8x1xf32>
    %187 = arith.subf %183, %186 : vector<8x1xf32>
    %188 = math.exp %187 : vector<8x1xf32>
    %cst_60 = arith.constant dense<0.000000e+00> : vector<1xf32>
    %189 = vector.multi_reduction <add>, %188, %cst_60 [0] : vector<8x1xf32> to vector<1xf32>
    %190 = vector.shape_cast %189 : vector<1xf32> to vector<1x1xf32>
    %191 = vector.broadcast %190 : vector<1x1xf32> to vector<8x1xf32>
    %192 = arith.divf %188, %191 : vector<8x1xf32>
    %193 = vector.extract_strided_slice %116 {offsets = [16, 0], sizes = [8, 256], strides = [1, 1]} : vector<32x256xf32> to vector<8x256xf32>
    %194 = vector.broadcast %192 : vector<8x1xf32> to vector<8x256xf32>
    %195 = arith.mulf %194, %193 : vector<8x256xf32>
    %196 = arith.addf %182, %195 : vector<8x256xf32>
    %197 = vector.extract_strided_slice %153 {offsets = [24, 0], sizes = [8, 1], strides = [1, 1]} : vector<32x1xf32> to vector<8x1xf32>
    %cst_61 = arith.constant dense<0xFF800000> : vector<1xf32>
    %198 = vector.multi_reduction <maximumf>, %197, %cst_61 [0] : vector<8x1xf32> to vector<1xf32>
    %199 = vector.shape_cast %198 : vector<1xf32> to vector<1x1xf32>
    %200 = vector.broadcast %199 : vector<1x1xf32> to vector<8x1xf32>
    %201 = arith.subf %197, %200 : vector<8x1xf32>
    %202 = math.exp %201 : vector<8x1xf32>
    %cst_62 = arith.constant dense<0.000000e+00> : vector<1xf32>
    %203 = vector.multi_reduction <add>, %202, %cst_62 [0] : vector<8x1xf32> to vector<1xf32>
    %204 = vector.shape_cast %203 : vector<1xf32> to vector<1x1xf32>
    %205 = vector.broadcast %204 : vector<1x1xf32> to vector<8x1xf32>
    %206 = arith.divf %202, %205 : vector<8x1xf32>
    %207 = vector.extract_strided_slice %116 {offsets = [24, 0], sizes = [8, 256], strides = [1, 1]} : vector<32x256xf32> to vector<8x256xf32>
    %208 = vector.broadcast %206 : vector<8x1xf32> to vector<8x256xf32>
    %209 = arith.mulf %208, %207 : vector<8x256xf32>
    %210 = arith.addf %196, %209 : vector<8x256xf32>
    %211 = vector.extract_strided_slice %1 {offsets = [8, 0], sizes = [8, 256], strides = [1, 1]} : vector<16x256xf32> to vector<8x256xf32>
    %c1 = arith.constant 1 : index
    %c0_63 = arith.constant 0 : index
    %c0_64 = arith.constant 0 : index
    %212 = vector.load %arg10[%c1, %c0_63, %c0_64] : memref<2x160x1xf32, #tpu.memory_space<vmem>>, vector<1x160x1xf32>
    %213 = vector.shape_cast %212 : vector<1x160x1xf32> to vector<160x1xf32>
    %c1_65 = arith.constant 1 : index
    %c0_66 = arith.constant 0 : index
    %c0_67 = arith.constant 0 : index
    %214 = vector.load %arg3[%c1_65, %c0_66, %c0_67] : memref<2x8x8xf32, #tpu.memory_space<vmem>>, vector<1x8x8xf32>
    %215 = vector.shape_cast %214 : vector<1x8x8xf32> to vector<8x8xf32>
    %cst_68 = arith.constant dense<0.000000e+00> : vector<8x256xf32>
    %216 = tpu.matmul %215, %211, %cst_68 {dimension_numbers = #tpu.dot_dimension_numbers<[1], [0], [0], [1], [0, 0, 1, 1], [], []>} : vector<8x8xf32>, vector<8x256xf32>, vector<8x256xf32> -> vector<8x256xf32>
    %217 = vector.extract_strided_slice %213 {offsets = [0, 0], sizes = [8, 1], strides = [1, 1]} : vector<160x1xf32> to vector<8x1xf32>
    %218 = vector.extract_strided_slice %213 {offsets = [8, 0], sizes = [8, 1], strides = [1, 1]} : vector<160x1xf32> to vector<8x1xf32>
    %cst_69 = arith.constant dense<0.000000e+00> : vector<8xf32>
    %219 = vector.multi_reduction <add>, %216, %cst_69 [1] : vector<8x256xf32> to vector<8xf32>
    %220 = vector.shape_cast %219 : vector<8xf32> to vector<8x1xf32>
    %cst_70 = arith.constant 2.560000e+02 : f32
    %221 = vector.broadcast %cst_70 : f32 to vector<8x1xf32>
    %222 = arith.divf %220, %221 : vector<8x1xf32>
    %cst_71 = arith.constant dense<0.000000e+00> : vector<8x1xf32>
    %223 = tpu.matmul %3, %222, %cst_71 {dimension_numbers = #tpu.dot_dimension_numbers<[1], [0], [0], [1], [0, 0, 1, 1], [], []>} : vector<8x8xf32>, vector<8x1xf32>, vector<8x1xf32> -> vector<8x1xf32>
    %224 = vector.broadcast %223 : vector<8x1xf32> to vector<8x256xf32>
    %225 = arith.subf %216, %224 : vector<8x256xf32>
    %226 = arith.mulf %225, %225 : vector<8x256xf32>
    %cst_72 = arith.constant dense<0.000000e+00> : vector<8xf32>
    %227 = vector.multi_reduction <add>, %226, %cst_72 [1] : vector<8x256xf32> to vector<8xf32>
    %228 = vector.shape_cast %227 : vector<8xf32> to vector<8x1xf32>
    %cst_73 = arith.constant 2.560000e+02 : f32
    %229 = vector.broadcast %cst_73 : f32 to vector<8x1xf32>
    %230 = arith.divf %228, %229 : vector<8x1xf32>
    %cst_74 = arith.constant dense<0.000000e+00> : vector<8x1xf32>
    %231 = tpu.matmul %3, %230, %cst_74 {dimension_numbers = #tpu.dot_dimension_numbers<[1], [0], [0], [1], [0, 0, 1, 1], [], []>} : vector<8x8xf32>, vector<8x1xf32>, vector<8x1xf32> -> vector<8x1xf32>
    %cst_75 = arith.constant 1.000000e-03 : f32
    %232 = vector.broadcast %cst_75 : f32 to vector<8x1xf32>
    %233 = arith.addf %231, %232 : vector<8x1xf32>
    %234 = math.rsqrt %233 : vector<8x1xf32>
    %235 = arith.mulf %234, %217 : vector<8x1xf32>
    %236 = vector.broadcast %235 : vector<8x1xf32> to vector<8x256xf32>
    %237 = arith.mulf %225, %236 : vector<8x256xf32>
    %238 = vector.broadcast %218 : vector<8x1xf32> to vector<8x256xf32>
    %239 = arith.addf %237, %238 : vector<8x256xf32>
    %cst_76 = arith.constant 2.000000e+01 : f32
    %240 = vector.broadcast %cst_76 : f32 to vector<8x256xf32>
    %241 = arith.minimumf %239, %240 : vector<8x256xf32>
    %242 = math.exp %241 : vector<8x256xf32>
    %cst_77 = arith.constant 1.000000e+00 : f32
    %243 = vector.broadcast %cst_77 : f32 to vector<8x256xf32>
    %244 = arith.addf %243, %242 : vector<8x256xf32>
    %245 = arith.mulf %244, %244 : vector<8x256xf32>
    %cst_78 = arith.constant 1.000000e+00 : f32
    %246 = vector.broadcast %cst_78 : f32 to vector<8x256xf32>
    %247 = arith.subf %245, %246 : vector<8x256xf32>
    %248 = arith.mulf %239, %247 : vector<8x256xf32>
    %cst_79 = arith.constant 1.000000e+00 : f32
    %249 = vector.broadcast %cst_79 : f32 to vector<8x256xf32>
    %250 = arith.addf %245, %249 : vector<8x256xf32>
    %251 = arith.divf %248, %250 : vector<8x256xf32>
    %c17_i32_80 = arith.constant 17 : i32
    %252 = tpu.dynamic_rotate %251 by %c17_i32_80 dim 1 : vector<8x256xf32>, i32 -> vector<8x256xf32>
    %253 = vector.extract_strided_slice %2 {offsets = [0, 0], sizes = [1, 256], strides = [1, 1]} : vector<9x256xf32> to vector<1x256xf32>
    %254 = vector.broadcast %253 : vector<1x256xf32> to vector<8x256xf32>
    %255 = arith.mulf %252, %254 : vector<8x256xf32>
    %c16_i32_81 = arith.constant 16 : i32
    %256 = tpu.dynamic_rotate %251 by %c16_i32_81 dim 1 : vector<8x256xf32>, i32 -> vector<8x256xf32>
    %257 = vector.extract_strided_slice %2 {offsets = [1, 0], sizes = [1, 256], strides = [1, 1]} : vector<9x256xf32> to vector<1x256xf32>
    %258 = vector.broadcast %257 : vector<1x256xf32> to vector<8x256xf32>
    %259 = arith.mulf %256, %258 : vector<8x256xf32>
    %c15_i32_82 = arith.constant 15 : i32
    %260 = tpu.dynamic_rotate %251 by %c15_i32_82 dim 1 : vector<8x256xf32>, i32 -> vector<8x256xf32>
    %261 = vector.extract_strided_slice %2 {offsets = [2, 0], sizes = [1, 256], strides = [1, 1]} : vector<9x256xf32> to vector<1x256xf32>
    %262 = vector.broadcast %261 : vector<1x256xf32> to vector<8x256xf32>
    %263 = arith.mulf %260, %262 : vector<8x256xf32>
    %c1_i32_83 = arith.constant 1 : i32
    %264 = tpu.dynamic_rotate %251 by %c1_i32_83 dim 1 : vector<8x256xf32>, i32 -> vector<8x256xf32>
    %265 = vector.extract_strided_slice %2 {offsets = [3, 0], sizes = [1, 256], strides = [1, 1]} : vector<9x256xf32> to vector<1x256xf32>
    %266 = vector.broadcast %265 : vector<1x256xf32> to vector<8x256xf32>
    %267 = arith.mulf %264, %266 : vector<8x256xf32>
    %c255_i32_84 = arith.constant 255 : i32
    %268 = tpu.dynamic_rotate %251 by %c255_i32_84 dim 1 : vector<8x256xf32>, i32 -> vector<8x256xf32>
    %269 = vector.extract_strided_slice %2 {offsets = [5, 0], sizes = [1, 256], strides = [1, 1]} : vector<9x256xf32> to vector<1x256xf32>
    %270 = vector.broadcast %269 : vector<1x256xf32> to vector<8x256xf32>
    %271 = arith.mulf %268, %270 : vector<8x256xf32>
    %c241_i32_85 = arith.constant 241 : i32
    %272 = tpu.dynamic_rotate %251 by %c241_i32_85 dim 1 : vector<8x256xf32>, i32 -> vector<8x256xf32>
    %273 = vector.extract_strided_slice %2 {offsets = [6, 0], sizes = [1, 256], strides = [1, 1]} : vector<9x256xf32> to vector<1x256xf32>
    %274 = vector.broadcast %273 : vector<1x256xf32> to vector<8x256xf32>
    %275 = arith.mulf %272, %274 : vector<8x256xf32>
    %c240_i32_86 = arith.constant 240 : i32
    %276 = tpu.dynamic_rotate %251 by %c240_i32_86 dim 1 : vector<8x256xf32>, i32 -> vector<8x256xf32>
    %277 = vector.extract_strided_slice %2 {offsets = [7, 0], sizes = [1, 256], strides = [1, 1]} : vector<9x256xf32> to vector<1x256xf32>
    %278 = vector.broadcast %277 : vector<1x256xf32> to vector<8x256xf32>
    %279 = arith.mulf %276, %278 : vector<8x256xf32>
    %c239_i32_87 = arith.constant 239 : i32
    %280 = tpu.dynamic_rotate %251 by %c239_i32_87 dim 1 : vector<8x256xf32>, i32 -> vector<8x256xf32>
    %281 = vector.extract_strided_slice %2 {offsets = [8, 0], sizes = [1, 256], strides = [1, 1]} : vector<9x256xf32> to vector<1x256xf32>
    %282 = vector.broadcast %281 : vector<1x256xf32> to vector<8x256xf32>
    %283 = arith.mulf %280, %282 : vector<8x256xf32>
    %284 = tpu.concatenate %255, %259, %263, %267, %251, %271, %275, %279, %283 in 0 : vector<8x256xf32>, vector<8x256xf32>, vector<8x256xf32>, vector<8x256xf32>, vector<8x256xf32>, vector<8x256xf32>, vector<8x256xf32>, vector<8x256xf32>, vector<8x256xf32> -> vector<72x256xf32>
    %c1_88 = arith.constant 1 : index
    %c0_89 = arith.constant 0 : index
    %c0_90 = arith.constant 0 : index
    %285 = vector.load %arg5[%c1_88, %c0_89, %c0_90] : memref<2x32x72xf32, #tpu.memory_space<vmem>>, vector<1x32x72xf32>
    %286 = vector.shape_cast %285 : vector<1x32x72xf32> to vector<32x72xf32>
    %cst_91 = arith.constant dense<0.000000e+00> : vector<32x256xf32>
    %287 = tpu.matmul %286, %284, %cst_91 {dimension_numbers = #tpu.dot_dimension_numbers<[1], [0], [0], [1], [0, 0, 1, 1], [], []>} : vector<32x72xf32>, vector<72x256xf32>, vector<32x256xf32> -> vector<32x256xf32>
    %288 = vector.extract_strided_slice %213 {offsets = [16, 0], sizes = [32, 1], strides = [1, 1]} : vector<160x1xf32> to vector<32x1xf32>
    %289 = vector.extract_strided_slice %213 {offsets = [48, 0], sizes = [32, 1], strides = [1, 1]} : vector<160x1xf32> to vector<32x1xf32>
    %cst_92 = arith.constant dense<0.000000e+00> : vector<32xf32>
    %290 = vector.multi_reduction <add>, %287, %cst_92 [1] : vector<32x256xf32> to vector<32xf32>
    %291 = vector.shape_cast %290 : vector<32xf32> to vector<32x1xf32>
    %cst_93 = arith.constant 2.560000e+02 : f32
    %292 = vector.broadcast %cst_93 : f32 to vector<32x1xf32>
    %293 = arith.divf %291, %292 : vector<32x1xf32>
    %cst_94 = arith.constant dense<0.000000e+00> : vector<32x1xf32>
    %294 = tpu.matmul %4, %293, %cst_94 {dimension_numbers = #tpu.dot_dimension_numbers<[1], [0], [0], [1], [0, 0, 1, 1], [], []>} : vector<32x32xf32>, vector<32x1xf32>, vector<32x1xf32> -> vector<32x1xf32>
    %295 = vector.broadcast %294 : vector<32x1xf32> to vector<32x256xf32>
    %296 = arith.subf %287, %295 : vector<32x256xf32>
    %297 = arith.mulf %296, %296 : vector<32x256xf32>
    %cst_95 = arith.constant dense<0.000000e+00> : vector<32xf32>
    %298 = vector.multi_reduction <add>, %297, %cst_95 [1] : vector<32x256xf32> to vector<32xf32>
    %299 = vector.shape_cast %298 : vector<32xf32> to vector<32x1xf32>
    %cst_96 = arith.constant 2.560000e+02 : f32
    %300 = vector.broadcast %cst_96 : f32 to vector<32x1xf32>
    %301 = arith.divf %299, %300 : vector<32x1xf32>
    %cst_97 = arith.constant dense<0.000000e+00> : vector<32x1xf32>
    %302 = tpu.matmul %4, %301, %cst_97 {dimension_numbers = #tpu.dot_dimension_numbers<[1], [0], [0], [1], [0, 0, 1, 1], [], []>} : vector<32x32xf32>, vector<32x1xf32>, vector<32x1xf32> -> vector<32x1xf32>
    %cst_98 = arith.constant 1.000000e-03 : f32
    %303 = vector.broadcast %cst_98 : f32 to vector<32x1xf32>
    %304 = arith.addf %302, %303 : vector<32x1xf32>
    %305 = math.rsqrt %304 : vector<32x1xf32>
    %306 = arith.mulf %305, %288 : vector<32x1xf32>
    %307 = vector.broadcast %306 : vector<32x1xf32> to vector<32x256xf32>
    %308 = arith.mulf %296, %307 : vector<32x256xf32>
    %309 = vector.broadcast %289 : vector<32x1xf32> to vector<32x256xf32>
    %310 = arith.addf %308, %309 : vector<32x256xf32>
    %cst_99 = arith.constant 2.000000e+01 : f32
    %311 = vector.broadcast %cst_99 : f32 to vector<32x256xf32>
    %312 = arith.minimumf %310, %311 : vector<32x256xf32>
    %313 = math.exp %312 : vector<32x256xf32>
    %cst_100 = arith.constant 1.000000e+00 : f32
    %314 = vector.broadcast %cst_100 : f32 to vector<32x256xf32>
    %315 = arith.addf %314, %313 : vector<32x256xf32>
    %316 = arith.mulf %315, %315 : vector<32x256xf32>
    %cst_101 = arith.constant 1.000000e+00 : f32
    %317 = vector.broadcast %cst_101 : f32 to vector<32x256xf32>
    %318 = arith.subf %316, %317 : vector<32x256xf32>
    %319 = arith.mulf %310, %318 : vector<32x256xf32>
    %cst_102 = arith.constant 1.000000e+00 : f32
    %320 = vector.broadcast %cst_102 : f32 to vector<32x256xf32>
    %321 = arith.addf %316, %320 : vector<32x256xf32>
    %322 = arith.divf %319, %321 : vector<32x256xf32>
    %323 = vector.extract_strided_slice %322 {offsets = [0, 0], sizes = [8, 256], strides = [1, 1]} : vector<32x256xf32> to vector<8x256xf32>
    %324 = vector.extract_strided_slice %322 {offsets = [8, 0], sizes = [8, 256], strides = [1, 1]} : vector<32x256xf32> to vector<8x256xf32>
    %325 = arith.addf %323, %324 : vector<8x256xf32>
    %326 = vector.extract_strided_slice %322 {offsets = [16, 0], sizes = [8, 256], strides = [1, 1]} : vector<32x256xf32> to vector<8x256xf32>
    %327 = arith.addf %325, %326 : vector<8x256xf32>
    %328 = vector.extract_strided_slice %322 {offsets = [24, 0], sizes = [8, 256], strides = [1, 1]} : vector<32x256xf32> to vector<8x256xf32>
    %329 = arith.addf %327, %328 : vector<8x256xf32>
    %cst_103 = arith.constant dense<0.000000e+00> : vector<8xf32>
    %330 = vector.multi_reduction <add>, %329, %cst_103 [1] : vector<8x256xf32> to vector<8xf32>
    %331 = vector.shape_cast %330 : vector<8xf32> to vector<8x1xf32>
    %cst_104 = arith.constant 2.560000e+02 : f32
    %332 = vector.broadcast %cst_104 : f32 to vector<8x1xf32>
    %333 = arith.divf %331, %332 : vector<8x1xf32>
    %c1_105 = arith.constant 1 : index
    %c0_106 = arith.constant 0 : index
    %c0_107 = arith.constant 0 : index
    %334 = vector.load %arg7[%c1_105, %c0_106, %c0_107] : memref<2x16x8xf32, #tpu.memory_space<vmem>>, vector<1x16x8xf32>
    %335 = vector.shape_cast %334 : vector<1x16x8xf32> to vector<16x8xf32>
    %cst_108 = arith.constant dense<0.000000e+00> : vector<16x1xf32>
    %336 = tpu.matmul %335, %333, %cst_108 {dimension_numbers = #tpu.dot_dimension_numbers<[1], [0], [0], [1], [0, 0, 1, 1], [], []>} : vector<16x8xf32>, vector<8x1xf32>, vector<16x1xf32> -> vector<16x1xf32>
    %337 = vector.extract_strided_slice %213 {offsets = [80, 0], sizes = [16, 1], strides = [1, 1]} : vector<160x1xf32> to vector<16x1xf32>
    %338 = arith.addf %336, %337 : vector<16x1xf32>
    %339 = vector.extract_strided_slice %213 {offsets = [96, 0], sizes = [16, 1], strides = [1, 1]} : vector<160x1xf32> to vector<16x1xf32>
    %340 = arith.mulf %338, %339 : vector<16x1xf32>
    %341 = vector.extract_strided_slice %213 {offsets = [112, 0], sizes = [16, 1], strides = [1, 1]} : vector<160x1xf32> to vector<16x1xf32>
    %342 = arith.addf %340, %341 : vector<16x1xf32>
    %cst_109 = arith.constant 2.000000e+01 : f32
    %343 = vector.broadcast %cst_109 : f32 to vector<16x1xf32>
    %344 = arith.minimumf %342, %343 : vector<16x1xf32>
    %345 = math.exp %344 : vector<16x1xf32>
    %cst_110 = arith.constant 1.000000e+00 : f32
    %346 = vector.broadcast %cst_110 : f32 to vector<16x1xf32>
    %347 = arith.addf %346, %345 : vector<16x1xf32>
    %348 = arith.mulf %347, %347 : vector<16x1xf32>
    %cst_111 = arith.constant 1.000000e+00 : f32
    %349 = vector.broadcast %cst_111 : f32 to vector<16x1xf32>
    %350 = arith.subf %348, %349 : vector<16x1xf32>
    %351 = arith.mulf %342, %350 : vector<16x1xf32>
    %cst_112 = arith.constant 1.000000e+00 : f32
    %352 = vector.broadcast %cst_112 : f32 to vector<16x1xf32>
    %353 = arith.addf %348, %352 : vector<16x1xf32>
    %354 = arith.divf %351, %353 : vector<16x1xf32>
    %c1_113 = arith.constant 1 : index
    %c0_114 = arith.constant 0 : index
    %c0_115 = arith.constant 0 : index
    %355 = vector.load %arg8[%c1_113, %c0_114, %c0_115] : memref<2x32x16xf32, #tpu.memory_space<vmem>>, vector<1x32x16xf32>
    %356 = vector.shape_cast %355 : vector<1x32x16xf32> to vector<32x16xf32>
    %cst_116 = arith.constant dense<0.000000e+00> : vector<32x1xf32>
    %357 = tpu.matmul %356, %354, %cst_116 {dimension_numbers = #tpu.dot_dimension_numbers<[1], [0], [0], [1], [0, 0, 1, 1], [], []>} : vector<32x16xf32>, vector<16x1xf32>, vector<32x1xf32> -> vector<32x1xf32>
    %358 = vector.extract_strided_slice %213 {offsets = [128, 0], sizes = [32, 1], strides = [1, 1]} : vector<160x1xf32> to vector<32x1xf32>
    %359 = arith.addf %357, %358 : vector<32x1xf32>
    %cst_117 = arith.constant 0.000000e+00 : f32
    %360 = vector.broadcast %cst_117 : f32 to vector<8x256xf32>
    %361 = vector.extract_strided_slice %359 {offsets = [0, 0], sizes = [8, 1], strides = [1, 1]} : vector<32x1xf32> to vector<8x1xf32>
    %cst_118 = arith.constant dense<0xFF800000> : vector<1xf32>
    %362 = vector.multi_reduction <maximumf>, %361, %cst_118 [0] : vector<8x1xf32> to vector<1xf32>
    %363 = vector.shape_cast %362 : vector<1xf32> to vector<1x1xf32>
    %364 = vector.broadcast %363 : vector<1x1xf32> to vector<8x1xf32>
    %365 = arith.subf %361, %364 : vector<8x1xf32>
    %366 = math.exp %365 : vector<8x1xf32>
    %cst_119 = arith.constant dense<0.000000e+00> : vector<1xf32>
    %367 = vector.multi_reduction <add>, %366, %cst_119 [0] : vector<8x1xf32> to vector<1xf32>
    %368 = vector.shape_cast %367 : vector<1xf32> to vector<1x1xf32>
    %369 = vector.broadcast %368 : vector<1x1xf32> to vector<8x1xf32>
    %370 = arith.divf %366, %369 : vector<8x1xf32>
    %371 = vector.extract_strided_slice %322 {offsets = [0, 0], sizes = [8, 256], strides = [1, 1]} : vector<32x256xf32> to vector<8x256xf32>
    %372 = vector.broadcast %370 : vector<8x1xf32> to vector<8x256xf32>
    %373 = arith.mulf %372, %371 : vector<8x256xf32>
    %374 = arith.addf %360, %373 : vector<8x256xf32>
    %375 = vector.extract_strided_slice %359 {offsets = [8, 0], sizes = [8, 1], strides = [1, 1]} : vector<32x1xf32> to vector<8x1xf32>
    %cst_120 = arith.constant dense<0xFF800000> : vector<1xf32>
    %376 = vector.multi_reduction <maximumf>, %375, %cst_120 [0] : vector<8x1xf32> to vector<1xf32>
    %377 = vector.shape_cast %376 : vector<1xf32> to vector<1x1xf32>
    %378 = vector.broadcast %377 : vector<1x1xf32> to vector<8x1xf32>
    %379 = arith.subf %375, %378 : vector<8x1xf32>
    %380 = math.exp %379 : vector<8x1xf32>
    %cst_121 = arith.constant dense<0.000000e+00> : vector<1xf32>
    %381 = vector.multi_reduction <add>, %380, %cst_121 [0] : vector<8x1xf32> to vector<1xf32>
    %382 = vector.shape_cast %381 : vector<1xf32> to vector<1x1xf32>
    %383 = vector.broadcast %382 : vector<1x1xf32> to vector<8x1xf32>
    %384 = arith.divf %380, %383 : vector<8x1xf32>
    %385 = vector.extract_strided_slice %322 {offsets = [8, 0], sizes = [8, 256], strides = [1, 1]} : vector<32x256xf32> to vector<8x256xf32>
    %386 = vector.broadcast %384 : vector<8x1xf32> to vector<8x256xf32>
    %387 = arith.mulf %386, %385 : vector<8x256xf32>
    %388 = arith.addf %374, %387 : vector<8x256xf32>
    %389 = vector.extract_strided_slice %359 {offsets = [16, 0], sizes = [8, 1], strides = [1, 1]} : vector<32x1xf32> to vector<8x1xf32>
    %cst_122 = arith.constant dense<0xFF800000> : vector<1xf32>
    %390 = vector.multi_reduction <maximumf>, %389, %cst_122 [0] : vector<8x1xf32> to vector<1xf32>
    %391 = vector.shape_cast %390 : vector<1xf32> to vector<1x1xf32>
    %392 = vector.broadcast %391 : vector<1x1xf32> to vector<8x1xf32>
    %393 = arith.subf %389, %392 : vector<8x1xf32>
    %394 = math.exp %393 : vector<8x1xf32>
    %cst_123 = arith.constant dense<0.000000e+00> : vector<1xf32>
    %395 = vector.multi_reduction <add>, %394, %cst_123 [0] : vector<8x1xf32> to vector<1xf32>
    %396 = vector.shape_cast %395 : vector<1xf32> to vector<1x1xf32>
    %397 = vector.broadcast %396 : vector<1x1xf32> to vector<8x1xf32>
    %398 = arith.divf %394, %397 : vector<8x1xf32>
    %399 = vector.extract_strided_slice %322 {offsets = [16, 0], sizes = [8, 256], strides = [1, 1]} : vector<32x256xf32> to vector<8x256xf32>
    %400 = vector.broadcast %398 : vector<8x1xf32> to vector<8x256xf32>
    %401 = arith.mulf %400, %399 : vector<8x256xf32>
    %402 = arith.addf %388, %401 : vector<8x256xf32>
    %403 = vector.extract_strided_slice %359 {offsets = [24, 0], sizes = [8, 1], strides = [1, 1]} : vector<32x1xf32> to vector<8x1xf32>
    %cst_124 = arith.constant dense<0xFF800000> : vector<1xf32>
    %404 = vector.multi_reduction <maximumf>, %403, %cst_124 [0] : vector<8x1xf32> to vector<1xf32>
    %405 = vector.shape_cast %404 : vector<1xf32> to vector<1x1xf32>
    %406 = vector.broadcast %405 : vector<1x1xf32> to vector<8x1xf32>
    %407 = arith.subf %403, %406 : vector<8x1xf32>
    %408 = math.exp %407 : vector<8x1xf32>
    %cst_125 = arith.constant dense<0.000000e+00> : vector<1xf32>
    %409 = vector.multi_reduction <add>, %408, %cst_125 [0] : vector<8x1xf32> to vector<1xf32>
    %410 = vector.shape_cast %409 : vector<1xf32> to vector<1x1xf32>
    %411 = vector.broadcast %410 : vector<1x1xf32> to vector<8x1xf32>
    %412 = arith.divf %408, %411 : vector<8x1xf32>
    %413 = vector.extract_strided_slice %322 {offsets = [24, 0], sizes = [8, 256], strides = [1, 1]} : vector<32x256xf32> to vector<8x256xf32>
    %414 = vector.broadcast %412 : vector<8x1xf32> to vector<8x256xf32>
    %415 = arith.mulf %414, %413 : vector<8x256xf32>
    %416 = arith.addf %402, %415 : vector<8x256xf32>
    %417 = tpu.concatenate %210, %416 in 0 : vector<8x256xf32>, vector<8x256xf32> -> vector<16x256xf32>
    %c0_126 = arith.constant 0 : index
    %c0_127 = arith.constant 0 : index
    %418 = vector.load %arg9[%c0_126, %c0_127] : memref<16x16xf32, #tpu.memory_space<vmem>>, vector<16x16xf32>
    %cst_128 = arith.constant dense<0.000000e+00> : vector<16x256xf32>
    %419 = tpu.matmul %418, %417, %cst_128 {dimension_numbers = #tpu.dot_dimension_numbers<[1], [0], [0], [1], [0, 0, 1, 1], [], []>} : vector<16x16xf32>, vector<16x256xf32>, vector<16x256xf32> -> vector<16x256xf32>
    %c0_129 = arith.constant 0 : index
    %c0_130 = arith.constant 0 : index
    %420 = vector.load %arg11[%c0_129, %c0_130] : memref<16x2xf32, #tpu.memory_space<vmem>>, vector<16x1xf32>
    %421 = vector.broadcast %420 : vector<16x1xf32> to vector<16x256xf32>
    %422 = arith.mulf %419, %421 : vector<16x256xf32>
    %c0_131 = arith.constant 0 : index
    %c1_132 = arith.constant 1 : index
    %423 = vector.load %arg11[%c0_131, %c1_132] : memref<16x2xf32, #tpu.memory_space<vmem>>, vector<16x1xf32>
    %424 = vector.broadcast %423 : vector<16x1xf32> to vector<16x256xf32>
    %425 = arith.addf %422, %424 : vector<16x256xf32>
    %426 = arith.addf %425, %1 : vector<16x256xf32>
    %c0_133 = arith.constant 0 : index
    %c0_134 = arith.constant 0 : index
    %c0_135 = arith.constant 0 : index
    %427 = vector.load %arg12[%c0_133, %c0_134, %c0_135] : memref<1x16x256xf32, #tpu.memory_space<vmem>>, vector<1x16x256xf32>
    %428 = vector.shape_cast %427 : vector<1x16x256xf32> to vector<16x256xf32>
    %429 = vector.shape_cast %426 : vector<16x256xf32> to vector<1x16x256xf32>
    tpu.vector_store %arg12[%c0_133, %c0_134, %c0_135], %429 {strides = array<i32>} : memref<1x16x256xf32, #tpu.memory_space<vmem>>, vector<1x16x256xf32>,
    return
  }
  func.func @transform_0(%arg0: i32) -> (i32, i32, i32) {
    %c0_i32 = arith.constant 0 : i32
    %c0_i32_0 = arith.constant 0 : i32
    %c0_i32_1 = arith.constant 0 : i32
    return %arg0, %c0_i32, %c0_i32_0 : i32, i32, i32
  }
  func.func @transform_1(%arg0: i32) -> (i32, i32) {
    %c0_i32 = arith.constant 0 : i32
    %c0_i32_0 = arith.constant 0 : i32
    %c0_i32_1 = arith.constant 0 : i32
    return %c0_i32, %c0_i32_0 : i32, i32
  }
  func.func @transform_2(%arg0: i32) -> (i32, i32, i32) {
    %c0_i32 = arith.constant 0 : i32
    %c0_i32_0 = arith.constant 0 : i32
    %c0_i32_1 = arith.constant 0 : i32
    %c0_i32_2 = arith.constant 0 : i32
    return %c0_i32, %c0_i32_0, %c0_i32_1 : i32, i32, i32
  }
  func.func @transform_3(%arg0: i32) -> (i32, i32) {
    %c0_i32 = arith.constant 0 : i32
    %c0_i32_0 = arith.constant 0 : i32
    %c0_i32_1 = arith.constant 0 : i32
    return %c0_i32, %c0_i32_0 : i32, i32
  }
  func.func @transform_4(%arg0: i32) -> (i32, i32, i32) {
    %c0_i32 = arith.constant 0 : i32
    %c0_i32_0 = arith.constant 0 : i32
    %c0_i32_1 = arith.constant 0 : i32
    %c0_i32_2 = arith.constant 0 : i32
    return %c0_i32, %c0_i32_0, %c0_i32_1 : i32, i32, i32
  }
  func.func @transform_5(%arg0: i32) -> (i32, i32) {
    %c0_i32 = arith.constant 0 : i32
    %c0_i32_0 = arith.constant 0 : i32
    %c0_i32_1 = arith.constant 0 : i32
    return %c0_i32, %c0_i32_0 : i32, i32
  }
  func.func @transform_6(%arg0: i32) -> (i32, i32, i32) {
    %c0_i32 = arith.constant 0 : i32
    %c0_i32_0 = arith.constant 0 : i32
    %c0_i32_1 = arith.constant 0 : i32
    %c0_i32_2 = arith.constant 0 : i32
    return %c0_i32, %c0_i32_0, %c0_i32_1 : i32, i32, i32
  }
  func.func @transform_7(%arg0: i32) -> (i32, i32, i32) {
    %c0_i32 = arith.constant 0 : i32
    %c0_i32_0 = arith.constant 0 : i32
    %c0_i32_1 = arith.constant 0 : i32
    %c0_i32_2 = arith.constant 0 : i32
    return %c0_i32, %c0_i32_0, %c0_i32_1 : i32, i32, i32
  }
  func.func @transform_8(%arg0: i32) -> (i32, i32) {
    %c0_i32 = arith.constant 0 : i32
    %c0_i32_0 = arith.constant 0 : i32
    %c0_i32_1 = arith.constant 0 : i32
    return %c0_i32, %c0_i32_0 : i32, i32
  }
  func.func @transform_9(%arg0: i32) -> (i32, i32, i32) {
    %c0_i32 = arith.constant 0 : i32
    %c0_i32_0 = arith.constant 0 : i32
    %c0_i32_1 = arith.constant 0 : i32
    %c0_i32_2 = arith.constant 0 : i32
    return %c0_i32, %c0_i32_0, %c0_i32_1 : i32, i32, i32
  }
  func.func @transform_10(%arg0: i32) -> (i32, i32) {
    %c0_i32 = arith.constant 0 : i32
    %c0_i32_0 = arith.constant 0 : i32
    %c0_i32_1 = arith.constant 0 : i32
    return %c0_i32, %c0_i32_0 : i32, i32
  }
  func.func @transform_11(%arg0: i32) -> (i32, i32, i32) {
    %c0_i32 = arith.constant 0 : i32
    %c0_i32_0 = arith.constant 0 : i32
    %c0_i32_1 = arith.constant 0 : i32
    return %arg0, %c0_i32, %c0_i32_0 : i32, i32, i32
  }
}

</mosaic_0001>

<bundles_post_ra>
// kernel: one_block_forward.1
= control target key start
LH: loop header
LB: loop body
LE: loop exit
PB: predicated region body
PF: predicated region fallthrough
CT: control target
= control target key end

     0   :  { %s3628_s17 = smov 0   ;;  %s4497_s0 = inlined_call_operand.vmem [shape: f32[2,16,256], index: 0, kind: input, shape index: {}]   ;;  %s4498_s1 = inlined_call_operand.vmem [shape: f32[9,256], index: 1, kind: input, shape index: {}]   ;;  %s4499_s2 = inlined_call_operand.vmem [shape: f32[2,8,8], index: 2, kind: input, shape index: {}]   ;;  %s4500_s3 = inlined_call_operand.vmem [shape: f32[8,8], index: 3, kind: input, shape index: {}]   ;;  %s4501_s4 = inlined_call_operand.vmem [shape: f32[2,32,72], index: 4, kind: input, shape index: {}]   ;;  %s4502_s5 = inlined_call_operand.vmem [shape: f32[32,32], index: 5, kind: input, shape index: {}]   ;;  %s4503_s6 = inlined_call_operand.vmem [shape: f32[2,16,8], index: 6, kind: input, shape index: {}]   ;;  %s4504_s7 = inlined_call_operand.vmem [shape: f32[2,32,16], index: 7, kind: input, shape index: {}]   ;;  %s4505_s8 = inlined_call_operand.vmem [shape: f32[16,16], index: 8, kind: input, shape index: {}]   ;;  %s4506_s9 = inlined_call_operand.vmem [shape: f32[2,160,1], index: 9, kind: input, shape index: {}]   ;;  %s4507_s10 = inlined_call_operand.vmem [shape: f32[16,2], index: 10, kind: input, shape index: {}]   ;;  %s4508_s11 = inlined_call_operand.vmem [shape: f32[2,16,256], index: 11, kind: output, shape index: {}]  }
   0x1 LB: > { %s3014_s18 = sadd.s32 4294967295, %s3554_s17   ;;  %p3018_p0 = scmp.ge.s32.totalorder %s3554_s17, 1  ;;  %s3554_s17 = sphi %s3628_s17, %s21_s17  }
   0x2   : > { %p337_p1 = scmp.lt.s32.totalorder %s3554_s17, 3 }
   0x4   : > { %p338_p2 = pnand %p3018_p0, %p337_p1 }
   0x5   : > { %p377_p3 = scmp.lt.s32.totalorder (!%p338_p2), %s3014_s18, 1  ;;  %v3556_v0 = vmov (!%p338_p2), 0.0   ;;  %v420_v3 = vld [vmem:[%s4499_s2] sm:$0xff] (!%p338_p2)  ;;  %vm421_vm0 = vcmask (!%p338_p2), 64512   ;;  %vm3557_vm1 = vmmov (!%p338_p2), 0   ;;  %v3558_v7 = vmov (!%p338_p2), 0  }
   0x6   : > { %341 = sbr.rel (%p338_p2) target bundleno = 6085 (0x17c5), region = 64  ;;  %489 = vmatprep.mubr.f32.mxu0 (!%p338_p2), %v3556_v0  ;;  %3186 = vmatprep.subr.mxu1 (!%p338_p2), %v3556_v0  ;;  %v3662_v10 = vld [vmem:[%s4500_s3] sm:$0xff] (!%p338_p2)  ;;  %v401_v27 = vld [vmem:[%s4506_s9 + $0x8] sm:$0xff] (!%p338_p2)  ;;  %s3559_s12 = smov (!%p338_p2), 1   ;;  %v697_v54 = vlaneseq (!%p338_p2)  ;;  %vm835_vm10 = vcmask (!%p338_p2), 588800   ;;  %vm953_vm11 = vcmask (!%p338_p2), 261120  }
   0x7   : > { %3188 = vmatprep.mubr.msk.f32.mxu1 (!%p338_p2), %vm3557_vm1, %v3556_v0  ;;  %3388 = vset.pattern.permute.xlu0 (!%p338_p2), %v3558_v7  ;;  %v400_v24 = vld [vmem:[%s4506_s9] sm:$0xff] (!%p338_p2)  ;;  %s3560_s13 = smov (!%p338_p2), 17   ;;  %s3561_s14 = smov (!%p338_p2), 127   ;;  %v3725_v62 = vld [vmem:[%s4498_s1 + $0x8] sm:$0xff] (!%p338_p2)  ;;  %vm1453_vm12 = vcmask (!%p338_p2), 130048   ;;  %vm1551_vm13 = vcmask (!%p338_p2), 7168  }
   0x8   : > { %3389 = vset.pattern.permute.xlu1 (!%p338_p2), %v3558_v7  ;;  %s3562_s15 = smov (!%p338_p2), 113   ;;  %s3563_s16 = smov (!%p338_p2), 16   ;;  %v3711_v56 = vshrl.u32 (!%p338_p2), %v697_v54, 7  ;;  %v3713_v57 = vand.u32 (!%p338_p2), 127, %v697_v54  ;;  %v3719_v60 = vld [vmem:[%s4498_s1] sm:$0xff] (!%p338_p2) }
   0x9   : > { %s4512_s20 = smov (!%p338_p2), 112   ;;  %s4510_s21 = smov (!%p338_p2), 111  }
   0xa   : > { %s3566_s23 = smov (!%p338_p2), 15   ;;  %v704_v59 = vsub.s32 (!%p338_p2), 0, %v3711_v56  ;;  %v721_v61 = vsub.s32 (!%p338_p2), 1, %v3711_v56  ;;  %vm699_vm2 = vcmp.lt.s32.totalorder (!%p338_p2), %v3713_v57, 17  ;;  %vm716_vm3 = vcmp.lt.s32.totalorder (!%p338_p2), %v3713_v57, 16 }
   0xb   : > { %vm733_vm4 = vcmp.lt.s32.totalorder (!%p338_p2), %v3713_v57, 15  ;;  %vm750_vm5 = vcmp.lt.s32.totalorder (!%p338_p2), %v3713_v57, 1  ;;  %vm767_vm6 = vcmp.lt.s32.totalorder (!%p338_p2), %v3713_v57, 127  ;;  %vm784_vm7 = vcmp.lt.s32.totalorder (!%p338_p2), %v3713_v57, 113 }
   0xc   : > { %vm801_vm8 = vcmp.lt.s32.totalorder (!%p338_p2), %v3713_v57, 112  ;;  %vm818_vm9 = vcmp.lt.s32.totalorder (!%p338_p2), %v3713_v57, 111  ;;  %v3085_v57 = vld [vmem:[%s4501_s4 + $0x28] sm:$0xff] (!%p338_p2) }
   0xd   : > { %s4518_s18 = smov (!%p377_p3, %s3014_s18), 1 }
   0xe   : > { %s4509_s19 = sshll.u32 %s4518_s18, 5 }
   0xf   : > { %s3646_s22 = scalar_lea.vmem %s4497_s0, %s4509_s19 }
  0x10   : > { %v388_v1 = vld [vmem:[%s3646_s22 + $0x8] sm:$0xff]  ;;  %v387_v2 = vld [vmem:[%s3646_s22] sm:$0xff] }
  0x11   : > { %425 = vmatprep.subr.mxu0 %v388_v1  ;;  %v3729_v1 = vrot.slane %v3719_v60, %v704_v59 }
  0x12   : > { %426 = vmatpush1.msra.mxu0 %v387_v2  ;;  %v3732_v2 = vrot.slane %v3725_v62, %v704_v59 }
  0x13   : > { %3023 = vmatmul.mubr.msk.f32.vlgmr.msra.gmra.mrb[0].mxu0 %vm421_vm0, %v420_v3  ;;  %3191 = vmatprep.subr.mxu0 %v3556_v0  ;;  %v3736_v3 = vrot.slane %v3719_v60, %v721_v61 }
  0x14   : > { %3193 = vmatprep.mubr.msk.f32.mxu0 %vm3557_vm1, %v3556_v0 }
  0xe6   : > { %v491_v4 = vpop.f32.mrb[0].mxu0 }
  0xe7   : > { %v493_v5 = vpop.f32.mrb[1].mxu0 }
  0xe8   : > { %v496_v6 = vadd.f32 %v493_v5, %v491_v4 }
  0xea   : > { %497 = vadd.xlane.f32.xlu0 %v496_v6 }
 0x177   : > { %v498_v8 = vpop.xlane.xlu0 %497 }
 0x178   : > { %v500_v9 = vmul.f32 0.00390625, %v498_v8 }
 0x17a   : > { %3187 = vmatpush3.msra.mxu1 %v500_v9 }
 0x17b   : > { %3189 = vmatmul.mubr.msk.f32.vlgmr.msra.gmra.mrb[0].mxu1 %vm421_vm0, %v3662_v10 }
 0x17c   : > { %912 = vmatprep.mubr.f32.mxu1 %v3556_v0 }
 0x24e   : > { %v570_v11 = vpop.f32.mrb[0].mxu1 }
 0x24f   : > { %576 = vperm.xlu0 %3388, %v570_v11   ;;  %v3190_v12 = vpop.f32.mrb[1].mxu1 }
 0x2ce   : > { %v577_v13 = vpop.permute.xlu0 %576 }
 0x2cf   : > { %v579_v14 = vsub.f32 %v491_v4, %v577_v13  ;;  %v580_v15 = vsub.f32 %v493_v5, %v577_v13  ;;  %v3739_v4 = vrot.slane %v3725_v62, %v721_v61 }
 0x2d1   : > { %v581_v16 = vmul.f32 %v579_v14, %v579_v14  ;;  %v582_v17 = vmul.f32 %v580_v15, %v580_v15 }
 0x2d3   : > { %v583_v18 = vadd.f32 %v582_v17, %v581_v16 }
 0x2d5   : > { %584 = vadd.xlane.f32.xlu1 %v583_v18 }
 0x362   : > { %v585_v19 = vpop.xlane.xlu1 %584 }
 0x363   : > { %v586_v20 = vmul.f32 0.00390625, %v585_v19  ;;  %v738_v19 = vsub.s32 2, %v3711_v56 }
 0x365   : > { %3192 = vmatpush3.msra.mxu0 %v586_v20  ;;  %v755_v20 = vsub.s32 3, %v3711_v56 }
 0x366   : > { %3194 = vmatmul.mubr.msk.f32.vlgmr.msra.gmra.mrb[2].mxu0 %vm421_vm0, %v3662_v10 }
 0x439   : > { %v653_v21 = vpop.f32.mrb[2].mxu0 }
 0x43a   : > { %v654_v22 = vadd.f32 0.001, %v653_v21  ;;  %v3195_v23 = vpop.f32.mrb[3].mxu0 }
 0x43b   : > { %v772_v23 = vsub.s32 5, %v3711_v56 }
 0x43c   : > { %3392 = vrsqrt.f32 %v654_v22  ;;  %v3757_v22 = vrot.slane %v3719_v60, %v738_v19 }
 0x446   : > { %v3393_v25 = vpop.eup %3392 }
 0x447   : > { %v658_v26 = vmul.f32 %v3393_v25, %v400_v24  ;;  %v3761_v25 = vrot.slane %v3725_v62, %v738_v19  ;;  %v831_v19 = vld [vmem:[%s4501_s4] sm:$0xff] }
 0x449   : > { %661 = vperm.xlu1 %3389, %v658_v26   ;;  %v3765_v26 = vrot.slane %v3719_v60, %v755_v20 }
 0x44d   : > { %668 = vperm.xlu1 %3389, %v401_v27   ;;  %v3768_v27 = vrot.slane %v3725_v62, %v755_v20  ;;  %v832_v20 = vld [vmem:[%s4501_s4 + $0x8] sm:$0xff] }
 0x4c8   : > { %v662_v28 = vpop.permute.xlu1 %661 }
 0x4c9   : > { %v664_v29 = vmul.f32 %v662_v28, %v579_v14  ;;  %v665_v30 = vmul.f32 %v662_v28, %v580_v15 }
 0x4cc   : > { %v669_v31 = vpop.permute.xlu1 %668 }
 0x4cd   : > { %v671_v32 = vadd.f32 %v669_v31, %v664_v29  ;;  %v672_v33 = vadd.f32 %v669_v31, %v665_v30 }
 0x4cf   : > { %v673_v34 = vmin.f32 %v671_v32, 20.0  ;;  %v674_v35 = vmin.f32 %v672_v33, 20.0 }
 0x4d1   : > { %v675_v36 = vmul.f32 1.442695, %v673_v34  ;;  %v677_v37 = vmul.f32 1.442695, %v674_v35  ;;  %v3783_v34 = vrot.slane %v3725_v62, %v772_v23 }
 0x4d3   : > { %3394 = vpow2.f32 %v675_v36 }
 0x4d4   : > { %3396 = vpow2.f32 %v677_v37 }
 0x4dd   : > { %v3395_v38 = vpop.eup %3394 }
 0x4de   : > { %v3397_v39 = vpop.eup %3396  ;;  %v679_v40 = vadd.f32 1.0, %v3395_v38 }
 0x4df   : > { %v680_v41 = vadd.f32 1.0, %v3397_v39 }
 0x4e0   : > { %v681_v42 = vmul.f32 %v679_v40, %v679_v40 }
 0x4e1   : > { %v682_v43 = vmul.f32 %v680_v41, %v680_v41 }
 0x4e2   : > { %v687_v44 = vadd.f32 1.0, %v681_v42  ;;  %v3026_v46 = vadd.f32 -1.0, %v681_v42 }
 0x4e3   : > { %v688_v45 = vadd.f32 1.0, %v682_v43  ;;  %v3027_v47 = vadd.f32 -1.0, %v682_v43 }
 0x4e4   : > { %3398 = vrcp.f32 %v687_v44  ;;  %v685_v48 = vmul.f32 %v3026_v46, %v671_v32 }
 0x4e5   : > { %3400 = vrcp.f32 %v688_v45  ;;  %v686_v52 = vmul.f32 %v3027_v47, %v672_v33  ;;  %v3780_v33 = vrot.slane %v3719_v60, %v772_v23  ;;  %v789_v45 = vsub.s32 6, %v3711_v56  ;;  %v834_v23 = vld [vmem:[%s4501_s4 + $0x18] sm:$0xff] }
 0x4e7   : > { %v3801_v54 = vrot.slane %v3719_v60, %v789_v45 }
 0x4ee   : > { %v3399_v49 = vpop.eup %3398 }
 0x4ef   : > { %v3675_v50 = vmul.f32 %v3399_v49, %v685_v48  ;;  %v3401_v51 = vpop.eup %3400  ;;  %v806_v48 = vsub.s32 7, %v3711_v56 }
 0x4f0   : > { %v3681_v53 = vmul.f32 %v3401_v51, %v686_v52 }
 0x4f1   : > { %746 = vrot.lane.b32.xlu0 %v3675_v50, %s3559_s12  ;;  %693 = vrot.lane.b32.xlu1 %v3675_v50, %s3560_s13  ;;  %v3808_v56 = vrot.slane %v3719_v60, %v806_v48 }
 0x4f5   : > { %763 = vrot.lane.b32.xlu0 %v3675_v50, %s3561_s14  ;;  %695 = vrot.lane.b32.xlu1 %v3681_v53, %s3560_s13 }
 0x4f9   : > { %780 = vrot.lane.b32.xlu0 %v3675_v50, %s3562_s15  ;;  %712 = vrot.lane.b32.xlu1 %v3675_v50, %s3563_s16 }
 0x4fd   : > { %797 = vrot.lane.b32.xlu0 %v3675_v50, %s4512_s20  ;;  %714 = vrot.lane.b32.xlu1 %v3681_v53, %s3563_s16 }
 0x501   : > { %814 = vrot.lane.b32.xlu0 %v3675_v50, %s4510_s21  ;;  %729 = vrot.lane.b32.xlu1 %v3675_v50, %s3566_s23 }
 0x505   : > { %731 = vrot.lane.b32.xlu1 %v3681_v53, %s3566_s23 }
 0x509   : > { %748 = vrot.lane.b32.xlu1 %v3681_v53, %s3559_s12 }
 0x50d   : > { %765 = vrot.lane.b32.xlu1 %v3681_v53, %s3561_s14 }
 0x511   : > { %782 = vrot.lane.b32.xlu1 %v3681_v53, %s3562_s15 }
 0x515   : > { %799 = vrot.lane.b32.xlu1 %v3681_v53, %s4512_s20 }
 0x519   : > { %816 = vrot.lane.b32.xlu1 %v3681_v53, %s4510_s21 }
 0x563   : > { %v694_v55 = vpop.permute.xlu1 %693  ;;  %v747_v15 = vpop.permute.xlu0 %746 }
 0x567   : > { %v696_v58 = vpop.permute.xlu1 %695  ;;  %v764_v24 = vpop.permute.xlu0 %763 }
 0x568   : > { %v700_v5 = vsel %vm699_vm2, %v694_v55, %v696_v58  ;;  %v701_v6 = vsel %vm699_vm2, %v696_v58, %v694_v55  ;;  %v3804_v58 = vrot.slane %v3725_v62, %v789_v45 }
 0x569   : > { %v710_v11 = vmul.f32 %v3729_v1, %v701_v6  ;;  %v711_v12 = vmul.f32 %v3732_v2, %v700_v5 }
 0x56b   : > { %v713_v63 = vpop.permute.xlu1 %712  ;;  %v781_v39 = vpop.permute.xlu0 %780 }
 0x56f   : > { %v715_v7 = vpop.permute.xlu1 %714  ;;  %v798_v55 = vpop.permute.xlu0 %797 }
 0x570   : > { %v717_v8 = vsel %vm716_vm3, %v713_v63, %v715_v7  ;;  %v718_v9 = vsel %vm716_vm3, %v715_v7, %v713_v63 }
 0x571   : > { %v727_v13 = vmul.f32 %v3736_v3, %v718_v9  ;;  %v728_v14 = vmul.f32 %v3739_v4, %v717_v8  ;;  %v3829_v8 = vld [vmem:[%s4498_s1 + $0x18] ss:$0 sm:$0xff] }
 0x573   : > { %v3294_v16 = vpack.c.bf16 %v727_v13, %v710_v11  ;;  %v730_v17 = vpop.permute.xlu1 %729  ;;  %v3292_v18 = vpack.c.bf16 %v728_v14, %v711_v12  ;;  %v815_v9 = vpop.permute.xlu0 %814 }
 0x575   : > { %3293 = vmatprep.subr.bf16.mxu1 %v3292_v18 }
 0x576   : > { %3295 = vmatpush1.bf16.msra.mxu1 %v3294_v16 }
 0x577   : > { %v732_v21 = vpop.permute.xlu1 %731 }
 0x578   : > { %v734_v28 = vsel %vm733_vm4, %v730_v17, %v732_v21  ;;  %v735_v29 = vsel %vm733_vm4, %v732_v21, %v730_v17  ;;  %v833_v21 = vld [vmem:[%s4501_s4 + $0x10] sm:$0xff] }
 0x579   : > { %v744_v35 = vmul.f32 %v3757_v22, %v735_v29  ;;  %v745_v36 = vmul.f32 %v3761_v25, %v734_v28 }
 0x57b   : > { %v749_v30 = vpop.permute.xlu1 %748 }
 0x57c   : > { %v751_v31 = vsel %vm750_vm5, %v747_v15, %v749_v30  ;;  %v752_v32 = vsel %vm750_vm5, %v749_v30, %v747_v15  ;;  %v3836_v15 = vld [vmem:[%s4498_s1 + $0x10] ss:$0 sm:$0xff] }
 0x57d   : > { %v761_v37 = vmul.f32 %v3765_v26, %v752_v32  ;;  %v762_v38 = vmul.f32 %v3768_v27, %v751_v31 }
 0x57f   : > { %v3298_v40 = vpack.c.bf16 %v761_v37, %v744_v35  ;;  %v766_v41 = vpop.permute.xlu1 %765  ;;  %v3296_v42 = vpack.c.bf16 %v762_v38, %v745_v36 }
 0x580   : > { %v768_v43 = vsel %vm767_vm6, %v764_v24, %v766_v41  ;;  %v769_v44 = vsel %vm767_vm6, %v766_v41, %v764_v24  ;;  %v3865_v41 = vld [vmem:[%s4502_s5] sm:$0xff] }
 0x581   : > { %v778_v46 = vmul.f32 %v3780_v33, %v768_v43  ;;  %v779_v47 = vmul.f32 %v3783_v34, %v769_v44  ;;  %3297 = vmatprep.subr.bf16.mxu1 %v3296_v42  ;;  %3204 = vmatprep.mubr.msk.f32.mxu0 %vm953_vm11, %v3865_v41 }
 0x582   : > { %3299 = vmatpush1.bf16.msra.mxu1 %v3298_v40 }
 0x583   : > { %v3302_v49 = vpack.c.bf16 %v778_v46, %v3675_v50  ;;  %v783_v51 = vpop.permute.xlu1 %782  ;;  %v3300_v52 = vpack.c.bf16 %v779_v47, %v3681_v53  ;;  %v3811_v50 = vrot.slane %v3725_v62, %v806_v48 }
 0x584   : > { %v785_v59 = vsel %vm784_vm7, %v781_v39, %v783_v51  ;;  %v786_v53 = vsel %vm784_vm7, %v783_v51, %v781_v39 }
 0x585   : > { %3301 = vmatprep.subr.bf16.mxu1 %v3300_v52  ;;  %v795_v60 = vmul.f32 %v3801_v54, %v785_v59  ;;  %v796_v62 = vmul.f32 %v3804_v58, %v786_v53  ;;  %v3877_v59 = vld [vmem:[%s4502_s5 + $0x10] sm:$0xff]  ;;  %v3886_v53 = vld [vmem:[%s4502_s5 + $0x18] sm:$0xff] }
 0x586   : > { %3303 = vmatpush1.bf16.msra.mxu1 %v3302_v49 }
 0x587   : > { %v800_v61 = vpop.permute.xlu1 %799 }
 0x588   : > { %v802_v63 = vsel %vm801_vm8, %v798_v55, %v800_v61  ;;  %v803_v5 = vsel %vm801_vm8, %v800_v61, %v798_v55  ;;  %v3872_v55 = vld [vmem:[%s4502_s5 + $0x8] sm:$0xff] }
 0x589   : > { %v812_v6 = vmul.f32 %v3808_v56, %v802_v63  ;;  %v813_v7 = vmul.f32 %v3811_v50, %v803_v5 }
 0x58b   : > { %v3306_v11 = vpack.c.bf16 %v812_v6, %v795_v60  ;;  %v817_v12 = vpop.permute.xlu1 %816  ;;  %v3304_v13 = vpack.c.bf16 %v813_v7, %v796_v62 }
 0x58c   : > { %v820_v14 = vsel %vm818_vm9, %v817_v12, %v815_v9  ;;  %v819_v16 = vsel %vm818_vm9, %v815_v9, %v817_v12 }
 0x58d   : > { %v830_v17 = vmul.f32 %v3829_v8, %v820_v14  ;;  %3305 = vmatprep.subr.bf16.mxu1 %v3304_v13  ;;  %v829_v18 = vmul.f32 %v3836_v15, %v819_v16 }
 0x58e   : > { %3307 = vmatpush1.bf16.msra.mxu1 %v3306_v11 }
 0x58f   : > { %864 = vmatprep.subr.mxu1 %v830_v17 }
 0x592   : > { %865 = vmatpush1.msra.mxu1 %v829_v18 }
 0x593   : > { %3030 = vmatmul.mubr.msk.f32.vlgmr.msra.gmra.mrb[2].mxu1 %vm835_vm10, %v831_v19 }
 0x594   : > { %918 = vmatprep.mubr.f32.mxu1 %v3556_v0 }
 0x597   : > { %3031 = vmatmul.mubr.msk.f32.gmra.mrb[4].mxu1 %vm835_vm10, %v832_v20 }
 0x598   : > { %924 = vmatprep.mubr.f32.mxu1 %v3556_v0 }
 0x59b   : > { %3032 = vmatmul.mubr.msk.f32.gmra.mrb[6].mxu1 %vm835_vm10, %v833_v21 }
 0x59c   : > { %930 = vmatprep.mubr.f32.mxu1 %v3556_v0 }
 0x59f   : > { %3033 = vmatmul.mubr.msk.f32.gmra.mrb[8].mxu1 %vm835_vm10, %v834_v23 }
 0x5a0   : > { %1754 = vmatprep.mubr.f32.mxu1 %v3556_v0 }
 0x666   : > { %v914_v24 = vpop.f32.mrb[2].mxu1 }
 0x667   : > { %v916_v28 = vpop.f32.mrb[3].mxu1 }
 0x668   : > { %v937_v29 = vadd.f32 %v916_v28, %v914_v24 }
 0x66a   : > { %938 = vadd.xlane.f32.xlu0 %v937_v29  ;;  %v920_v30 = vpop.f32.mrb[4].mxu1 }
 0x66b   : > { %v922_v31 = vpop.f32.mrb[5].mxu1 }
 0x66c   : > { %v940_v32 = vadd.f32 %v922_v31, %v920_v30 }
 0x66e   : > { %941 = vadd.xlane.f32.xlu1 %v940_v32  ;;  %v926_v35 = vpop.f32.mrb[6].mxu1 }
 0x66f   : > { %v928_v36 = vpop.f32.mrb[7].mxu1 }
 0x670   : > { %v943_v37 = vadd.f32 %v928_v36, %v926_v35 }
 0x672   : > { %944 = vadd.xlane.f32.xlu0 %v943_v37  ;;  %v932_v38 = vpop.f32.mrb[8].mxu1 }
 0x673   : > { %v934_v39 = vpop.f32.mrb[9].mxu1 }
 0x674   : > { %v946_v40 = vadd.f32 %v934_v39, %v932_v38 }
 0x676   : > { %947 = vadd.xlane.f32.xlu0 %v946_v40  ;;  %v406_v40 = vld [vmem:[%s4506_s9 + $0x30] sm:$0xff] }
 0x6f7   : > { %v939_v42 = vpop.xlane.xlu0 %938 }
 0x6f8   : > { %v949_v44 = vmul.f32 0.00390625, %v939_v42  ;;  %v390_v42 = vld [vmem:[%s3646_s22 + $0x18] sm:$0xff] }
 0x6f9   : > { %1690 = vmatprep.subr.mxu1 %v390_v42 }
 0x6fb   : > { %v942_v43 = vpop.xlane.xlu1 %941 }
 0x6fc   : > { %v950_v45 = vmul.f32 0.00390625, %v942_v43  ;;  %v389_v43 = vld [vmem:[%s3646_s22 + $0x10] sm:$0xff] }
 0x6fd   : > { %1691 = vmatpush1.msra.mxu1 %v389_v43  ;;  %v404_v43 = vld [vmem:[%s4506_s9 + $0x20] sm:$0xff] }
 0x6fe   : > { %v3308_v46 = vpack.c.bf16 %v950_v45, %v949_v44  ;;  %v3078_v44 = vld [vmem:[%s4499_s2 + $0x8] sm:$0xff]  ;;  %3239 = vmatprep.subr.mxu1 %v3556_v0 }
 0x6ff   : > { %v945_v47 = vpop.xlane.xlu0 %944  ;;  %3079 = vmatmul.mubr.msk.f32.vlgmr.msra.gmra.mrb[10].mxu1 %vm421_vm0, %v3078_v44 }
 0x700   : > { %3309 = vmatprep.subr.bf16.mxu0 %v3308_v46  ;;  %v951_v49 = vmul.f32 0.00390625, %v945_v47  ;;  %3241 = vmatprep.mubr.msk.f32.mxu1 %vm3557_vm1, %v3556_v0 }
 0x701   : > { %3311 = vmatpush3.bf16.msra.mxu0 %v3308_v46 }
 0x703   : > { %v948_v48 = vpop.xlane.xlu0 %947 }
 0x704   : > { %v952_v51 = vmul.f32 0.00390625, %v948_v48 }
 0x706   : > { %v3312_v52 = vpack.c.bf16 %v952_v51, %v951_v49 }
 0x708   : > { %3313 = vmatprep.subr.bf16.mxu0 %v3312_v52 }
 0x709   : > { %3315 = vmatpush3.bf16.msra.mxu0 %v3312_v52 }
 0x70c   : > { %3205 = vmatmul.mubr.msk.f32.vlgmr.msra.gmra.mrb[4].mxu0 %vm953_vm11, %v3872_v55 }
 0x70d   : > { %3207 = vmatprep.mubr.msk.f32.mxu0 %vm953_vm11, %v3877_v59 }
 0x710   : > { %3208 = vmatmul.mubr.msk.f32.gmra.mrb[6].mxu0 %vm953_vm11, %v3886_v53 }
 0x711   : > { %3218 = vmatprep.mubr.msk.f32.mxu0 %vm953_vm11, %v3865_v41 }
 0x7df   : > { %v3206_v61 = vpop.f32.mrb[4].mxu0 }
 0x7e0   : > { %1058 = vperm.xlu0 %3388, %v3206_v61   ;;  %v1032_v63 = vpop.f32.mrb[5].mxu0 }
 0x7e1   : > { %1053 = vperm.xlu1 %3389, %v1032_v63  }
 0x7e3   : > { %v3209_v5 = vpop.f32.mrb[6].mxu0 }
 0x7e4   : > { %v1042_v60 = vpop.f32.mrb[7].mxu0 }
 0x7e5   : > { %1063 = vperm.xlu1 %3389, %v1042_v60   ;;  %v3948_v60 = vpop.f32.mrb[10].mxu1 }
 0x7e9   : > { %1068 = vperm.xlu1 %3389, %v3209_v5  }
 0x85f   : > { %v1059_v62 = vpop.permute.xlu0 %1058 }
 0x860   : > { %v3892_v6 = vsub.f32 %v920_v30, %v1059_v62  ;;  %v3894_v7 = vsub.f32 %v922_v31, %v1059_v62  ;;  %v1054_v9 = vpop.permute.xlu1 %1053  ;;  %v3950_v62 = vpop.f32.mrb[11].mxu1 }
 0x861   : > { %v3896_v11 = vsub.f32 %v914_v24, %v1054_v9  ;;  %v3898_v12 = vsub.f32 %v916_v28, %v1054_v9  ;;  %v1761_v9 = vadd.f32 %v3950_v62, %v3948_v60 }
 0x862   : > { %v1081_v13 = vmul.f32 %v3892_v6, %v3892_v6  ;;  %v1082_v14 = vmul.f32 %v3894_v7, %v3894_v7 }
 0x863   : > { %v1079_v16 = vmul.f32 %v3896_v11, %v3896_v11  ;;  %v1080_v17 = vmul.f32 %v3898_v12, %v3898_v12 }
 0x864   : > { %v1064_v18 = vpop.permute.xlu1 %1063  ;;  %v1090_v19 = vadd.f32 %v1082_v14, %v1081_v13 }
 0x865   : > { %v3908_v20 = vsub.f32 %v926_v35, %v1064_v18  ;;  %v3910_v21 = vsub.f32 %v928_v36, %v1064_v18  ;;  %v1087_v23 = vadd.f32 %v1080_v17, %v1079_v16 }
 0x866   : > { %1091 = vadd.xlane.f32.xlu1 %v1090_v19 }
 0x867   : > { %1088 = vadd.xlane.f32.xlu0 %v1087_v23  ;;  %v1083_v24 = vmul.f32 %v3908_v20, %v3908_v20  ;;  %v1084_v28 = vmul.f32 %v3910_v21, %v3910_v21 }
 0x868   : > { %v1069_v29 = vpop.permute.xlu1 %1068 }
 0x869   : > { %v3916_v30 = vsub.f32 %v932_v38, %v1069_v29  ;;  %v3918_v31 = vsub.f32 %v934_v39, %v1069_v29  ;;  %v1093_v32 = vadd.f32 %v1084_v28, %v1083_v24  ;;  %v407_v38 = vld [vmem:[%s4506_s9 + $0x38] sm:$0xff]  ;;  %v408_v39 = vld [vmem:[%s4506_s9 + $0x40] sm:$0xff]  ;;  %v402_v29 = vld [vmem:[%s4506_s9 + $0x10] sm:$0xff] }
 0x86a   : > { %v403_v28 = vld [vmem:[%s4506_s9 + $0x18] sm:$0xff] }
 0x86b   : > { %1094 = vadd.xlane.f32.xlu0 %v1093_v32  ;;  %v1085_v35 = vmul.f32 %v3916_v30, %v3916_v30  ;;  %v1086_v36 = vmul.f32 %v3918_v31, %v3918_v31 }
 0x86d   : > { %v1096_v37 = vadd.f32 %v1086_v36, %v1085_v35 }
 0x86f   : > { %1097 = vadd.xlane.f32.xlu0 %v1096_v37 }
 0x877   : > { %1226 = vperm.xlu1 %3389, %v406_v40   ;;  %v405_v40 = vld [vmem:[%s4506_s9 + $0x28] sm:$0xff] }
 0x885   : > { %1231 = vperm.xlu0 %3388, %v407_v38  }
 0x889   : > { %1236 = vperm.xlu0 %3388, %v408_v39  }
 0x8f3   : > { %v1092_v45 = vpop.xlane.xlu1 %1091 }
 0x8f4   : > { %v1100_v46 = vmul.f32 0.00390625, %v1092_v45  ;;  %v1089_v47 = vpop.xlane.xlu0 %1088  ;;  %v409_v45 = vld [vmem:[%s4506_s9 + $0x48] sm:$0xff] }
 0x8f5   : > { %v1099_v48 = vmul.f32 0.00390625, %v1089_v47 }
 0x8f7   : > { %v3316_v49 = vpack.c.bf16 %v1100_v46, %v1099_v48  ;;  %v1227_v48 = vpop.permute.xlu1 %1226 }
 0x8f8   : > { %v1095_v51 = vpop.xlane.xlu0 %1094 }
 0x8f9   : > { %3317 = vmatprep.subr.bf16.mxu0 %v3316_v49  ;;  %v1101_v61 = vmul.f32 0.00390625, %v1095_v51 }
 0x8fa   : > { %3319 = vmatpush3.bf16.msra.mxu0 %v3316_v49 }
 0x8fc   : > { %v1098_v52 = vpop.xlane.xlu0 %1097 }
 0x8fd   : > { %v1102_v63 = vmul.f32 0.00390625, %v1098_v52 }
 0x8ff   : > { %v3320_v5 = vpack.c.bf16 %v1102_v63, %v1101_v61 }
 0x901   : > { %3321 = vmatprep.subr.bf16.mxu0 %v3320_v5 }
 0x902   : > { %3323 = vmatpush3.bf16.msra.mxu0 %v3320_v5 }
 0x904   : > { %v1232_v46 = vpop.permute.xlu0 %1231 }
 0x905   : > { %3219 = vmatmul.mubr.msk.f32.vlgmr.msra.gmra.mrb[8].mxu0 %vm953_vm11, %v3872_v55 }
 0x906   : > { %3221 = vmatprep.mubr.msk.f32.mxu0 %vm953_vm11, %v3877_v59 }
 0x908   : > { %v1237_v47 = vpop.permute.xlu0 %1236 }
 0x909   : > { %3222 = vmatmul.mubr.msk.f32.gmra.mrb[10].mxu0 %vm953_vm11, %v3886_v53 }
 0x9d8   : > { %v3220_v13 = vpop.f32.mrb[8].mxu0 }
 0x9d9   : > { %v1175_v14 = vadd.f32 0.001, %v3220_v13  ;;  %v1169_v16 = vpop.f32.mrb[9].mxu0 }
 0x9da   : > { %v1170_v17 = vadd.f32 0.001, %v1169_v16 }
 0x9db   : > { %3402 = vrsqrt.f32 %v1175_v14 }
 0x9dc   : > { %3404 = vrsqrt.f32 %v1170_v17  ;;  %v3223_v18 = vpop.f32.mrb[10].mxu0 }
 0x9dd   : > { %v1185_v19 = vadd.f32 0.001, %v3223_v18  ;;  %v1179_v23 = vpop.f32.mrb[11].mxu0 }
 0x9de   : > { %v1180_v24 = vadd.f32 0.001, %v1179_v23 }
 0x9df   : > { %3406 = vrsqrt.f32 %v1185_v19 }
 0x9e0   : > { %3408 = vrsqrt.f32 %v1180_v24 }
 0x9e5   : > { %v3403_v32 = vpop.eup %3402 }
 0x9e6   : > { %v3405_v35 = vpop.eup %3404  ;;  %v1193_v36 = vmul.f32 %v3403_v32, %v403_v28 }
 0x9e7   : > { %v1192_v37 = vmul.f32 %v3405_v35, %v402_v29 }
 0x9e8   : > { %1203 = vperm.xlu0 %3388, %v1193_v36  }
 0x9e9   : > { %v3407_v38 = vpop.eup %3406  ;;  %1198 = vperm.xlu1 %3389, %v1192_v37  }
 0x9ea   : > { %v3409_v39 = vpop.eup %3408  ;;  %v1195_v42 = vmul.f32 %v3407_v38, %v405_v40 }
 0x9eb   : > { %v1194_v44 = vmul.f32 %v3409_v39, %v404_v43 }
 0x9ed   : > { %1213 = vperm.xlu1 %3389, %v1195_v42  }
 0x9f1   : > { %1208 = vperm.xlu1 %3389, %v1194_v44  }
 0x9f5   : > { %1241 = vperm.xlu1 %3389, %v409_v45  }
 0xa07   : > { %1762 = vadd.xlane.f32.xlu0 %v1761_v9 }
 0xa67   : > { %v1204_v49 = vpop.permute.xlu0 %1203 }
 0xa68   : > { %v1218_v51 = vmul.f32 %v1204_v49, %v3892_v6  ;;  %v1219_v52 = vmul.f32 %v1204_v49, %v3894_v7  ;;  %v1199_v61 = vpop.permute.xlu1 %1198 }
 0xa69   : > { %v1216_v63 = vmul.f32 %v1199_v61, %v3896_v11  ;;  %v1217_v5 = vmul.f32 %v1199_v61, %v3898_v12 }
 0xa6a   : > { %v3973_v13 = vadd.f32 %v1232_v46, %v1218_v51  ;;  %v3975_v14 = vadd.f32 %v1232_v46, %v1219_v52 }
 0xa6b   : > { %v3977_v16 = vadd.f32 %v1227_v48, %v1216_v63  ;;  %v3979_v9 = vadd.f32 %v1227_v48, %v1217_v5 }
 0xa6c   : > { %v1254_v17 = vmin.f32 %v3973_v13, 20.0  ;;  %v1255_v18 = vmin.f32 %v3975_v14, 20.0  ;;  %v1214_v6 = vpop.permute.xlu1 %1213 }
 0xa6d   : > { %v1252_v7 = vmin.f32 %v3977_v16, 20.0  ;;  %v1253_v19 = vmin.f32 %v3979_v9, 20.0  ;;  %v1222_v35 = vmul.f32 %v1214_v6, %v3916_v30  ;;  %v1223_v36 = vmul.f32 %v1214_v6, %v3918_v31 }
 0xa6e   : > { %v1264_v11 = vmul.f32 1.442695, %v1254_v17  ;;  %v1266_v23 = vmul.f32 1.442695, %v1255_v18 }
 0xa6f   : > { %v1260_v12 = vmul.f32 1.442695, %v1252_v7  ;;  %v1262_v24 = vmul.f32 1.442695, %v1253_v19 }
 0xa70   : > { %3410 = vpow2.f32 %v1264_v11  ;;  %v1209_v28 = vpop.permute.xlu1 %1208 }
 0xa71   : > { %3412 = vpow2.f32 %v1266_v23  ;;  %v1220_v29 = vmul.f32 %v1209_v28, %v3908_v20  ;;  %v1221_v32 = vmul.f32 %v1209_v28, %v3910_v21 }
 0xa72   : > { %3414 = vpow2.f32 %v1260_v12 }
 0xa73   : > { %3416 = vpow2.f32 %v1262_v24  ;;  %v3989_v37 = vadd.f32 %v1237_v47, %v1220_v29  ;;  %v3991_v40 = vadd.f32 %v1237_v47, %v1221_v32 }
 0xa74   : > { %v1242_v38 = vpop.permute.xlu1 %1241 }
 0xa75   : > { %v1256_v39 = vmin.f32 %v3989_v37, 20.0  ;;  %v1257_v42 = vmin.f32 %v3991_v40, 20.0  ;;  %v3995_v43 = vadd.f32 %v1242_v38, %v1222_v35  ;;  %v3997_v20 = vadd.f32 %v1242_v38, %v1223_v36 }
 0xa77   : > { %v1268_v21 = vmul.f32 1.442695, %v1256_v39  ;;  %v1270_v44 = vmul.f32 1.442695, %v1257_v42  ;;  %v1258_v30 = vmin.f32 %v3995_v43, 20.0  ;;  %v1259_v45 = vmin.f32 %v3997_v20, 20.0 }
 0xa79   : > { %3418 = vpow2.f32 %v1268_v21  ;;  %v1272_v31 = vmul.f32 1.442695, %v1258_v30  ;;  %v1274_v46 = vmul.f32 1.442695, %v1259_v45 }
 0xa7a   : > { %v3411_v47 = vpop.eup %3410  ;;  %3420 = vpow2.f32 %v1270_v44 }
 0xa7b   : > { %v3413_v48 = vpop.eup %3412  ;;  %v1278_v49 = vadd.f32 1.0, %v3411_v47  ;;  %3422 = vpow2.f32 %v1272_v31 }
 0xa7c   : > { %v3415_v51 = vpop.eup %3414  ;;  %v1279_v52 = vadd.f32 1.0, %v3413_v48  ;;  %3424 = vpow2.f32 %v1274_v46 }
 0xa7d   : > { %v3417_v61 = vpop.eup %3416  ;;  %v1286_v63 = vmul.f32 %v1278_v49, %v1278_v49  ;;  %v1276_v5 = vadd.f32 1.0, %v3415_v51 }
 0xa7e   : > { %v1287_v17 = vmul.f32 %v1279_v52, %v1279_v52  ;;  %v1277_v18 = vadd.f32 1.0, %v3417_v61 }
 0xa7f   : > { %v1310_v6 = vadd.f32 1.0, %v1286_v63  ;;  %v1284_v7 = vmul.f32 %v1276_v5, %v1276_v5  ;;  %v3044_v47 = vadd.f32 -1.0, %v1286_v63 }
 0xa80   : > { %v1311_v19 = vadd.f32 1.0, %v1287_v17  ;;  %v1285_v11 = vmul.f32 %v1277_v18, %v1277_v18  ;;  %v3045_v52 = vadd.f32 -1.0, %v1287_v17 }
 0xa81   : > { %v1308_v23 = vadd.f32 1.0, %v1284_v7  ;;  %3426 = vrcp.f32 %v1310_v6  ;;  %v3042_v48 = vadd.f32 -1.0, %v1284_v7 }
 0xa82   : > { %v1309_v12 = vadd.f32 1.0, %v1285_v11  ;;  %3428 = vrcp.f32 %v1311_v19  ;;  %v3043_v61 = vadd.f32 -1.0, %v1285_v11  ;;  %v1302_v19 = vmul.f32 %v3044_v47, %v3973_v13 }
 0xa83   : > { %v3419_v24 = vpop.eup %3418  ;;  %3430 = vrcp.f32 %v1308_v23  ;;  %v1300_v23 = vmul.f32 %v3042_v48, %v3977_v16 }
 0xa84   : > { %v3421_v28 = vpop.eup %3420  ;;  %v1280_v29 = vadd.f32 1.0, %v3419_v24  ;;  %3432 = vrcp.f32 %v1309_v12  ;;  %v1303_v24 = vmul.f32 %v3045_v52, %v3975_v14  ;;  %v1301_v63 = vmul.f32 %v3043_v61, %v3979_v9  ;;  %v1343_v61 = vld [vmem:[%s4503_s6 + $0x8] sm:$0xff] }
 0xa85   : > { %v3423_v32 = vpop.eup %3422  ;;  %v1281_v35 = vadd.f32 1.0, %v3421_v28 }
 0xa86   : > { %v3425_v36 = vpop.eup %3424  ;;  %v1288_v38 = vmul.f32 %v1280_v29, %v1280_v29  ;;  %v1282_v39 = vadd.f32 1.0, %v3423_v32 }
 0xa87   : > { %v1289_v42 = vmul.f32 %v1281_v35, %v1281_v35  ;;  %v1283_v21 = vadd.f32 1.0, %v3425_v36 }
 0xa88   : > { %v1312_v44 = vadd.f32 1.0, %v1288_v38  ;;  %v1290_v30 = vmul.f32 %v1282_v39, %v1282_v39  ;;  %v3046_v12 = vadd.f32 -1.0, %v1288_v38 }
 0xa89   : > { %v1313_v45 = vadd.f32 1.0, %v1289_v42  ;;  %v1291_v31 = vmul.f32 %v1283_v21, %v1283_v21  ;;  %v3047_v7 = vadd.f32 -1.0, %v1289_v42 }
 0xa8a   : > { %3434 = vrcp.f32 %v1312_v44  ;;  %v1314_v46 = vadd.f32 1.0, %v1290_v30  ;;  %v3048_v17 = vadd.f32 -1.0, %v1290_v30  ;;  %v1304_v13 = vmul.f32 %v3046_v12, %v3989_v37 }
 0xa8b   : > { %3436 = vrcp.f32 %v1313_v45  ;;  %v1315_v49 = vadd.f32 1.0, %v1291_v31  ;;  %v3427_v51 = vpop.eup %3426  ;;  %v3049_v35 = vadd.f32 -1.0, %v1291_v31  ;;  %v1305_v16 = vmul.f32 %v3047_v7, %v3991_v40 }
 0xa8c   : > { %3438 = vrcp.f32 %v1314_v46  ;;  %v3429_v5 = vpop.eup %3428  ;;  %v4005_v28 = vmul.f32 %v3427_v51, %v1302_v19  ;;  %v1306_v9 = vmul.f32 %v3048_v17, %v3995_v43  ;;  %v1342_v51 = vld [vmem:[%s4503_s6] sm:$0xff] }
 0xa8d   : > { %3440 = vrcp.f32 %v1315_v49  ;;  %v3431_v18 = vpop.eup %3430  ;;  %v4009_v11 = vmul.f32 %v3429_v5, %v1303_v24  ;;  %v1307_v30 = vmul.f32 %v3049_v35, %v3997_v20  ;;  %3226 = vmatprep.mubr.msk.f32.mxu0 %vm421_vm0, %v1342_v51  ;;  %v1449_v19 = vld [vmem:[%s4504_s7] sm:$0xff]  ;;  %v411_v35 = vld [vmem:[%s4506_s9 + $0x58] sm:$0xff] }
 0xa8e   : > { %v3433_v6 = vpop.eup %3432  ;;  %v4007_v29 = vmul.f32 %v3431_v18, %v1300_v23 }
 0xa8f   : > { %v4011_v32 = vmul.f32 %v3433_v6, %v1301_v63  ;;  %v3059_v6 = vld [vmem:[%s4506_s9 + $0xa8] sm:$0xff] }
 0xa90   : > { %v1332_v21 = vadd.f32 %v4005_v28, %v4007_v29 }
 0xa91   : > { %v1333_v37 = vadd.f32 %v4009_v11, %v4011_v32 }
 0xa94   : > { %v3435_v36 = vpop.eup %3434  ;;  %v1763_v38 = vpop.xlane.xlu0 %1762 }
 0xa95   : > { %v3437_v14 = vpop.eup %3436  ;;  %v1764_v39 = vmul.f32 0.00390625, %v1763_v38  ;;  %v4016_v42 = vmul.f32 %v3435_v36, %v1304_v13 }
 0xa96   : > { %v3439_v44 = vpop.eup %3438  ;;  %v4021_v45 = vmul.f32 %v3437_v14, %v1305_v16  ;;  %v412_v16 = vld [vmem:[%s4506_s9 + $0x60] sm:$0xff]  ;;  %v415_v14 = vld [vmem:[%s4506_s9 + $0x78] sm:$0xff] }
 0xa97   : > { %v3441_v31 = vpop.eup %3440  ;;  %3240 = vmatpush3.msra.mxu1 %v1764_v39  ;;  %v4025_v40 = vmul.f32 %v3439_v44, %v1306_v9  ;;  %v1334_v43 = vadd.f32 %v1332_v21, %v4016_v42  ;;  %v414_v21 = vld [vmem:[%s4506_s9 + $0x70] sm:$0xff] }
 0xa98   : > { %3242 = vmatmul.mubr.msk.f32.vlgmr.msra.gmra.mrb[12].mxu1 %vm421_vm0, %v3662_v10  ;;  %v4030_v46 = vmul.f32 %v3441_v31, %v1307_v30  ;;  %v1335_v47 = vadd.f32 %v1333_v37, %v4021_v45 }
 0xa99   : > { %v1336_v20 = vadd.f32 %v1334_v43, %v4025_v40  ;;  %2099 = vmatprep.mubr.f32.mxu1 %v3556_v0 }
 0xa9a   : > { %v1337_v48 = vadd.f32 %v1335_v47, %v4030_v46 }
 0xa9c   : > { %v1338_v49 = vadd.f32 %v1337_v48, %v1336_v20 }
 0xa9e   : > { %1339 = vadd.xlane.f32.xlu1 %v1338_v49 }
 0xb2b   : > { %v1340_v52 = vpop.xlane.xlu1 %1339 }
 0xb2c   : > { %v1341_v10 = vmul.f32 0.00390625, %v1340_v52 }
 0xb2e   : > { %3224 = vmatprep.subr.mxu0 %v1341_v10 }
 0xb2f   : > { %3225 = vmatpush3.msra.mxu0 %v1341_v10 }
 0xb30   : > { %3227 = vmatmul.mubr.msk.f32.vlgmr.msra.gmra.mrb[12].mxu0 %vm421_vm0, %v1343_v61 }
 0xb31   : > { %3233 = vmatprep.mubr.msk.f32.mxu0 %vm1453_vm12, %v1449_v19 }
 0xb6b   : > { %v1831_v5 = vpop.f32.mrb[12].mxu1 }
 0xb6c   : > { %1837 = vperm.xlu0 %3388, %v1831_v5   ;;  %v3243_v18 = vpop.f32.mrb[13].mxu1 }
 0xb70   : > { %1929 = vperm.xlu0 %3388, %v3059_v6  }
 0xbeb   : > { %v1838_v23 = vpop.permute.xlu0 %1837 }
 0xbec   : > { %v4052_v12 = vsub.f32 %v3948_v60, %v1838_v23  ;;  %v4055_v24 = vsub.f32 %v3950_v62, %v1838_v23  ;;  %v410_v60 = vld [vmem:[%s4506_s9 + $0x50] sm:$0xff]  ;;  %v413_v62 = vld [vmem:[%s4506_s9 + $0x68] sm:$0xff] }
 0xbee   : > { %v1842_v63 = vmul.f32 %v4052_v12, %v4052_v12  ;;  %v1843_v7 = vmul.f32 %v4055_v24, %v4055_v24 }
 0xbf0   : > { %v1844_v17 = vadd.f32 %v1843_v7, %v1842_v63 }
 0xbf2   : > { %1845 = vadd.xlane.f32.xlu1 %v1844_v17 }
 0xc03   : > { %v3228_v13 = vpop.f32.mrb[12].mxu0 }
 0xc04   : > { %v1422_v36 = vadd.f32 %v3228_v13, %v411_v35  ;;  %v1416_v38 = vpop.f32.mrb[13].mxu0  ;;  %v1450_v13 = vld [vmem:[%s4504_s7 + $0x8] sm:$0xff] }
 0xc05   : > { %v1417_v9 = vadd.f32 %v1416_v38, %v410_v60 }
 0xc06   : > { %v1426_v39 = vmul.f32 %v1422_v36, %v413_v62  ;;  %v1451_v36 = vld [vmem:[%s4504_s7 + $0x10] sm:$0xff] }
 0xc07   : > { %v1425_v44 = vmul.f32 %v1417_v9, %v412_v16  ;;  %v1452_v16 = vld [vmem:[%s4504_s7 + $0x18] sm:$0xff]  ;;  %v3540_v9 = vld [vmem:[%s4500_s3] sm:$0xff] }
 0xc08   : > { %v1428_v30 = vadd.f32 %v1426_v39, %v415_v14 }
 0xc09   : > { %v1427_v37 = vadd.f32 %v1425_v44, %v414_v21 }
 0xc0a   : > { %v1430_v31 = vmin.f32 %v1428_v30, 20.0 }
 0xc0b   : > { %v1429_v43 = vmin.f32 %v1427_v37, 20.0 }
 0xc0c   : > { %v1433_v47 = vmul.f32 1.442695, %v1430_v31 }
 0xc0d   : > { %v1431_v20 = vmul.f32 1.442695, %v1429_v43 }
 0xc0e   : > { %3442 = vpow2.f32 %v1433_v47  ;;  %v3058_v47 = vld [vmem:[%s4506_s9 + $0xa0] sm:$0xff] }
 0xc0f   : > { %3444 = vpow2.f32 %v1431_v20 }
 0xc18   : > { %v3443_v48 = vpop.eup %3442 }
 0xc19   : > { %v3445_v49 = vpop.eup %3444  ;;  %v1436_v51 = vadd.f32 1.0, %v3443_v48 }
 0xc1a   : > { %v1435_v52 = vadd.f32 1.0, %v3445_v49 }
 0xc1b   : > { %v1438_v10 = vmul.f32 %v1436_v51, %v1436_v51 }
 0xc1c   : > { %v1437_v61 = vmul.f32 %v1435_v52, %v1435_v52 }
 0xc1d   : > { %v1444_v5 = vadd.f32 1.0, %v1438_v10  ;;  %v3053_v6 = vadd.f32 -1.0, %v1438_v10  ;;  %v1930_v10 = vpop.permute.xlu0 %1929 }
 0xc1e   : > { %v1443_v18 = vadd.f32 1.0, %v1437_v61  ;;  %v3052_v19 = vadd.f32 -1.0, %v1437_v61 }
 0xc1f   : > { %3446 = vrcp.f32 %v1444_v5  ;;  %v1442_v23 = vmul.f32 %v3053_v6, %v1428_v30 }
 0xc20   : > { %3448 = vrcp.f32 %v1443_v18  ;;  %v1441_v63 = vmul.f32 %v3052_v19, %v1427_v37 }
 0xc29   : > { %v3447_v7 = vpop.eup %3446 }
 0xc2a   : > { %v3449_v17 = vpop.eup %3448  ;;  %v1448_v35 = vmul.f32 %v3447_v7, %v1442_v23 }
 0xc2b   : > { %v1446_v60 = vmul.f32 %v3449_v17, %v1441_v63 }
 0xc2d   : > { %v3324_v62 = vpack.c.bf16 %v1448_v35, %v1446_v60 }
 0xc2f   : > { %3325 = vmatprep.subr.bf16.mxu0 %v3324_v62 }
 0xc30   : > { %3327 = vmatpush3.bf16.msra.mxu0 %v3324_v62 }
 0xc31   : > { %3244 = vmatprep.subr.mxu0 %v3556_v0 }
 0xc33   : > { %3234 = vmatmul.mubr.msk.f32.vlgmr.msra.gmra.mrb[14].mxu0 %vm1453_vm12, %v1450_v13 }
 0xc34   : > { %3236 = vmatprep.mubr.msk.f32.mxu0 %vm1453_vm12, %v1451_v36 }
 0xc37   : > { %3237 = vmatmul.mubr.msk.f32.gmra.mrb[16].mxu0 %vm1453_vm12, %v1452_v16 }
 0xc38   : > { %3246 = vmatprep.mubr.msk.f32.mxu0 %vm3557_vm1, %v3556_v0 }
 0xc7f   : > { %v1846_v38 = vpop.xlane.xlu1 %1845 }
 0xc80   : > { %v1847_v14 = vmul.f32 0.00390625, %v1846_v38 }
 0xc82   : > { %3245 = vmatpush3.msra.mxu0 %v1847_v14 }
 0xc83   : > { %3247 = vmatmul.mubr.msk.f32.vlgmr.msra.gmra.mrb[18].mxu0 %vm421_vm0, %v3540_v9 }
 0xc84   : > { %3257 = vmatprep.mubr.msk.f32.mxu0 %vm953_vm11, %v3865_v41 }
 0xd06   : > { %v4100_v39 = vpop.f32.mrb[14].mxu0 }
 0xd07   : > { %v4102_v21 = vpop.f32.mrb[15].mxu0 }
 0xd0a   : > { %v4104_v44 = vpop.f32.mrb[16].mxu0 }
 0xd0b   : > { %v4106_v30 = vpop.f32.mrb[17].mxu0 }
 0xd56   : > { %v1914_v37 = vpop.f32.mrb[18].mxu0 }
 0xd57   : > { %v1915_v31 = vadd.f32 0.001, %v1914_v37  ;;  %v3248_v43 = vpop.f32.mrb[19].mxu0 }
 0xd59   : > { %3450 = vrsqrt.f32 %v1915_v31 }
 0xd63   : > { %v3451_v20 = vpop.eup %3450 }
 0xd64   : > { %v1919_v48 = vmul.f32 %v3451_v20, %v3058_v47 }
 0xd66   : > { %1922 = vperm.xlu1 %3389, %v1919_v48  }
 0xde5   : > { %v1923_v49 = vpop.permute.xlu1 %1922 }
 0xde6   : > { %v1925_v51 = vmul.f32 %v1923_v49, %v4052_v12  ;;  %v1926_v52 = vmul.f32 %v1923_v49, %v4055_v24 }
 0xde8   : > { %v1932_v61 = vadd.f32 %v1930_v10, %v1925_v51  ;;  %v1933_v5 = vadd.f32 %v1930_v10, %v1926_v52 }
 0xdea   : > { %v1934_v18 = vmin.f32 %v1932_v61, 20.0  ;;  %v1935_v6 = vmin.f32 %v1933_v5, 20.0 }
 0xdec   : > { %v1936_v19 = vmul.f32 1.442695, %v1934_v18  ;;  %v1938_v23 = vmul.f32 1.442695, %v1935_v6 }
 0xdee   : > { %3452 = vpow2.f32 %v1936_v19 }
 0xdef   : > { %3454 = vpow2.f32 %v1938_v23 }
 0xdf8   : > { %v3453_v63 = vpop.eup %3452 }
 0xdf9   : > { %v3455_v7 = vpop.eup %3454  ;;  %v1940_v17 = vadd.f32 1.0, %v3453_v63 }
 0xdfa   : > { %v1941_v35 = vadd.f32 1.0, %v3455_v7 }
 0xdfb   : > { %v1942_v60 = vmul.f32 %v1940_v17, %v1940_v17 }
 0xdfc   : > { %v1943_v62 = vmul.f32 %v1941_v35, %v1941_v35 }
 0xdfd   : > { %v1948_v13 = vadd.f32 1.0, %v1942_v60  ;;  %v3082_v12 = vadd.f32 -1.0, %v1942_v60 }
 0xdfe   : > { %v1949_v36 = vadd.f32 1.0, %v1943_v62  ;;  %v3083_v24 = vadd.f32 -1.0, %v1943_v62 }
 0xdff   : > { %3456 = vrcp.f32 %v1948_v13  ;;  %v1946_v16 = vmul.f32 %v3082_v12, %v1932_v61 }
 0xe00   : > { %3458 = vrcp.f32 %v1949_v36  ;;  %v1947_v14 = vmul.f32 %v3083_v24, %v1933_v5 }
 0xe09   : > { %v3457_v38 = vpop.eup %3456 }
 0xe0a   : > { %v3459_v9 = vpop.eup %3458  ;;  %v4113_v37 = vmul.f32 %v3457_v38, %v1946_v16 }
 0xe0b   : > { %v1953_v31 = vmul.f32 %v3459_v9, %v1947_v14 }
 0xe0c   : > { %1954 = vrot.lane.b32.xlu0 %v4113_v37, %s3560_s13 }
 0xe0d   : > { %1956 = vrot.lane.b32.xlu1 %v1953_v31, %s3560_s13  ;;  %s4514_s13 = smov 112  }
 0xe10   : > { %1962 = vrot.lane.b32.xlu0 %v4113_v37, %s3563_s16 }
 0xe11   : > { %1964 = vrot.lane.b32.xlu1 %v1953_v31, %s3563_s16  ;;  %s4515_s16 = smov 111  }
 0xe14   : > { %1970 = vrot.lane.b32.xlu0 %v4113_v37, %s3566_s23 }
 0xe15   : > { %1972 = vrot.lane.b32.xlu1 %v1953_v31, %s3566_s23 }
 0xe18   : > { %1978 = vrot.lane.b32.xlu0 %v4113_v37, %s3559_s12 }
 0xe19   : > { %1980 = vrot.lane.b32.xlu1 %v1953_v31, %s3559_s12 }
 0xe1c   : > { %1986 = vrot.lane.b32.xlu0 %v4113_v37, %s3561_s14 }
 0xe1d   : > { %1988 = vrot.lane.b32.xlu1 %v1953_v31, %s3561_s14 }
 0xe20   : > { %1994 = vrot.lane.b32.xlu0 %v4113_v37, %s3562_s15 }
 0xe21   : > { %1996 = vrot.lane.b32.xlu1 %v1953_v31, %s3562_s15 }
 0xe24   : > { %2002 = vrot.lane.b32.xlu0 %v4113_v37, %s4514_s13 }
 0xe25   : > { %2004 = vrot.lane.b32.xlu1 %v1953_v31, %s4514_s13  ;;  %s4516_s13 = sshll.u32 %s4518_s18, 5 }
 0xe26   : > { %s386_s14 = scalar_lea.vmem %s4508_s11, %s4516_s13 }
 0xe28   : > { %2010 = vrot.lane.b32.xlu0 %v4113_v37, %s4515_s16 }
 0xe29   : > { %2012 = vrot.lane.b32.xlu1 %v1953_v31, %s4515_s16 }
 0xe7e   : > { %v1955_v43 = vpop.permute.xlu0 %1954 }
 0xe7f   : > { %v1957_v47 = vpop.permute.xlu1 %1956 }
 0xe80   : > { %v1958_v20 = vsel %vm699_vm2, %v1955_v43, %v1957_v47  ;;  %v1959_v48 = vsel %vm699_vm2, %v1957_v47, %v1955_v43 }
 0xe81   : > { %v1960_v61 = vmul.f32 %v1959_v48, %v3729_v1  ;;  %v1961_v5 = vmul.f32 %v1958_v20, %v3732_v2 }
 0xe82   : > { %v1963_v49 = vpop.permute.xlu0 %1962 }
 0xe83   : > { %v1965_v51 = vpop.permute.xlu1 %1964 }
 0xe84   : > { %v1966_v52 = vsel %vm716_vm3, %v1963_v49, %v1965_v51  ;;  %v1967_v10 = vsel %vm716_vm3, %v1965_v51, %v1963_v49 }
 0xe85   : > { %v1968_v18 = vmul.f32 %v1967_v10, %v3736_v3  ;;  %v1969_v6 = vmul.f32 %v1966_v52, %v3739_v4 }
 0xe86   : > { %v1971_v19 = vpop.permute.xlu0 %1970 }
 0xe87   : > { %v3330_v23 = vpack.c.bf16 %v1968_v18, %v1960_v61  ;;  %v1973_v63 = vpop.permute.xlu1 %1972  ;;  %v3328_v7 = vpack.c.bf16 %v1969_v6, %v1961_v5 }
 0xe88   : > { %v1974_v17 = vsel %vm733_vm4, %v1971_v19, %v1973_v63  ;;  %v1975_v35 = vsel %vm733_vm4, %v1973_v63, %v1971_v19 }
 0xe89   : > { %3329 = vmatprep.subr.bf16.mxu1 %v3328_v7  ;;  %v1976_v4 = vmul.f32 %v1975_v35, %v3757_v22  ;;  %v1977_v62 = vmul.f32 %v1974_v17, %v3761_v25 }
 0xe8a   : > { %3331 = vmatpush1.bf16.msra.mxu1 %v3330_v23  ;;  %v1979_v60 = vpop.permute.xlu0 %1978 }
 0xe8b   : > { %v1981_v1 = vpop.permute.xlu1 %1980 }
 0xe8c   : > { %v1982_v2 = vsel %vm750_vm5, %v1979_v60, %v1981_v1  ;;  %v1983_v3 = vsel %vm750_vm5, %v1981_v1, %v1979_v60 }
 0xe8d   : > { %v1984_v13 = vmul.f32 %v1983_v3, %v3765_v26  ;;  %v1985_v36 = vmul.f32 %v1982_v2, %v3768_v27 }
 0xe8e   : > { %v1987_v12 = vpop.permute.xlu0 %1986 }
 0xe8f   : > { %v3334_v24 = vpack.c.bf16 %v1984_v13, %v1976_v4  ;;  %v1989_v16 = vpop.permute.xlu1 %1988  ;;  %v3332_v38 = vpack.c.bf16 %v1985_v36, %v1977_v62 }
 0xe90   : > { %v1990_v14 = vsel %vm767_vm6, %v1987_v12, %v1989_v16  ;;  %v1991_v9 = vsel %vm767_vm6, %v1989_v16, %v1987_v12 }
 0xe91   : > { %v1992_v43 = vmul.f32 %v1990_v14, %v3780_v33  ;;  %v1993_v22 = vmul.f32 %v1991_v9, %v3783_v34  ;;  %3333 = vmatprep.subr.bf16.mxu1 %v3332_v38 }
 0xe92   : > { %3335 = vmatpush1.bf16.msra.mxu1 %v3334_v24  ;;  %v1995_v25 = vpop.permute.xlu0 %1994 }
 0xe93   : > { %v3338_v26 = vpack.c.bf16 %v1992_v43, %v4113_v37  ;;  %v1997_v27 = vpop.permute.xlu1 %1996  ;;  %v3336_v47 = vpack.c.bf16 %v1993_v22, %v1953_v31 }
 0xe94   : > { %v1998_v20 = vsel %vm784_vm7, %v1995_v25, %v1997_v27  ;;  %v1999_v48 = vsel %vm784_vm7, %v1997_v27, %v1995_v25 }
 0xe95   : > { %3337 = vmatprep.subr.bf16.mxu1 %v3336_v47  ;;  %v2000_v37 = vmul.f32 %v1998_v20, %v3801_v54  ;;  %v2001_v31 = vmul.f32 %v1999_v48, %v3804_v58  ;;  %v3084_v58 = vld [vmem:[%s4501_s4 + $0x20] sm:$0xff] }
 0xe96   : > { %3339 = vmatpush1.bf16.msra.mxu1 %v3338_v26  ;;  %v2003_v49 = vpop.permute.xlu0 %2002 }
 0xe97   : > { %v2005_v51 = vpop.permute.xlu1 %2004 }
 0xe98   : > { %v2006_v33 = vsel %vm801_vm8, %v2003_v49, %v2005_v51  ;;  %v2007_v34 = vsel %vm801_vm8, %v2005_v51, %v2003_v49 }
 0xe99   : > { %v2008_v52 = vmul.f32 %v2006_v33, %v3808_v56  ;;  %v2009_v10 = vmul.f32 %v2007_v34, %v3811_v50  ;;  %v3086_v56 = vld [vmem:[%s4501_s4 + $0x30] sm:$0xff]  ;;  %v3087_v50 = vld [vmem:[%s4501_s4 + $0x38] sm:$0xff] }
 0xe9a   : > { %v2011_v61 = vpop.permute.xlu0 %2010 }
 0xe9b   : > { %v3342_v5 = vpack.c.bf16 %v2008_v52, %v2000_v37  ;;  %v2013_v18 = vpop.permute.xlu1 %2012  ;;  %v3340_v6 = vpack.c.bf16 %v2009_v10, %v2001_v31 }
 0xe9c   : > { %v2015_v19 = vsel %vm818_vm9, %v2013_v18, %v2011_v61  ;;  %v2014_v23 = vsel %vm818_vm9, %v2011_v61, %v2013_v18 }
 0xe9d   : > { %v2017_v63 = vmul.f32 %v3829_v8, %v2015_v19  ;;  %3341 = vmatprep.subr.bf16.mxu1 %v3340_v6  ;;  %v2016_v54 = vmul.f32 %v3836_v15, %v2014_v23 }
 0xe9e   : > { %3343 = vmatpush1.bf16.msra.mxu1 %v3342_v5 }
 0xe9f   : > { %2051 = vmatprep.subr.mxu1 %v2017_v63 }
 0xea2   : > { %2052 = vmatpush1.msra.mxu1 %v2016_v54 }
 0xea3   : > { %3088 = vmatmul.mubr.msk.f32.vlgmr.msra.gmra.mrb[14].mxu1 %vm835_vm10, %v3084_v58 }
 0xea4   : > { %2105 = vmatprep.mubr.f32.mxu1 %v3556_v0 }
 0xea7   : > { %3089 = vmatmul.mubr.msk.f32.gmra.mrb[16].mxu1 %vm835_vm10, %v3085_v57 }
 0xea8   : > { %2111 = vmatprep.mubr.f32.mxu1 %v3556_v0 }
 0xeab   : > { %3090 = vmatmul.mubr.msk.f32.gmra.mrb[18].mxu1 %vm835_vm10, %v3086_v56 }
 0xeac   : > { %2117 = vmatprep.mubr.f32.mxu1 %v3556_v0 }
 0xeaf   : > { %3091 = vmatmul.mubr.msk.f32.gmra.mrb[20].mxu1 %vm835_vm10, %v3087_v50  ;;  %v3064_v50 = vld [vmem:[%s4506_s9 + $0xd0] sm:$0xff] }
 0xeb0   : > { %2910 = vmatprep.mubr.f32.mxu1 %v3556_v0 }
 0xf76   : > { %v2101_v8 = vpop.f32.mrb[14].mxu1 }
 0xf77   : > { %v2103_v15 = vpop.f32.mrb[15].mxu1 }
 0xf78   : > { %v2124_v7 = vadd.f32 %v2103_v15, %v2101_v8 }
 0xf7a   : > { %2125 = vadd.xlane.f32.xlu0 %v2124_v7  ;;  %v2107_v17 = vpop.f32.mrb[16].mxu1 }
 0xf7b   : > { %v2109_v35 = vpop.f32.mrb[17].mxu1 }
 0xf7c   : > { %v2127_v60 = vadd.f32 %v2109_v35, %v2107_v17 }
 0xf7e   : > { %2128 = vadd.xlane.f32.xlu1 %v2127_v60  ;;  %v2113_v1 = vpop.f32.mrb[18].mxu1 }
 0xf7f   : > { %v2115_v2 = vpop.f32.mrb[19].mxu1 }
 0xf80   : > { %v2130_v3 = vadd.f32 %v2115_v2, %v2113_v1 }
 0xf82   : > { %2131 = vadd.xlane.f32.xlu0 %v2130_v3  ;;  %v2119_v4 = vpop.f32.mrb[20].mxu1 }
 0xf83   : > { %v2121_v62 = vpop.f32.mrb[21].mxu1 }
 0xf84   : > { %v2133_v13 = vadd.f32 %v2121_v62, %v2119_v4 }
 0xf86   : > { %2134 = vadd.xlane.f32.xlu0 %v2133_v13  ;;  %v3541_v13 = vld [vmem:[%s4502_s5 + $0x8] sm:$0xff] }
0x1007   : > { %v2126_v36 = vpop.xlane.xlu0 %2125 }
0x1008   : > { %v2136_v24 = vmul.f32 0.00390625, %v2126_v36  ;;  %v3542_v36 = vld [vmem:[%s4502_s5 + $0x10] sm:$0xff] }
0x100b   : > { %v2129_v12 = vpop.xlane.xlu1 %2128 }
0x100c   : > { %v2137_v16 = vmul.f32 0.00390625, %v2129_v12  ;;  %v3543_v12 = vld [vmem:[%s4502_s5 + $0x18] sm:$0xff] }
0x100e   : > { %v3344_v38 = vpack.c.bf16 %v2137_v16, %v2136_v24  ;;  %v416_v24 = vld [vmem:[%s4506_s9 + $0x80] sm:$0xff]  ;;  %v417_v16 = vld [vmem:[%s4506_s9 + $0x88] sm:$0xff] }
0x100f   : > { %v2132_v14 = vpop.xlane.xlu0 %2131 }
0x1010   : > { %3345 = vmatprep.subr.bf16.mxu0 %v3344_v38  ;;  %v2138_v43 = vmul.f32 0.00390625, %v2132_v14  ;;  %v1538_v14 = vadd.f32 %v4100_v39, %v417_v16 }
0x1011   : > { %3347 = vmatpush3.bf16.msra.mxu0 %v3344_v38  ;;  %v1533_v38 = vadd.f32 %v4102_v21, %v416_v24 }
0x1013   : > { %v2135_v9 = vpop.xlane.xlu0 %2134 }
0x1014   : > { %v2139_v22 = vmul.f32 0.00390625, %v2135_v9  ;;  %v1552_v9 = vsel %vm1551_vm13, %v1533_v38, -inf }
0x1016   : > { %v3348_v25 = vpack.c.bf16 %v2139_v22, %v2138_v43  ;;  %v418_v43 = vld [vmem:[%s4506_s9 + $0x90] sm:$0xff]  ;;  %v1580_v22 = vsel %vm1551_vm13, %v1538_v14, -inf }
0x1018   : > { %3349 = vmatprep.subr.bf16.mxu0 %v3348_v25 }
0x1019   : > { %3351 = vmatpush3.bf16.msra.mxu0 %v3348_v25  ;;  %v1553_v25 = vrot.slane %v1552_v9, 4 }
0x101b   : > { %v1554_v21 = vmax.f32 %v1552_v9, %v1553_v25 }
0x101c   : > { %3258 = vmatmul.mubr.msk.f32.vlgmr.msra.gmra.mrb[20].mxu0 %vm953_vm11, %v3872_v55 }
0x101d   : > { %3260 = vmatprep.mubr.msk.f32.mxu0 %vm953_vm11, %v3877_v59 }
0x1020   : > { %3261 = vmatmul.mubr.msk.f32.gmra.mrb[22].mxu0 %vm953_vm11, %v3886_v53 }
0x1021   : > { %3271 = vmatprep.mubr.msk.f32.mxu0 %vm953_vm11, %v3865_v41 }
0x10ef   : > { %v3259_v26 = vpop.f32.mrb[20].mxu0 }
0x10f0   : > { %2232 = vperm.xlu0 %3388, %v3259_v26   ;;  %v2206_v27 = vpop.f32.mrb[21].mxu0  ;;  %v1543_v26 = vadd.f32 %v4106_v30, %v418_v43 }
0x10f1   : > { %2227 = vperm.xlu1 %3389, %v2206_v27   ;;  %v419_v27 = vld [vmem:[%s4506_s9 + $0x98] sm:$0xff] }
0x10f2   : > { %v1608_v39 = vsel %vm1551_vm13, %v1543_v26, -inf }
0x10f3   : > { %v3262_v47 = vpop.f32.mrb[22].mxu0 }
0x10f4   : > { %v2216_v20 = vpop.f32.mrb[23].mxu0 }
0x10f5   : > { %2237 = vperm.xlu1 %3389, %v2216_v20   ;;  %v1548_v20 = vadd.f32 %v4104_v44, %v419_v27 }
0x10f9   : > { %2242 = vperm.xlu1 %3389, %v3262_v47   ;;  %v1581_v47 = vrot.slane %v1580_v22, 4 }
0x116f   : > { %v2233_v48 = vpop.permute.xlu0 %2232 }
0x1170   : > { %v4216_v49 = vsub.f32 %v2107_v17, %v2233_v48  ;;  %v4218_v55 = vsub.f32 %v2109_v35, %v2233_v48  ;;  %v2228_v59 = vpop.permute.xlu1 %2227  ;;  %v1582_v48 = vmax.f32 %v1580_v22, %v1581_v47 }
0x1171   : > { %v4220_v51 = vsub.f32 %v2101_v8, %v2228_v59  ;;  %v4222_v53 = vsub.f32 %v2103_v15, %v2228_v59  ;;  %v3065_v8 = vld [vmem:[%s4506_s9 + $0xd8] sm:$0xff]  ;;  %v1555_v59 = vrot.slane %v1554_v21, 2 }
0x1172   : > { %v2255_v41 = vmul.f32 %v4216_v49, %v4216_v49  ;;  %v2256_v33 = vmul.f32 %v4218_v55, %v4218_v55 }
0x1173   : > { %v2253_v34 = vmul.f32 %v4220_v51, %v4220_v51  ;;  %v2254_v37 = vmul.f32 %v4222_v53, %v4222_v53 }
0x1174   : > { %v2238_v31 = vpop.permute.xlu1 %2237  ;;  %v2264_v52 = vadd.f32 %v2256_v33, %v2255_v41  ;;  %v1609_v41 = vrot.slane %v1608_v39, 4  ;;  %v1636_v33 = vsel %vm1551_vm13, %v1548_v20, -inf }
0x1175   : > { %v4232_v10 = vsub.f32 %v2113_v1, %v2238_v31  ;;  %v4234_v61 = vsub.f32 %v2115_v2, %v2238_v31  ;;  %v2261_v5 = vadd.f32 %v2254_v37, %v2253_v34  ;;  %v1583_v34 = vrot.slane %v1582_v48, 2 }
0x1176   : > { %2265 = vadd.xlane.f32.xlu1 %v2264_v52  ;;  %v1556_v37 = vmax.f32 %v1554_v21, %v1555_v59  ;;  %v1637_v31 = vrot.slane %v1636_v33, 4  ;;  %v1610_v52 = vmax.f32 %v1608_v39, %v1609_v41 }
0x1177   : > { %2262 = vadd.xlane.f32.xlu0 %v2261_v5  ;;  %v2257_v18 = vmul.f32 %v4232_v10, %v4232_v10  ;;  %v2258_v6 = vmul.f32 %v4234_v61, %v4234_v61  ;;  %v1584_v30 = vmax.f32 %v1582_v48, %v1583_v34 }
0x1178   : > { %v2243_v19 = vpop.permute.xlu1 %2242  ;;  %v1557_v5 = vrot.slane %v1556_v37, 1 }
0x1179   : > { %v4240_v23 = vsub.f32 %v2119_v4, %v2243_v19  ;;  %v4242_v63 = vsub.f32 %v2121_v62, %v2243_v19  ;;  %v2267_v54 = vadd.f32 %v2258_v6, %v2257_v18  ;;  %v1638_v18 = vmax.f32 %v1636_v33, %v1637_v31 }
0x117a   : > { %v1611_v6 = vrot.slane %v1610_v52, 2  ;;  %v1585_v19 = vrot.slane %v1584_v30, 1 }
0x117b   : > { %2268 = vadd.xlane.f32.xlu0 %v2267_v54  ;;  %v2259_v58 = vmul.f32 %v4240_v23, %v4240_v23  ;;  %v2260_v57 = vmul.f32 %v4242_v63, %v4242_v63  ;;  %v1558_v54 = vmax.f32 %v1556_v37, %v1557_v5 }
0x117c   : > { %v1586_v44 = vmax.f32 %v1584_v30, %v1585_v19 }
0x117d   : > { %v2270_v56 = vadd.f32 %v2260_v57, %v2259_v58  ;;  %v1639_v58 = vrot.slane %v1638_v18, 2  ;;  %v1612_v57 = vmax.f32 %v1610_v52, %v1611_v6 }
0x117f   : > { %2271 = vadd.xlane.f32.xlu0 %v2270_v56  ;;  %v1559_v56 = vsub.f32 %v1533_v38, %v1558_v54  ;;  %v3061_v54 = vld [vmem:[%s4506_s9 + $0xb8] sm:$0xff] }
0x1187   : > { %2400 = vperm.xlu1 %3389, %v3064_v50   ;;  %v1640_v50 = vmax.f32 %v1638_v18, %v1639_v58  ;;  %v3060_v58 = vld [vmem:[%s4506_s9 + $0xb0] sm:$0xff] }
0x1195   : > { %2405 = vperm.xlu0 %3388, %v3065_v8   ;;  %v1613_v8 = vrot.slane %v1612_v57, 1 }
0x1203   : > { %v2266_v15 = vpop.xlane.xlu1 %2265 }
0x1204   : > { %v2274_v7 = vmul.f32 0.00390625, %v2266_v15  ;;  %v2263_v17 = vpop.xlane.xlu0 %2262  ;;  %v1587_v15 = vsub.f32 %v1538_v14, %v1586_v44 }
0x1205   : > { %v2273_v35 = vmul.f32 0.00390625, %v2263_v17  ;;  %v1641_v17 = vrot.slane %v1640_v50, 1 }
0x1207   : > { %v3352_v60 = vpack.c.bf16 %v2274_v7, %v2273_v35  ;;  %v1560_v7 = vmul.f32 1.442695, %v1559_v56  ;;  %v1614_v35 = vmax.f32 %v1612_v57, %v1613_v8 }
0x1208   : > { %v2269_v1 = vpop.xlane.xlu0 %2268 }
0x1209   : > { %3353 = vmatprep.subr.bf16.mxu0 %v3352_v60  ;;  %v2275_v3 = vmul.f32 0.00390625, %v2269_v1  ;;  %3460 = vpow2.f32 %v1560_v7  ;;  %v1642_v1 = vmax.f32 %v1640_v50, %v1641_v17 }
0x120a   : > { %3355 = vmatpush3.bf16.msra.mxu0 %v3352_v60  ;;  %v1588_v60 = vmul.f32 1.442695, %v1587_v15 }
0x120c   : > { %v2272_v2 = vpop.xlane.xlu0 %2271  ;;  %3462 = vpow2.f32 %v1588_v60 }
0x120d   : > { %v2276_v4 = vmul.f32 0.00390625, %v2272_v2  ;;  %v1615_v2 = vsub.f32 %v1543_v26, %v1614_v35  ;;  %v3063_v35 = vld [vmem:[%s4506_s9 + $0xc8] sm:$0xff] }
0x120f   : > { %v3356_v62 = vpack.c.bf16 %v2276_v4, %v2275_v3  ;;  %v1643_v3 = vsub.f32 %v1548_v20, %v1642_v1  ;;  %v1616_v4 = vmul.f32 1.442695, %v1615_v2  ;;  %v3066_v1 = vld [vmem:[%s4506_s9 + $0xe0] sm:$0xff] }
0x1211   : > { %3357 = vmatprep.subr.bf16.mxu0 %v3356_v62  ;;  %3464 = vpow2.f32 %v1616_v4 }
0x1212   : > { %3359 = vmatpush3.bf16.msra.mxu0 %v3356_v62  ;;  %v1644_v62 = vmul.f32 1.442695, %v1643_v3 }
0x1214   : > { %3466 = vpow2.f32 %v1644_v62 }
0x1215   : > { %3272 = vmatmul.mubr.msk.f32.vlgmr.msra.gmra.mrb[24].mxu0 %vm953_vm11, %v3541_v13  ;;  %v4286_v13 = vpop.eup %3460 }
0x1216   : > { %3274 = vmatprep.mubr.msk.f32.mxu0 %vm953_vm11, %v3542_v36  ;;  %v4288_v36 = vpop.eup %3462 }
0x1217   : > { %v1590_v24 = vsel %vm1551_vm13, %v4288_v36, 0.0 }
0x1218   : > { %v1591_v14 = vrot.slane %v1590_v24, 4 }
0x1219   : > { %3275 = vmatmul.mubr.msk.f32.gmra.mrb[26].mxu0 %vm953_vm11, %v3543_v12  ;;  %v1562_v12 = vsel %vm1551_vm13, %v4286_v13, 0.0 }
0x121a   : > { %v1563_v16 = vrot.slane %v1562_v12, 4  ;;  %v1592_v26 = vadd.f32 %v1591_v14, %v1590_v24  ;;  %v3062_v24 = vld [vmem:[%s4506_s9 + $0xc0] sm:$0xff] }
0x121b   : > { %v4294_v38 = vpop.eup %3464 }
0x121c   : > { %v1564_v9 = vadd.f32 %v1563_v16, %v1562_v12  ;;  %v1618_v43 = vsel %vm1551_vm13, %v4294_v38, 0.0  ;;  %v1593_v41 = vrot.slane %v1592_v26, 2 }
0x121d   : > { %v1619_v20 = vrot.slane %v1618_v43, 4 }
0x121e   : > { %v4298_v22 = vpop.eup %3466  ;;  %v1565_v21 = vrot.slane %v1564_v9, 2  ;;  %v1594_v5 = vadd.f32 %v1593_v41, %v1592_v26  ;;  %v2406_v41 = vpop.permute.xlu0 %2405 }
0x121f   : > { %v1646_v48 = vsel %vm1551_vm13, %v4298_v22, 0.0  ;;  %v1620_v31 = vadd.f32 %v1619_v20, %v1618_v43  ;;  %v3067_v43 = vld [vmem:[%s4506_s9 + $0xe8] sm:$0xff] }
0x1220   : > { %v1647_v37 = vrot.slane %v1646_v48, 4  ;;  %v1566_v30 = vadd.f32 %v1565_v21, %v1564_v9  ;;  %v1595_v44 = vrot.slane %v1594_v5, 1 }
0x1221   : > { %v1621_v6 = vrot.slane %v1620_v31, 2 }
0x1222   : > { %v1648_v18 = vadd.f32 %v1647_v37, %v1646_v48  ;;  %v1567_v19 = vrot.slane %v1566_v30, 1  ;;  %v1596_v2 = vadd.f32 %v1595_v44, %v1594_v5 }
0x1223   : > { %v1622_v7 = vadd.f32 %v1621_v6, %v1620_v31 }
0x1224   : > { %v1649_v50 = vrot.slane %v1648_v18, 2  ;;  %v1568_v15 = vadd.f32 %v1567_v19, %v1566_v30 }
0x1225   : > { %v1623_v4 = vrot.slane %v1622_v7, 1 }
0x1226   : > { %v1650_v62 = vadd.f32 %v1649_v50, %v1648_v18 }
0x1227   : > { %v1624_v16 = vadd.f32 %v1623_v4, %v1622_v7 }
0x1228   : > { %v1651_v14 = vrot.slane %v1650_v62, 1 }
0x12e8   : > { %v3273_v25 = vpop.f32.mrb[24].mxu0 }
0x12e9   : > { %v2349_v27 = vadd.f32 0.001, %v3273_v25  ;;  %v2343_v47 = vpop.f32.mrb[25].mxu0  ;;  %v1652_v25 = vadd.f32 %v1651_v14, %v1650_v62 }
0x12ea   : > { %v2344_v39 = vadd.f32 0.001, %v2343_v47 }
0x12eb   : > { %3468 = vrsqrt.f32 %v2349_v27 }
0x12ec   : > { %3470 = vrsqrt.f32 %v2344_v39  ;;  %v3276_v59 = vpop.f32.mrb[26].mxu0 }
0x12ed   : > { %v2359_v33 = vadd.f32 0.001, %v3276_v59  ;;  %v2353_v34 = vpop.f32.mrb[27].mxu0 }
0x12ee   : > { %v2354_v52 = vadd.f32 0.001, %v2353_v34 }
0x12ef   : > { %3472 = vrsqrt.f32 %v2359_v33  ;;  %v2401_v33 = vpop.permute.xlu1 %2400 }
0x12f0   : > { %3474 = vrsqrt.f32 %v2354_v52 }
0x12f1   : > { %3476 = vrcp.f32 %v1568_v15 }
0x12f2   : > { %3478 = vrcp.f32 %v1596_v2 }
0x12f3   : > { %3480 = vrcp.f32 %v1624_v16 }
0x12f4   : > { %3482 = vrcp.f32 %v1652_v25 }
0x12f5   : > { %v3469_v57 = vpop.eup %3468 }
0x12f6   : > { %v3471_v56 = vpop.eup %3470  ;;  %v2367_v8 = vmul.f32 %v3469_v57, %v3061_v54 }
0x12f7   : > { %v2366_v17 = vmul.f32 %v3471_v56, %v3060_v58 }
0x12f8   : > { %2377 = vperm.xlu0 %3388, %v2367_v8  }
0x12f9   : > { %v3473_v60 = vpop.eup %3472  ;;  %2372 = vperm.xlu1 %3389, %v2366_v17  }
0x12fa   : > { %v2369_v3 = vmul.f32 %v3473_v60, %v3063_v35  ;;  %v3475_v12 = vpop.eup %3474 }
0x12fb   : > { %v2368_v9 = vmul.f32 %v3475_v12, %v3062_v24  ;;  %v3477_v26 = vpop.eup %3476 }
0x12fc   : > { %2410 = vperm.xlu0 %3388, %v3066_v1   ;;  %v1570_v27 = vmul.f32 %v3477_v26, %v4286_v13  ;;  %v3479_v47 = vpop.eup %3478 }
0x12fd   : > { %2387 = vperm.xlu1 %3389, %v2369_v3   ;;  %v1598_v21 = vmul.f32 %v3479_v47, %v4288_v36  ;;  %v3481_v20 = vpop.eup %3480 }
0x12fe   : > { %v1626_v39 = vmul.f32 %v3481_v20, %v4294_v38  ;;  %v3483_v48 = vpop.eup %3482 }
0x12ff   : > { %v1654_v59 = vmul.f32 %v3483_v48, %v4298_v22 }
0x1301   : > { %2382 = vperm.xlu1 %3389, %v2368_v9  }
0x1305   : > { %2415 = vperm.xlu1 %3389, %v3067_v43  }
0x1309   : > { %1573 = vperm.xlu1 %3389, %v1570_v27  }
0x130d   : > { %1601 = vperm.xlu1 %3389, %v1598_v21  }
0x1311   : > { %1629 = vperm.xlu1 %3389, %v1626_v39  }
0x1315   : > { %1657 = vperm.xlu1 %3389, %v1654_v59  }
0x1377   : > { %v2378_v34 = vpop.permute.xlu0 %2377 }
0x1378   : > { %v2392_v37 = vmul.f32 %v2378_v34, %v4216_v49  ;;  %v2393_v13 = vmul.f32 %v2378_v34, %v4218_v55  ;;  %v2373_v31 = vpop.permute.xlu1 %2372 }
0x1379   : > { %v2390_v52 = vmul.f32 %v2373_v31, %v4220_v51  ;;  %v2391_v36 = vmul.f32 %v2373_v31, %v4222_v53 }
0x137a   : > { %v4328_v30 = vadd.f32 %v2406_v41, %v2392_v37  ;;  %v4330_v38 = vadd.f32 %v2406_v41, %v2393_v13 }
0x137b   : > { %v4332_v5 = vadd.f32 %v2401_v33, %v2390_v52  ;;  %v4334_v22 = vadd.f32 %v2401_v33, %v2391_v36  ;;  %v2411_v50 = vpop.permute.xlu0 %2410 }
0x137c   : > { %v2428_v18 = vmin.f32 %v4328_v30, 20.0  ;;  %v2429_v6 = vmin.f32 %v4330_v38, 20.0  ;;  %v2388_v49 = vpop.permute.xlu1 %2387 }
0x137d   : > { %v2426_v55 = vmin.f32 %v4332_v5, 20.0  ;;  %v2427_v19 = vmin.f32 %v4334_v22, 20.0  ;;  %v2396_v8 = vmul.f32 %v2388_v49, %v4240_v23  ;;  %v2397_v15 = vmul.f32 %v2388_v49, %v4242_v63 }
0x137e   : > { %v2438_v51 = vmul.f32 1.442695, %v2428_v18  ;;  %v2440_v54 = vmul.f32 1.442695, %v2429_v6 }
0x137f   : > { %v2434_v53 = vmul.f32 1.442695, %v2426_v55  ;;  %v2436_v58 = vmul.f32 1.442695, %v2427_v19 }
0x1380   : > { %3484 = vpow2.f32 %v2438_v51  ;;  %v2383_v57 = vpop.permute.xlu1 %2382 }
0x1381   : > { %3486 = vpow2.f32 %v2440_v54  ;;  %v2394_v44 = vmul.f32 %v2383_v57, %v4232_v10  ;;  %v2395_v56 = vmul.f32 %v2383_v57, %v4234_v61 }
0x1382   : > { %3488 = vpow2.f32 %v2434_v53 }
0x1383   : > { %3490 = vpow2.f32 %v2436_v58  ;;  %v4344_v7 = vadd.f32 %v2411_v50, %v2394_v44  ;;  %v4346_v17 = vadd.f32 %v2411_v50, %v2395_v56 }
0x1384   : > { %v2416_v35 = vpop.permute.xlu1 %2415 }
0x1385   : > { %v2430_v60 = vmin.f32 %v4344_v7, 20.0  ;;  %v2431_v1 = vmin.f32 %v4346_v17, 20.0  ;;  %v4350_v2 = vadd.f32 %v2416_v35, %v2396_v8  ;;  %v4352_v10 = vadd.f32 %v2416_v35, %v2397_v15 }
0x1387   : > { %v2442_v61 = vmul.f32 1.442695, %v2430_v60  ;;  %v2444_v3 = vmul.f32 1.442695, %v2431_v1  ;;  %v2432_v23 = vmin.f32 %v4350_v2, 20.0  ;;  %v2433_v4 = vmin.f32 %v4352_v10, 20.0 }
0x1389   : > { %3492 = vpow2.f32 %v2442_v61  ;;  %v2446_v63 = vmul.f32 1.442695, %v2432_v23  ;;  %v2448_v62 = vmul.f32 1.442695, %v2433_v4 }
0x138a   : > { %v3485_v12 = vpop.eup %3484  ;;  %3494 = vpow2.f32 %v2444_v3 }
0x138b   : > { %v3487_v24 = vpop.eup %3486  ;;  %v2452_v16 = vadd.f32 1.0, %v3485_v12  ;;  %3496 = vpow2.f32 %v2446_v63 }
0x138c   : > { %v3489_v14 = vpop.eup %3488  ;;  %v2453_v9 = vadd.f32 1.0, %v3487_v24  ;;  %3498 = vpow2.f32 %v2448_v62 }
0x138d   : > { %v3491_v43 = vpop.eup %3490  ;;  %v2460_v25 = vmul.f32 %v2452_v16, %v2452_v16  ;;  %v2450_v26 = vadd.f32 1.0, %v3489_v14 }
0x138e   : > { %v2461_v27 = vmul.f32 %v2453_v9, %v2453_v9  ;;  %v2451_v47 = vadd.f32 1.0, %v3491_v43 }
0x138f   : > { %v2484_v21 = vadd.f32 1.0, %v2460_v25  ;;  %v2458_v20 = vmul.f32 %v2450_v26, %v2450_v26  ;;  %v3102_v58 = vadd.f32 -1.0, %v2460_v25 }
0x1390   : > { %v2485_v39 = vadd.f32 1.0, %v2461_v27  ;;  %v2459_v48 = vmul.f32 %v2451_v47, %v2451_v47  ;;  %v3103_v50 = vadd.f32 -1.0, %v2461_v27 }
0x1391   : > { %v2482_v59 = vadd.f32 1.0, %v2458_v20  ;;  %3500 = vrcp.f32 %v2484_v21  ;;  %v3100_v57 = vadd.f32 -1.0, %v2458_v20  ;;  %v2476_v1 = vmul.f32 %v3102_v58, %v4328_v30 }
0x1392   : > { %v2483_v41 = vadd.f32 1.0, %v2459_v48  ;;  %3502 = vrcp.f32 %v2485_v39  ;;  %v3101_v8 = vadd.f32 -1.0, %v2459_v48  ;;  %v2477_v23 = vmul.f32 %v3103_v50, %v4330_v38 }
0x1393   : > { %v3493_v33 = vpop.eup %3492  ;;  %3504 = vrcp.f32 %v2482_v59  ;;  %v2474_v61 = vmul.f32 %v3100_v57, %v4332_v5  ;;  %v3072_v57 = vld [vmem:[%s4506_s9 + $0x110] sm:$0xff] }
0x1394   : > { %v3495_v34 = vpop.eup %3494  ;;  %v2454_v37 = vadd.f32 1.0, %v3493_v33  ;;  %3506 = vrcp.f32 %v2483_v41  ;;  %v2475_v4 = vmul.f32 %v3101_v8, %v4334_v22 }
0x1395   : > { %v3497_v13 = vpop.eup %3496  ;;  %v2455_v31 = vadd.f32 1.0, %v3495_v34  ;;  %v4395_v34 = vld [vmem:[%s4507_s10] sm:$0xff] }
0x1396   : > { %v3499_v52 = vpop.eup %3498  ;;  %v2462_v36 = vmul.f32 %v2454_v37, %v2454_v37  ;;  %v2456_v18 = vadd.f32 1.0, %v3497_v13 }
0x1397   : > { %v2463_v6 = vmul.f32 %v2455_v31, %v2455_v31  ;;  %v2457_v49 = vadd.f32 1.0, %v3499_v52  ;;  %v3109_v31 = vld [vmem:[%s4503_s6 + $0x18] sm:$0xff]  ;;  %v3114_v52 = vld [vmem:[%s4504_s7 + $0x20] sm:$0xff] }
0x1398   : > { %v2486_v55 = vadd.f32 1.0, %v2462_v36  ;;  %v2464_v19 = vmul.f32 %v2456_v18, %v2456_v18  ;;  %v3104_v3 = vadd.f32 -1.0, %v2462_v36  ;;  %v3069_v36 = vld [vmem:[%s4506_s9 + $0xf8] sm:$0xff]  ;;  %v3068_v18 = vld [vmem:[%s4506_s9 + $0xf0] sm:$0xff] }
0x1399   : > { %v2487_v51 = vadd.f32 1.0, %v2463_v6  ;;  %v2465_v54 = vmul.f32 %v2457_v49, %v2457_v49  ;;  %v3105_v63 = vadd.f32 -1.0, %v2463_v6  ;;  %v3071_v6 = vld [vmem:[%s4506_s9 + $0x108] sm:$0xff] }
0x139a   : > { %3508 = vrcp.f32 %v2486_v55  ;;  %v2488_v53 = vadd.f32 1.0, %v2464_v19  ;;  %v3106_v24 = vadd.f32 -1.0, %v2464_v19  ;;  %v2478_v30 = vmul.f32 %v3104_v3, %v4344_v7  ;;  %v3070_v19 = vld [vmem:[%s4506_s9 + $0x100] sm:$0xff] }
0x139b   : > { %3510 = vrcp.f32 %v2487_v51  ;;  %v2489_v44 = vadd.f32 1.0, %v2465_v54  ;;  %v3501_v56 = vpop.eup %3500  ;;  %v3107_v9 = vadd.f32 -1.0, %v2465_v54  ;;  %v2479_v5 = vmul.f32 %v3105_v63, %v4346_v17  ;;  %v3073_v54 = vld [vmem:[%s4506_s9 + $0x118] sm:$0xff] }
0x139c   : > { %3512 = vrcp.f32 %v2488_v53  ;;  %v3503_v15 = vpop.eup %3502  ;;  %v4360_v62 = vmul.f32 %v3501_v56, %v2476_v1  ;;  %v2480_v38 = vmul.f32 %v3106_v24, %v4350_v2 }
0x139d   : > { %3514 = vrcp.f32 %v2489_v44  ;;  %v3505_v35 = vpop.eup %3504  ;;  %v4364_v16 = vmul.f32 %v3503_v15, %v2477_v23  ;;  %v2481_v47 = vmul.f32 %v3107_v9, %v4352_v10  ;;  %v3108_v10 = vld [vmem:[%s4503_s6 + $0x10] sm:$0xff] }
0x139e   : > { %v3507_v60 = vpop.eup %3506  ;;  %v4362_v12 = vmul.f32 %v3505_v35, %v2474_v61  ;;  %3279 = vmatprep.mubr.msk.f32.mxu0 %vm421_vm0, %v3108_v10 }
0x139f   : > { %v4366_v14 = vmul.f32 %v3507_v60, %v2475_v4 }
0x13a0   : > { %v2506_v26 = vadd.f32 %v4360_v62, %v4362_v12 }
0x13a1   : > { %v2507_v20 = vadd.f32 %v4364_v16, %v4366_v14 }
0x13a4   : > { %v3509_v43 = vpop.eup %3508 }
0x13a5   : > { %v3511_v25 = vpop.eup %3510  ;;  %v4371_v22 = vmul.f32 %v3509_v43, %v2478_v30 }
0x13a6   : > { %v3513_v27 = vpop.eup %3512  ;;  %v4376_v21 = vmul.f32 %v3511_v25, %v2479_v5 }
0x13a7   : > { %v3515_v7 = vpop.eup %3514  ;;  %v4380_v39 = vmul.f32 %v3513_v27, %v2480_v38  ;;  %v2508_v17 = vadd.f32 %v2506_v26, %v4371_v22 }
0x13a8   : > { %v4383_v48 = vmul.f32 %v3515_v7, %v2481_v47  ;;  %v2509_v2 = vadd.f32 %v2507_v20, %v4376_v21  ;;  %v3115_v7 = vld [vmem:[%s4504_s7 + $0x28] sm:$0xff] }
0x13a9   : > { %v2510_v59 = vadd.f32 %v2508_v17, %v4380_v39  ;;  %v3116_v17 = vld [vmem:[%s4504_s7 + $0x30] sm:$0xff] }
0x13aa   : > { %v2511_v41 = vadd.f32 %v2509_v2, %v4383_v48  ;;  %v3117_v2 = vld [vmem:[%s4504_s7 + $0x38] sm:$0xff] }
0x13ac   : > { %v2512_v33 = vadd.f32 %v2511_v41, %v2510_v59  ;;  %v3075_v59 = vld [vmem:[%s4506_s9 + $0x128] sm:$0xff]  ;;  %v3074_v41 = vld [vmem:[%s4506_s9 + $0x120] sm:$0xff] }
0x13ae   : > { %2513 = vadd.xlane.f32.xlu0 %v2512_v33 }
0x13c4   : > { %2927 = vperm.xlu0 %3388, %v4395_v34  }
0x143b   : > { %v2514_v37 = vpop.xlane.xlu0 %2513 }
0x143c   : > { %v2515_v13 = vmul.f32 0.00390625, %v2514_v37 }
0x143e   : > { %3277 = vmatprep.subr.mxu0 %v2515_v13 }
0x143f   : > { %3278 = vmatpush3.msra.mxu0 %v2515_v13 }
0x1440   : > { %3280 = vmatmul.mubr.msk.f32.vlgmr.msra.gmra.mrb[28].mxu0 %vm421_vm0, %v3109_v31  ;;  %v3077_v31 = vld [vmem:[%s4506_s9 + $0x138] sm:$0xff] }
0x1441   : > { %3286 = vmatprep.mubr.msk.f32.mxu0 %vm1453_vm12, %v3114_v52 }
0x1513   : > { %v3281_v49 = vpop.f32.mrb[28].mxu0 }
0x1514   : > { %v2597_v55 = vadd.f32 %v3281_v49, %v3069_v36  ;;  %v2591_v51 = vpop.f32.mrb[29].mxu0  ;;  %v3076_v36 = vld [vmem:[%s4506_s9 + $0x130] sm:$0xff] }
0x1515   : > { %v2592_v53 = vadd.f32 %v3068_v18, %v2591_v51 }
0x1516   : > { %v2601_v58 = vmul.f32 %v3071_v6, %v2597_v55 }
0x1517   : > { %v2600_v44 = vmul.f32 %v3070_v19, %v2592_v53 }
0x1518   : > { %v2603_v56 = vadd.f32 %v3073_v54, %v2601_v58 }
0x1519   : > { %v2602_v50 = vadd.f32 %v3072_v57, %v2600_v44 }
0x151a   : > { %v2605_v8 = vmin.f32 %v2603_v56, 20.0 }
0x151b   : > { %v2604_v15 = vmin.f32 %v2602_v50, 20.0 }
0x151c   : > { %v2608_v35 = vmul.f32 1.442695, %v2605_v8 }
0x151d   : > { %v2606_v60 = vmul.f32 1.442695, %v2604_v15 }
0x151e   : > { %3516 = vpow2.f32 %v2608_v35 }
0x151f   : > { %3518 = vpow2.f32 %v2606_v60 }
0x1528   : > { %v3517_v1 = vpop.eup %3516 }
0x1529   : > { %v3519_v61 = vpop.eup %3518  ;;  %v2611_v3 = vadd.f32 1.0, %v3517_v1 }
0x152a   : > { %v2610_v23 = vadd.f32 1.0, %v3519_v61 }
0x152b   : > { %v2613_v4 = vmul.f32 %v2611_v3, %v2611_v3 }
0x152c   : > { %v2612_v63 = vmul.f32 %v2610_v23, %v2610_v23 }
0x152d   : > { %v2619_v24 = vadd.f32 1.0, %v2613_v4  ;;  %v3113_v30 = vadd.f32 -1.0, %v2613_v4 }
0x152e   : > { %v2618_v9 = vadd.f32 1.0, %v2612_v63  ;;  %v3112_v43 = vadd.f32 -1.0, %v2612_v63 }
0x152f   : > { %3520 = vrcp.f32 %v2619_v24  ;;  %v2617_v5 = vmul.f32 %v3113_v30, %v2603_v56 }
0x1530   : > { %3522 = vrcp.f32 %v2618_v9  ;;  %v2616_v38 = vmul.f32 %v3112_v43, %v2602_v50 }
0x1539   : > { %v3521_v25 = vpop.eup %3520 }
0x153a   : > { %v3523_v26 = vpop.eup %3522  ;;  %v2623_v27 = vmul.f32 %v3521_v25, %v2617_v5 }
0x153b   : > { %v2621_v47 = vmul.f32 %v3523_v26, %v2616_v38 }
0x153d   : > { %v3360_v20 = vpack.c.bf16 %v2623_v27, %v2621_v47 }
0x153f   : > { %3361 = vmatprep.subr.bf16.mxu0 %v3360_v20 }
0x1540   : > { %3363 = vmatpush3.bf16.msra.mxu0 %v3360_v20 }
0x1543   : > { %3287 = vmatmul.mubr.msk.f32.vlgmr.msra.gmra.mrb[30].mxu0 %vm1453_vm12, %v3115_v7 }
0x1544   : > { %3289 = vmatprep.mubr.msk.f32.mxu0 %vm1453_vm12, %v3116_v17 }
0x1547   : > { %3290 = vmatmul.mubr.msk.f32.gmra.mrb[32].mxu0 %vm1453_vm12, %v3117_v2 }
0x1616   : > { %v3288_v33 = vpop.f32.mrb[30].mxu0 }
0x1617   : > { %v2713_v10 = vadd.f32 %v3288_v33, %v3075_v59  ;;  %v2707_v37 = vpop.f32.mrb[31].mxu0 }
0x1618   : > { %v2708_v13 = vadd.f32 %v3074_v41, %v2707_v37 }
0x1619   : > { %v2754_v52 = vsel %vm1551_vm13, %v2713_v10, -inf }
0x161a   : > { %v2755_v18 = vrot.slane %v2754_v52, 4  ;;  %v2726_v6 = vsel %vm1551_vm13, %v2708_v13, -inf  ;;  %v3291_v49 = vpop.f32.mrb[32].mxu0 }
0x161b   : > { %v2727_v55 = vrot.slane %v2726_v6, 4  ;;  %v2723_v19 = vadd.f32 %v3291_v49, %v3077_v31  ;;  %v2717_v51 = vpop.f32.mrb[33].mxu0 }
0x161c   : > { %v2756_v54 = vmax.f32 %v2754_v52, %v2755_v18  ;;  %v2718_v53 = vadd.f32 %v3076_v36, %v2717_v51 }
0x161d   : > { %v2728_v58 = vmax.f32 %v2726_v6, %v2727_v55  ;;  %v2810_v57 = vsel %vm1551_vm13, %v2723_v19, -inf }
0x161e   : > { %v2757_v44 = vrot.slane %v2756_v54, 2  ;;  %v2811_v56 = vrot.slane %v2810_v57, 4  ;;  %v2782_v50 = vsel %vm1551_vm13, %v2718_v53, -inf }
0x161f   : > { %v2729_v8 = vrot.slane %v2728_v58, 2  ;;  %v2783_v15 = vrot.slane %v2782_v50, 4 }
0x1620   : > { %v2758_v35 = vmax.f32 %v2756_v54, %v2757_v44  ;;  %v2812_v60 = vmax.f32 %v2810_v57, %v2811_v56 }
0x1621   : > { %v2730_v1 = vmax.f32 %v2728_v58, %v2729_v8  ;;  %v2784_v61 = vmax.f32 %v2782_v50, %v2783_v15 }
0x1622   : > { %v2759_v3 = vrot.slane %v2758_v35, 1  ;;  %v2813_v23 = vrot.slane %v2812_v60, 2 }
0x1623   : > { %v2731_v4 = vrot.slane %v2730_v1, 1  ;;  %v2785_v63 = vrot.slane %v2784_v61, 2 }
0x1624   : > { %v2760_v24 = vmax.f32 %v2758_v35, %v2759_v3  ;;  %v2814_v9 = vmax.f32 %v2812_v60, %v2813_v23 }
0x1625   : > { %v2732_v30 = vmax.f32 %v2730_v1, %v2731_v4  ;;  %v2786_v43 = vmax.f32 %v2784_v61, %v2785_v63 }
0x1626   : > { %v2761_v5 = vsub.f32 %v2713_v10, %v2760_v24  ;;  %v2815_v25 = vrot.slane %v2814_v9, 1 }
0x1627   : > { %v2733_v38 = vsub.f32 %v2708_v13, %v2732_v30  ;;  %v2787_v26 = vrot.slane %v2786_v43, 1 }
0x1628   : > { %v2762_v27 = vmul.f32 1.442695, %v2761_v5  ;;  %v2816_v47 = vmax.f32 %v2814_v9, %v2815_v25 }
0x1629   : > { %v2734_v20 = vmul.f32 1.442695, %v2733_v38  ;;  %v2788_v7 = vmax.f32 %v2786_v43, %v2787_v26 }
0x162a   : > { %3524 = vpow2.f32 %v2762_v27  ;;  %v2817_v17 = vsub.f32 %v2723_v19, %v2816_v47 }
0x162b   : > { %3526 = vpow2.f32 %v2734_v20  ;;  %v2789_v2 = vsub.f32 %v2718_v53, %v2788_v7  ;;  %v2924_v20 = vld [vmem:[%s4507_s10 + $0x8] sm:$0xff]  ;;  %v3567_v7 = vmov 1  }
0x162c   : > { %v2818_v59 = vmul.f32 1.442695, %v2817_v17  ;;  %3391 = vset.pattern.permute.xlu0 %v3567_v7  ;;  %v1574_v17 = vpop.permute.xlu1 %1573 }
0x162d   : > { %v2790_v41 = vmul.f32 1.442695, %v2789_v2 }
0x162e   : > { %3528 = vpow2.f32 %v2818_v59 }
0x162f   : > { %3530 = vpow2.f32 %v2790_v41 }
0x1630   : > { %v1602_v2 = vpop.permute.xlu1 %1601 }
0x1634   : > { %v3525_v33 = vpop.eup %3524  ;;  %v1630_v59 = vpop.permute.xlu1 %1629 }
0x1635   : > { %v3527_v37 = vpop.eup %3526  ;;  %v2764_v31 = vsel %vm1551_vm13, %v3525_v33, 0.0 }
0x1636   : > { %v2765_v10 = vrot.slane %v2764_v31, 4  ;;  %v2736_v13 = vsel %vm1551_vm13, %v3527_v37, 0.0 }
0x1637   : > { %v2737_v52 = vrot.slane %v2736_v13, 4 }
0x1638   : > { %v3529_v36 = vpop.eup %3528  ;;  %v2766_v18 = vadd.f32 %v2765_v10, %v2764_v31  ;;  %v1658_v41 = vpop.permute.xlu1 %1657  ;;  %v1604_v31 = vmul.f32 %v1602_v2, %v4005_v28  ;;  %v1605_v10 = vmul.f32 %v1602_v2, %v4009_v11 }
0x1639   : > { %v3531_v6 = vpop.eup %3530  ;;  %v2738_v49 = vadd.f32 %v2737_v52, %v2736_v13  ;;  %v2820_v55 = vsel %vm1551_vm13, %v3529_v36, 0.0 }
0x163a   : > { %v2767_v19 = vrot.slane %v2766_v18, 2  ;;  %v2821_v51 = vrot.slane %v2820_v55, 4  ;;  %v2792_v54 = vsel %vm1551_vm13, %v3531_v6, 0.0 }
0x163b   : > { %v2739_v53 = vrot.slane %v2738_v49, 2  ;;  %v2793_v58 = vrot.slane %v2792_v54, 4 }
0x163c   : > { %v2768_v57 = vadd.f32 %v2767_v19, %v2766_v18  ;;  %v2822_v44 = vadd.f32 %v2821_v51, %v2820_v55  ;;  %v1577_v18 = vmul.f32 %v1574_v17, %v4011_v32 }
0x163d   : > { %v2740_v56 = vadd.f32 %v2739_v53, %v2738_v49  ;;  %v2794_v50 = vadd.f32 %v2793_v58, %v2792_v54 }
0x163e   : > { %v2769_v8 = vrot.slane %v2768_v57, 1  ;;  %v2823_v15 = vrot.slane %v2822_v44, 2  ;;  %v1607_v51 = vadd.f32 %v1605_v10, %v1577_v18 }
0x163f   : > { %v2741_v35 = vrot.slane %v2740_v56, 1  ;;  %v2795_v60 = vrot.slane %v2794_v50, 2 }
0x1640   : > { %v2824_v1 = vadd.f32 %v2823_v15, %v2822_v44  ;;  %v2770_v61 = vadd.f32 %v2769_v8, %v2768_v57 }
0x1641   : > { %v2796_v3 = vadd.f32 %v2795_v60, %v2794_v50  ;;  %v2742_v23 = vadd.f32 %v2741_v35, %v2740_v56 }
0x1642   : > { %3532 = vrcp.f32 %v2770_v61  ;;  %v2825_v63 = vrot.slane %v2824_v1, 1 }
0x1643   : > { %v2797_v4 = vrot.slane %v2796_v3, 1  ;;  %3534 = vrcp.f32 %v2742_v23 }
0x1644   : > { %v2826_v9 = vadd.f32 %v2825_v63, %v2824_v1 }
0x1645   : > { %v2798_v24 = vadd.f32 %v2797_v4, %v2796_v3  ;;  %v3544_v4 = vld [vmem:[%s3646_s22] sm:$0xff] }
0x1647   : > { %3536 = vrcp.f32 %v2798_v24 }
0x1648   : > { %3538 = vrcp.f32 %v2826_v9 }
0x164c   : > { %v3533_v30 = vpop.eup %3532 }
0x164d   : > { %v2772_v43 = vmul.f32 %v3533_v30, %v3525_v33  ;;  %v3535_v5 = vpop.eup %3534  ;;  %v3545_v30 = vld [vmem:[%s3646_s22 + $0x8] sm:$0xff] }
0x164e   : > { %v2744_v25 = vmul.f32 %v3535_v5, %v3527_v37 }
0x164f   : > { %2775 = vperm.xlu1 %3389, %v2772_v43  }
0x1651   : > { %v3537_v38 = vpop.eup %3536 }
0x1652   : > { %v2800_v26 = vmul.f32 %v3537_v38, %v3531_v6  ;;  %v3539_v27 = vpop.eup %3538  ;;  %v1633_v6 = vmul.f32 %v1630_v59, %v4021_v45 }
0x1653   : > { %2747 = vperm.xlu1 %3389, %v2744_v25   ;;  %v2828_v47 = vmul.f32 %v3539_v27, %v3529_v36  ;;  %v1576_v36 = vmul.f32 %v1574_v17, %v4007_v29  ;;  %v1661_v29 = vmul.f32 %v1658_v41, %v4030_v46  ;;  %v2839_v46 = vld [vmem:[%s4505_s8 + $0x8] sm:$0xff]  ;;  %v3546_v27 = vld [vmem:[%s3646_s22 + $0x10] sm:$0xff] }
0x1654   : > { %v1635_v53 = vadd.f32 %v1633_v6, %v1607_v51 }
0x1656   : > { %v1663_v44 = vadd.f32 %v1661_v29, %v1635_v53 }
0x1657   : > { %2803 = vperm.xlu1 %3389, %v2800_v26  }
0x165b   : > { %2831 = vperm.xlu1 %3389, %v2828_v47  }
0x165f   : > { %2932 = vperm.xlu1 %3389, %v2924_v20  }
0x1663   : > { %3390 = vset.pattern.permute.xlu1 %v3567_v7 }
0x1664   : > { %2940 = vperm.xlu1 %3390, %v4395_v34   ;;  %v1632_v34 = vmul.f32 %v1630_v59, %v4016_v42 }
0x1668   : > { %2944 = vperm.xlu1 %3390, %v2924_v20   ;;  %v3547_v20 = vld [vmem:[%s3646_s22 + $0x18] sm:$0xff] }
0x16ce   : > { %v2776_v33 = vpop.permute.xlu1 %2775 }
0x16cf   : > { %v2778_v55 = vmul.f32 %v2776_v33, %v4360_v62  ;;  %v2779_v19 = vmul.f32 %v2776_v33, %v4364_v16 }
0x16d2   : > { %v2748_v37 = vpop.permute.xlu1 %2747 }
0x16d3   : > { %v2750_v13 = vmul.f32 %v2748_v37, %v4362_v12  ;;  %v2751_v52 = vmul.f32 %v2748_v37, %v4366_v14  ;;  %v1606_v12 = vadd.f32 %v1604_v31, %v1576_v36  ;;  %v1660_v14 = vmul.f32 %v1658_v41, %v4025_v40  ;;  %v2838_v40 = vld [vmem:[%s4505_s8] sm:$0xff] }
0x16d5   : > { %v2780_v32 = vadd.f32 %v2778_v55, %v2750_v13  ;;  %v2781_v54 = vadd.f32 %v2779_v19, %v2751_v52  ;;  %v1634_v42 = vadd.f32 %v1632_v34, %v1606_v12 }
0x16d6   : > { %v2804_v49 = vpop.permute.xlu1 %2803 }
0x16d7   : > { %v2806_v28 = vmul.f32 %v2804_v49, %v4371_v22  ;;  %v2807_v11 = vmul.f32 %v2804_v49, %v4376_v21  ;;  %v1662_v22 = vadd.f32 %v1660_v14, %v1634_v42 }
0x16d9   : > { %v2808_v58 = vadd.f32 %v2806_v28, %v2780_v32  ;;  %v2809_v57 = vadd.f32 %v2807_v11, %v2781_v54 }
0x16da   : > { %v2832_v45 = vpop.permute.xlu1 %2831 }
0x16db   : > { %v2834_v62 = vmul.f32 %v2832_v45, %v4380_v39  ;;  %v2835_v16 = vmul.f32 %v2832_v45, %v4383_v48  ;;  %v2928_v48 = vpop.permute.xlu0 %2927 }
0x16dd   : > { %v2836_v21 = vadd.f32 %v2834_v62, %v2808_v58  ;;  %v2837_v56 = vadd.f32 %v2835_v16, %v2809_v57 }
0x16de   : > { %v2933_v39 = vpop.permute.xlu1 %2932 }
0x16df   : > { %v3366_v50 = vpack.c.bf16 %v2836_v21, %v1662_v22  ;;  %v3364_v8 = vpack.c.bf16 %v2837_v56, %v1663_v44 }
0x16e1   : > { %3365 = vmatprep.subr.bf16.mxu1 %v3364_v8 }
0x16e2   : > { %3367 = vmatpush1.bf16.msra.mxu1 %v3366_v50 }
0x16e3   : > { %v2941_v35 = vpop.permute.xlu1 %2940 }
0x16e5   : > { %3122 = vmatmul.mubr.msk.f32.vlgmr.msra.gmra.mrb[22].mxu1 %vm1453_vm12, %v2838_v40 }
0x16e6   : > { %2916 = vmatprep.mubr.f32.mxu1 %v3556_v0 }
0x16e7   : > { %v2945_v25 = vpop.permute.xlu1 %2944 }
0x16e9   : > { %3123 = vmatmul.mubr.msk.f32.gmra.mrb[24].mxu1 %vm1453_vm12, %v2839_v46 }
0x17b8   : > { %v2912_v15 = vpop.f32.mrb[22].mxu1 }
0x17b9   : > { %v2935_v60 = vmul.f32 %v2928_v48, %v2912_v15  ;;  %v2914_v1 = vpop.f32.mrb[23].mxu1 }
0x17ba   : > { %v2936_v61 = vmul.f32 %v2928_v48, %v2914_v1 }
0x17bb   : > { %v2947_v3 = vadd.f32 %v2941_v35, %v2935_v60 }
0x17bc   : > { %v2948_v0 = vadd.f32 %v2941_v35, %v2936_v61  ;;  %v2918_v23 = vpop.f32.mrb[24].mxu1 }
0x17bd   : > { %v2951_v63 = vadd.f32 %v3544_v4, %v2947_v3  ;;  %v2937_v24 = vmul.f32 %v2933_v39, %v2918_v23  ;;  %v2920_v9 = vpop.f32.mrb[25].mxu1 }
0x17be   : > { %v2952_v43 = vadd.f32 %v3545_v30, %v2948_v0  ;;  %v2938_v5 = vmul.f32 %v2933_v39, %v2920_v9 }
0x17bf   : > { %2955 = vst [vmem:[%s386_s14] sm:$0xff] %v2951_v63  ;;  %v2949_v38 = vadd.f32 %v2945_v25, %v2937_v24 }
0x17c0   : > { %2956 = vst [vmem:[%s386_s14 + $0x8] sm:$0xff] %v2952_v43  ;;  %v2950_v26 = vadd.f32 %v2945_v25, %v2938_v5 }
0x17c1   : > { %v2953_v47 = vadd.f32 %v3546_v27, %v2949_v38 }
0x17c2   : > { %v2954_v7 = vadd.f32 %v3547_v20, %v2950_v26 }
0x17c3   : > { %2957 = vst [vmem:[%s386_s14 + $0x10] sm:$0xff] %v2953_v47 }
0x17c4   : > { %2958 = vst [vmem:[%s386_s14 + $0x18] sm:$0xff] %v2954_v7 }
0x17c5 PF: > { %s21_s17 = sadd.s32 1, %s3554_s17  }
0x17c6   : > { %p18_p4 = scmp.ge.s32.totalorder %s21_s17, 4  }
0x17c8   :  { %20 = sbr.rel (!%p18_p4) target bundleno = 1 (0x1), region = 99 }

</bundles_post_ra>
